<compile_context>
chip_gen: v5e
topology: v5e:2x2
jax: 0.10.0
libtpu: 0.0.40
codegen_flags: <defaults>
</compile_context>

<pallas_src>
import functools

import jax
import jax.numpy as jnp
from jax.experimental import pallas as pl
from jax.experimental.pallas import tpu as pltpu

_NEG = -1e9


# ------------------------------ in-kernel helpers ------------------------------

def _layer_norm(x, gamma, beta, eps=1e-6):
    # x: (..., D) float32; gamma/beta: (1, D) float32
    mu = jnp.mean(x, axis=-1, keepdims=True)
    var = jnp.mean(jnp.square(x - mu), axis=-1, keepdims=True)
    return (x - mu) * jax.lax.rsqrt(var + eps) * gamma + beta


def _pad_bias(pad_row):
    # pad_row: (1, Lk) int32 key-pad indicator -> additive bias (1, 1, Lk) f32
    return jnp.where(pad_row != 0, 0.0, _NEG).astype(jnp.float32)[:, None, :]


def _attention(xq, xkv, bias, wq, wk, wv, wo, n_head, d_k, d_v):
    """Head-batched multi-head attention for one batch element.

    xq: (Lq, D) bf16, xkv: (Lk, D) bf16, bias: additive f32 mask broadcastable
    to (H, Lq, Lk).  Returns (Lq, D) float32 (pre-residual, pre-layernorm).
    """
    Lq = xq.shape[0]
    Lk = xkv.shape[0]
    inv_temp = 1.0 / (d_k ** 0.5)

    # Fused projections over all heads (one lane-dense MXU pass each).
    q = jnp.dot(xq, wq, preferred_element_type=jnp.float32) * inv_temp    # (Lq, H*dk)
    k = jnp.dot(xkv, wk, preferred_element_type=jnp.float32)              # (Lk, H*dk)
    v = jnp.dot(xkv, wv, preferred_element_type=jnp.float32)              # (Lk, H*dv)

    # One relayout per tensor, then fully head-batched einsums (no per-head loop).
    q = pltpu.einshape("qhd->hqd", q.reshape(Lq, n_head, d_k))            # (H, Lq, dk)
    k = pltpu.einshape("khd->hkd", k.reshape(Lk, n_head, d_k))            # (H, Lk, dk)
    v = pltpu.einshape("khd->hkd", v.reshape(Lk, n_head, d_v))            # (H, Lk, dv)

    s = jnp.einsum("hqd,hkd->hqk", q, k,
                   preferred_element_type=jnp.float32) + bias             # (H, Lq, Lk)
    s = s - jnp.max(s, axis=-1, keepdims=True)
    p = jnp.exp(s)
    p = p * pl.reciprocal(jnp.sum(p, axis=-1, keepdims=True), approx=True)
    ctx = jnp.einsum("hqk,hkd->hqd", p, v,
                     preferred_element_type=jnp.float32)                  # (H, Lq, dv)

    # Concat heads (single relayout) + one output-projection matmul.
    ctx = pltpu.einshape("hqd->qhd", ctx).reshape(Lq, n_head * d_v)
    return jnp.dot(ctx.astype(wo.dtype), wo, preferred_element_type=jnp.float32)


def _ffn(x2, w1, b1, w2, b2):
    # x2: (L, D) bf16 -> (L, D) float32
    h = jnp.dot(x2, w1, preferred_element_type=jnp.float32) + b1
    h = jnp.maximum(h, 0.0)
    return jnp.dot(h.astype(w2.dtype), w2, preferred_element_type=jnp.float32) + b2


# ------------------------------------ kernels -----------------------------------

def embed_norm_kernel(x_ref, pos_ref, g_ref, b_ref, out_ref):
    # x_ref: (B, L, D) bf16 embedded tokens, pos_ref: (L, D) f32 sinusoid slice
    x = x_ref[...].astype(jnp.float32) + pos_ref[...]
    out_ref[...] = _layer_norm(x, g_ref[...], b_ref[...]).astype(out_ref.dtype)


def enc_stack_kernel(n_head, d_k, d_v,
                     x_ref, kpad_ref,
                     wq, wk, wv, wo, ag, ab,
                     w1, b1, w2, b2, fg, fb,
                     out_ref):
    # grid = (B, n_layers); one batch element per block, layers streamed on axis 1.
    l = pl.program_id(1)
    _, L, D = x_ref.shape

    @pl.when(l == 0)
    def _():
        out_ref[...] = x_ref[...]          # layer-0 input = post-embed activation

    x2 = out_ref[...].reshape(L, D)        # bf16 activation carried across layers
    x_f32 = x2.astype(jnp.float32)
    bias = _pad_bias(kpad_ref[...])        # (1, 1, L)

    attn = _attention(x2, x2, bias, wq[...], wk[...], wv[...], wo[...],
                      n_head, d_k, d_v)
    h1 = _layer_norm(attn + x_f32, ag[...], ab[...])            # (L, D) f32

    ffn = _ffn(h1.astype(jnp.bfloat16), w1[...], b1[...], w2[...], b2[...])
    out = _layer_norm(ffn + h1, fg[...], fb[...])
    out_ref[...] = out.reshape(1, L, D).astype(out_ref.dtype)


def dec_stack_kernel(n_head, d_k, d_v,
                     y_ref, enc_ref, tpad_ref, spad_ref,
                     swq, swk, swv, swo, sg, sb,
                     cwq, cwk, cwv, cwo, cg, cb,
                     w1, b1, w2, b2, fg, fb,
                     out_ref):
    l = pl.program_id(1)
    _, Lt, D = y_ref.shape
    Ls = enc_ref.shape[1]

    @pl.when(l == 0)
    def _():
        out_ref[...] = y_ref[...]

    y2 = out_ref[...].reshape(Lt, D)
    y_f32 = y2.astype(jnp.float32)
    enc2 = enc_ref[...].reshape(Ls, D)

    # Additive masks, built once and shared by all heads.
    r = jax.lax.broadcasted_iota(jnp.int32, (Lt, Lt), 0)
    c = jax.lax.broadcasted_iota(jnp.int32, (Lt, Lt), 1)
    causal = jnp.where(r >= c, 0.0, _NEG).astype(jnp.float32)[None, :, :]  # (1, Lt, Lt)
    slf_bias = _pad_bias(tpad_ref[...]) + causal                           # (1, Lt, Lt)
    crs_bias = _pad_bias(spad_ref[...])                                    # (1, 1, Ls)

    # masked (causal + pad) self-attention
    slf = _attention(y2, y2, slf_bias, swq[...], swk[...], swv[...], swo[...],
                     n_head, d_k, d_v)
    h1 = _layer_norm(slf + y_f32, sg[...], sb[...])

    # encoder-decoder cross attention (src pad mask)
    crs = _attention(h1.astype(jnp.bfloat16), enc2, crs_bias,
                     cwq[...], cwk[...], cwv[...], cwo[...], n_head, d_k, d_v)
    h2 = _layer_norm(crs + h1, cg[...], cb[...])

    # position-wise FFN
    ffn = _ffn(h2.astype(jnp.bfloat16), w1[...], b1[...], w2[...], b2[...])
    out = _layer_norm(ffn + h2, fg[...], fb[...])
    out_ref[...] = out.reshape(1, Lt, D).astype(out_ref.dtype)


def proj_kernel(x_ref, wt_ref, out_ref):
    # x_ref: (TM, D) bf16 rows; wt_ref: (D, TN) bf16 pre-transposed, pre-scaled
    # shared embedding.  Output block is lane-dense f32.
    out_ref[...] = jnp.dot(x_ref[...], wt_ref[...],
                           preferred_element_type=jnp.float32)


# -------------------------------- pallas_call glue -------------------------------

_ENC_KEYS = ('wq', 'wk', 'wv', 'wo', 'ag', 'ab', 'w1', 'b1', 'w2', 'b2', 'fg', 'fb')
_DEC_KEYS = ('swq', 'swk', 'swv', 'swo', 'sg', 'sb',
             'cwq', 'cwk', 'cwv', 'cwo', 'cg', 'cb',
             'w1', 'b1', 'w2', 'b2', 'fg', 'fb')


def _stacked_spec(arr):
    # (n_layers, r0, r1) weight stack: stream one layer's (r0, r1) slice per step.
    _, r0, r1 = arr.shape
    return pl.BlockSpec((None, r0, r1), lambda b, l: (l, 0, 0))


def _maybe_vmem_limit(nbytes):
    # Raise the scoped-VMEM limit only when the estimated working set exceeds the
    # 32 MiB default; cap at 64 MiB so the same code still fits v7x physical VMEM.
    if nbytes > 30 * 1024 * 1024:
        return min(int(nbytes * 5 // 4), 64 * 1024 * 1024)
    return None


def _run_embed_norm(x_emb, pos, g, b):
    B, L, D = x_emb.shape
    return pl.pallas_call(
        embed_norm_kernel,
        out_shape=jax.ShapeDtypeStruct((B, L, D), jnp.bfloat16),
    )(x_emb, pos, g, b)


def _run_encoder_stack(x, src_pad3, ep, cfg):
    B, Ls, D = x.shape
    weights = [ep[k] for k in _ENC_KEYS]
    act_in_spec = pl.BlockSpec((1, Ls, D), lambda b, l: (b, 0, 0))
    act_out_spec = pl.BlockSpec((1, Ls, D), lambda b, l: (b, 0, 0))
    pad_spec = pl.BlockSpec((None, 1, Ls), lambda b, l: (b, 0, 0))
    # TODO(synk): at real sizes (large B*L / d_inner) additionally tile rows inside the
    # layer so the f32 FFN/score intermediates fit v7x's 64 MiB VMEM.
    return pl.pallas_call(
        functools.partial(enc_stack_kernel, cfg['n_head'], cfg['d_k'], cfg['d_v']),
        grid=(B, cfg['n_layers']),
        in_specs=[act_in_spec, pad_spec] + [_stacked_spec(w) for w in weights],
        out_specs=act_out_spec,
        out_shape=jax.ShapeDtypeStruct((B, Ls, D), jnp.bfloat16),
        compiler_params=pltpu.CompilerParams(
            dimension_semantics=("parallel", "arbitrary")),
    )(x, src_pad3, *weights)


def _run_decoder_stack(y, enc_out, trg_pad3, src_pad3, dp, cfg):
    B, Lt, D = y.shape
    Ls = enc_out.shape[1]
    weights = [dp[k] for k in _DEC_KEYS]
    act_in_spec = pl.BlockSpec((1, Lt, D), lambda b, l: (b, 0, 0))
    act_out_spec = pl.BlockSpec((1, Lt, D), lambda b, l: (b, 0, 0))
    enc_spec = pl.BlockSpec((1, Ls, D), lambda b, l: (b, 0, 0))
    tpad_spec = pl.BlockSpec((None, 1, Lt), lambda b, l: (b, 0, 0))
    spad_spec = pl.BlockSpec((None, 1, Ls), lambda b, l: (b, 0, 0))
    return pl.pallas_call(
        functools.partial(dec_stack_kernel, cfg['n_head'], cfg['d_k'], cfg['d_v']),
        grid=(B, cfg['n_layers']),
        in_specs=[act_in_spec, enc_spec, tpad_spec, spad_spec]
                 + [_stacked_spec(w) for w in weights],
        out_specs=act_out_spec,
        out_shape=jax.ShapeDtypeStruct((B, Lt, D), jnp.bfloat16),
        compiler_params=pltpu.CompilerParams(
            dimension_semantics=("parallel", "arbitrary")),
    )(y, enc_out, trg_pad3, src_pad3, *weights)


def _pick_tile(n, prefs):
    for t in prefs:
        if n % t == 0:
            return t
    return n


def _run_projection(x2, emb_t):
    # x2: (B*Lt, D) bf16, emb_t: (D, V) bf16 (scale_prj already folded in).
    M, D = x2.shape
    V = emb_t.shape[1]
    tm = _pick_tile(M, (256, 128))        # row tiles (multiple of 8 or full)
    tn = _pick_tile(V, (512, 256))        # lane-dense vocab tiles (>=256 for v6e/v7x MXU)
    vmem_need = 2 * (tm * D * 2 + D * tn * 2 + tm * tn * 4)   # double-buffered blocks
    return pl.pallas_call(
        proj_kernel,
        grid=(M // tm, V // tn),
        in_specs=[pl.BlockSpec((tm, D), lambda i, j: (i, 0)),
                  pl.BlockSpec((D, tn), lambda i, j: (0, j))],
        out_specs=pl.BlockSpec((tm, tn), lambda i, j: (i, j)),
        out_shape=jax.ShapeDtypeStruct((M, V), jnp.float32),
        compiler_params=pltpu.CompilerParams(
            dimension_semantics=("parallel", "parallel"),
            vmem_limit_bytes=_maybe_vmem_limit(vmem_need)),
    )(x2, emb_t)


# ---------------------------------- parameters -----------------------------------

def sinusoid_table(n_position, d_hid):
    pos = jnp.arange(n_position, dtype=jnp.float32)[:, None]
    j = jnp.arange(d_hid)
    angle = pos / jnp.power(10000.0, (2.0 * (j // 2)).astype(jnp.float32) / d_hid)
    return jnp.where(j % 2 == 0, jnp.sin(angle), jnp.cos(angle)).astype(jnp.float32)


def init_params(key, cfg):
    D, DI = cfg['d_model'], cfg['d_inner']
    H, DK, DV = cfg['n_head'], cfg['d_k'], cfg['d_v']
    V, nl = cfg['n_vocab'], cfg['n_layers']
    keys = iter(jax.random.split(key, 1024))

    def xavier(shape):
        lim = (6.0 / (shape[-2] + shape[-1])) ** 0.5
        return jax.random.uniform(next(keys), shape, jnp.float32,
                                  -lim, lim).astype(jnp.bfloat16)

    def xavier_stack(shape):
        return jnp.stack([xavier(shape) for _ in range(nl)], axis=0)

    def gamma_stack(d):
        return jnp.ones((nl, 1, d), jnp.float32)

    def beta_stack(d):
        return jnp.zeros((nl, 1, d), jnp.float32)

    enc = dict(
        wq=xavier_stack((D, H * DK)), wk=xavier_stack((D, H * DK)),
        wv=xavier_stack((D, H * DV)), wo=xavier_stack((H * DV, D)),
        ag=gamma_stack(D), ab=beta_stack(D),
        w1=xavier_stack((D, DI)), b1=beta_stack(DI),
        w2=xavier_stack((DI, D)), b2=beta_stack(D),
        fg=gamma_stack(D), fb=beta_stack(D))
    dec = dict(
        swq=xavier_stack((D, H * DK)), swk=xavier_stack((D, H * DK)),
        swv=xavier_stack((D, H * DV)), swo=xavier_stack((H * DV, D)),
        sg=gamma_stack(D), sb=beta_stack(D),
        cwq=xavier_stack((D, H * DK)), cwk=xavier_stack((D, H * DK)),
        cwv=xavier_stack((D, H * DV)), cwo=xavier_stack((H * DV, D)),
        cg=gamma_stack(D), cb=beta_stack(D),
        w1=xavier_stack((D, DI)), b1=beta_stack(DI),
        w2=xavier_stack((DI, D)), b2=beta_stack(D),
        fg=gamma_stack(D), fb=beta_stack(D))

    emb = xavier((V, D))          # shared: src emb == trg emb == output projection
    # scale_prj (d_model**-0.5) folded into the pre-transposed projection weight.
    emb_t = (emb.astype(jnp.float32).T * (float(D) ** -0.5)).astype(jnp.bfloat16)

    return dict(
        emb=emb, emb_t=emb_t, pos=sinusoid_table(cfg['n_position'], D),
        enc_g=jnp.ones((1, D), jnp.float32), enc_b=jnp.zeros((1, D), jnp.float32),
        dec_g=jnp.ones((1, D), jnp.float32), dec_b=jnp.zeros((1, D), jnp.float32),
        enc=enc, dec=dec)


# ------------------------------------ forward ------------------------------------

def transformer_forward(params, src_seq, trg_seq, cfg):
    pad = cfg['pad_idx']
    D = cfg['d_model']
    B, Ls = src_seq.shape
    Lt = trg_seq.shape[1]

    # (B, 1, L) int32 key-pad indicators; full masks are built inside the kernels.
    src_pad3 = (src_seq != pad).astype(jnp.int32)[:, None, :]
    trg_pad3 = (trg_seq != pad).astype(jnp.int32)[:, None, :]
    pos = params['pos']

    # TODO(synk): move the embedding gather into the embed kernel via
    # PrefetchScalarGridSpec + pl.Element row gather (currently XLA glue).
    x = params['emb'][src_seq]
    x = _run_embed_norm(x, pos[:Ls], params['enc_g'], params['enc_b'])
    enc_out = _run_encoder_stack(x, src_pad3, params['enc'], cfg)

    y = params['emb'][trg_seq]
    y = _run_embed_norm(y, pos[:Lt], params['dec_g'], params['dec_b'])
    dec_out = _run_decoder_stack(y, enc_out, trg_pad3, src_pad3, params['dec'], cfg)

    # Shared-weight vocab projection; scale_prj already folded into emb_t.
    logits = _run_projection(dec_out.reshape(B * Lt, D), params['emb_t'])
    return logits                                               # (B*Lt, V)


# -------------------------------------- main --------------------------------------

if __name__ == "__main__":
    cfg = dict(n_vocab=64, pad_idx=0, d_model=32, d_inner=64,
               n_layers=2, n_head=4, d_k=8, d_v=8, n_position=32)
    B, Ls, Lt = 2, 8, 8

    key = jax.random.PRNGKey(0)
    k_src, k_trg, k_par = jax.random.split(key, 3)
    src_seq = jax.random.randint(k_src, (B, Ls), 1, cfg['n_vocab'], dtype=jnp.int32)
    trg_seq = jax.random.randint(k_trg, (B, Lt), 1, cfg['n_vocab'], dtype=jnp.int32)
    # introduce some padding tokens to exercise the masks
    src_seq = src_seq.at[:, -2:].set(cfg['pad_idx'])
    trg_seq = trg_seq.at[:, -1:].set(cfg['pad_idx'])

    params = init_params(k_par, cfg)

    fwd = jax.jit(functools.partial(transformer_forward, params, cfg=cfg))
    logits = jax.block_until_ready(fwd(src_seq, trg_seq))

    assert logits.shape == (B * Lt, cfg['n_vocab'])
    assert bool(jnp.all(jnp.isfinite(logits)))
    print("KERNEL_OK")
</pallas_src>

<mosaic_0001>
module attributes {stable_mosaic.version = 11 : i64} {
  func.func @embed_norm_kernel(%arg0: memref<2x8x32xbf16, #tpu.memory_space<vmem>>, %arg1: memref<8x32xf32, #tpu.memory_space<vmem>>, %arg2: memref<1x32xf32, #tpu.memory_space<vmem>>, %arg3: memref<1x32xf32, #tpu.memory_space<vmem>>, %arg4: memref<2x8x32xbf16, #tpu.memory_space<vmem>>) attributes {dimension_semantics = [], scalar_prefetch = 0 : i64, scratch_operands = 0 : i64, tpu.core_type = #tpu.core_type<tc>} {
    %c0 = arith.constant 0 : index
    %c0_0 = arith.constant 0 : index
    %c0_1 = arith.constant 0 : index
    %0 = vector.load %arg0[%c0, %c0_0, %c0_1] : memref<2x8x32xbf16, #tpu.memory_space<vmem>>, vector<2x8x32xbf16>
    %1 = arith.extf %0 : vector<2x8x32xbf16> to vector<2x8x32xf32>
    %c0_2 = arith.constant 0 : index
    %c0_3 = arith.constant 0 : index
    %2 = vector.load %arg1[%c0_2, %c0_3] : memref<8x32xf32, #tpu.memory_space<vmem>>, vector<8x32xf32>
    %3 = vector.shape_cast %2 : vector<8x32xf32> to vector<1x8x32xf32>
    %4 = vector.broadcast %3 : vector<1x8x32xf32> to vector<2x8x32xf32>
    %5 = arith.addf %1, %4 : vector<2x8x32xf32>
    %c0_4 = arith.constant 0 : index
    %c0_5 = arith.constant 0 : index
    %6 = vector.load %arg2[%c0_4, %c0_5] : memref<1x32xf32, #tpu.memory_space<vmem>>, vector<1x32xf32>
    %c0_6 = arith.constant 0 : index
    %c0_7 = arith.constant 0 : index
    %7 = vector.load %arg3[%c0_6, %c0_7] : memref<1x32xf32, #tpu.memory_space<vmem>>, vector<1x32xf32>
    %cst = arith.constant dense<0.000000e+00> : vector<2x8xf32>
    %8 = vector.multi_reduction <add>, %5, %cst [2] : vector<2x8x32xf32> to vector<2x8xf32>
    %9 = vector.shape_cast %8 : vector<2x8xf32> to vector<2x8x1xf32>
    %cst_8 = arith.constant 3.200000e+01 : f32
    %10 = vector.broadcast %cst_8 : f32 to vector<2x8x1xf32>
    %11 = arith.divf %9, %10 : vector<2x8x1xf32>
    %12 = vector.broadcast %11 : vector<2x8x1xf32> to vector<2x8x32xf32>
    %13 = arith.subf %5, %12 : vector<2x8x32xf32>
    %14 = arith.mulf %13, %13 : vector<2x8x32xf32>
    %cst_9 = arith.constant dense<0.000000e+00> : vector<2x8xf32>
    %15 = vector.multi_reduction <add>, %14, %cst_9 [2] : vector<2x8x32xf32> to vector<2x8xf32>
    %16 = vector.shape_cast %15 : vector<2x8xf32> to vector<2x8x1xf32>
    %cst_10 = arith.constant 3.200000e+01 : f32
    %17 = vector.broadcast %cst_10 : f32 to vector<2x8x1xf32>
    %18 = arith.divf %16, %17 : vector<2x8x1xf32>
    %19 = vector.broadcast %11 : vector<2x8x1xf32> to vector<2x8x32xf32>
    %20 = arith.subf %5, %19 : vector<2x8x32xf32>
    %cst_11 = arith.constant 9.99999997E-7 : f32
    %21 = vector.broadcast %cst_11 : f32 to vector<2x8x1xf32>
    %22 = arith.addf %18, %21 : vector<2x8x1xf32>
    %23 = math.rsqrt %22 : vector<2x8x1xf32>
    %24 = vector.broadcast %23 : vector<2x8x1xf32> to vector<2x8x32xf32>
    %25 = arith.mulf %20, %24 : vector<2x8x32xf32>
    %26 = vector.shape_cast %6 : vector<1x32xf32> to vector<1x1x32xf32>
    %27 = vector.broadcast %26 : vector<1x1x32xf32> to vector<2x8x32xf32>
    %28 = arith.mulf %25, %27 : vector<2x8x32xf32>
    %29 = vector.shape_cast %7 : vector<1x32xf32> to vector<1x1x32xf32>
    %30 = vector.broadcast %29 : vector<1x1x32xf32> to vector<2x8x32xf32>
    %31 = arith.addf %28, %30 : vector<2x8x32xf32>
    %32 = arith.truncf %31 : vector<2x8x32xf32> to vector<2x8x32xbf16>
    %c0_12 = arith.constant 0 : index
    %c0_13 = arith.constant 0 : index
    %c0_14 = arith.constant 0 : index
    %33 = vector.load %arg4[%c0_12, %c0_13, %c0_14] : memref<2x8x32xbf16, #tpu.memory_space<vmem>>, vector<2x8x32xbf16>
    tpu.vector_store %arg4[%c0_12, %c0_13, %c0_14], %32 {strides = array<i32>} : memref<2x8x32xbf16, #tpu.memory_space<vmem>>, vector<2x8x32xbf16>,
    return
  }
}

module attributes {stable_mosaic.version = 11 : i64} {
  func.func @embed_norm_kernel(%arg0: memref<2x8x32xbf16, #tpu.memory_space<vmem>>, %arg1: memref<8x32xf32, #tpu.memory_space<vmem>>, %arg2: memref<1x32xf32, #tpu.memory_space<vmem>>, %arg3: memref<1x32xf32, #tpu.memory_space<vmem>>, %arg4: memref<2x8x32xbf16, #tpu.memory_space<vmem>>) attributes {dimension_semantics = [], scalar_prefetch = 0 : i64, scratch_operands = 0 : i64, tpu.core_type = #tpu.core_type<tc>} {
    %c0 = arith.constant 0 : index
    %c0_0 = arith.constant 0 : index
    %c0_1 = arith.constant 0 : index
    %0 = vector.load %arg0[%c0, %c0_0, %c0_1] : memref<2x8x32xbf16, #tpu.memory_space<vmem>>, vector<2x8x32xbf16>
    %1 = arith.extf %0 : vector<2x8x32xbf16> to vector<2x8x32xf32>
    %c0_2 = arith.constant 0 : index
    %c0_3 = arith.constant 0 : index
    %2 = vector.load %arg1[%c0_2, %c0_3] : memref<8x32xf32, #tpu.memory_space<vmem>>, vector<8x32xf32>
    %3 = vector.shape_cast %2 : vector<8x32xf32> to vector<1x8x32xf32>
    %4 = vector.broadcast %3 : vector<1x8x32xf32> to vector<2x8x32xf32>
    %5 = arith.addf %1, %4 : vector<2x8x32xf32>
    %c0_4 = arith.constant 0 : index
    %c0_5 = arith.constant 0 : index
    %6 = vector.load %arg2[%c0_4, %c0_5] : memref<1x32xf32, #tpu.memory_space<vmem>>, vector<1x32xf32>
    %c0_6 = arith.constant 0 : index
    %c0_7 = arith.constant 0 : index
    %7 = vector.load %arg3[%c0_6, %c0_7] : memref<1x32xf32, #tpu.memory_space<vmem>>, vector<1x32xf32>
    %cst = arith.constant dense<0.000000e+00> : vector<2x8xf32>
    %8 = vector.multi_reduction <add>, %5, %cst [2] : vector<2x8x32xf32> to vector<2x8xf32>
    %9 = vector.shape_cast %8 : vector<2x8xf32> to vector<2x8x1xf32>
    %cst_8 = arith.constant 3.200000e+01 : f32
    %10 = vector.broadcast %cst_8 : f32 to vector<2x8x1xf32>
    %11 = arith.divf %9, %10 : vector<2x8x1xf32>
    %12 = vector.broadcast %11 : vector<2x8x1xf32> to vector<2x8x32xf32>
    %13 = arith.subf %5, %12 : vector<2x8x32xf32>
    %14 = arith.mulf %13, %13 : vector<2x8x32xf32>
    %cst_9 = arith.constant dense<0.000000e+00> : vector<2x8xf32>
    %15 = vector.multi_reduction <add>, %14, %cst_9 [2] : vector<2x8x32xf32> to vector<2x8xf32>
    %16 = vector.shape_cast %15 : vector<2x8xf32> to vector<2x8x1xf32>
    %cst_10 = arith.constant 3.200000e+01 : f32
    %17 = vector.broadcast %cst_10 : f32 to vector<2x8x1xf32>
    %18 = arith.divf %16, %17 : vector<2x8x1xf32>
    %19 = vector.broadcast %11 : vector<2x8x1xf32> to vector<2x8x32xf32>
    %20 = arith.subf %5, %19 : vector<2x8x32xf32>
    %cst_11 = arith.constant 9.99999997E-7 : f32
    %21 = vector.broadcast %cst_11 : f32 to vector<2x8x1xf32>
    %22 = arith.addf %18, %21 : vector<2x8x1xf32>
    %23 = math.rsqrt %22 : vector<2x8x1xf32>
    %24 = vector.broadcast %23 : vector<2x8x1xf32> to vector<2x8x32xf32>
    %25 = arith.mulf %20, %24 : vector<2x8x32xf32>
    %26 = vector.shape_cast %6 : vector<1x32xf32> to vector<1x1x32xf32>
    %27 = vector.broadcast %26 : vector<1x1x32xf32> to vector<2x8x32xf32>
    %28 = arith.mulf %25, %27 : vector<2x8x32xf32>
    %29 = vector.shape_cast %7 : vector<1x32xf32> to vector<1x1x32xf32>
    %30 = vector.broadcast %29 : vector<1x1x32xf32> to vector<2x8x32xf32>
    %31 = arith.addf %28, %30 : vector<2x8x32xf32>
    %32 = arith.truncf %31 : vector<2x8x32xf32> to vector<2x8x32xbf16>
    %c0_12 = arith.constant 0 : index
    %c0_13 = arith.constant 0 : index
    %c0_14 = arith.constant 0 : index
    %33 = vector.load %arg4[%c0_12, %c0_13, %c0_14] : memref<2x8x32xbf16, #tpu.memory_space<vmem>>, vector<2x8x32xbf16>
    tpu.vector_store %arg4[%c0_12, %c0_13, %c0_14], %32 {strides = array<i32>} : memref<2x8x32xbf16, #tpu.memory_space<vmem>>, vector<2x8x32xbf16>,
    return
  }
}

module attributes {stable_mosaic.version = 11 : i64} {
  func.func @enc_stack_kernel(%arg0: i32, %arg1: i32, %arg2: memref<1x8x32xbf16, #tpu.memory_space<vmem>>, %arg3: memref<1x1x8xi32, #tpu.memory_space<vmem>>, %arg4: memref<1x32x32xbf16, #tpu.memory_space<vmem>>, %arg5: memref<1x32x32xbf16, #tpu.memory_space<vmem>>, %arg6: memref<1x32x32xbf16, #tpu.memory_space<vmem>>, %arg7: memref<1x32x32xbf16, #tpu.memory_space<vmem>>, %arg8: memref<1x1x32xf32, #tpu.memory_space<vmem>>, %arg9: memref<1x1x32xf32, #tpu.memory_space<vmem>>, %arg10: memref<1x32x64xbf16, #tpu.memory_space<vmem>>, %arg11: memref<1x1x64xf32, #tpu.memory_space<vmem>>, %arg12: memref<1x64x32xbf16, #tpu.memory_space<vmem>>, %arg13: memref<1x1x32xf32, #tpu.memory_space<vmem>>, %arg14: memref<1x1x32xf32, #tpu.memory_space<vmem>>, %arg15: memref<1x1x32xf32, #tpu.memory_space<vmem>>, %arg16: memref<1x8x32xbf16, #tpu.memory_space<vmem>>) attributes {dimension_semantics = [#tpu.dimension_semantics<parallel>, #tpu.dimension_semantics<arbitrary>], iteration_bounds = array<i64: 2, 2>, scalar_prefetch = 0 : i64, scratch_operands = 0 : i64, tpu.core_type = #tpu.core_type<tc>, window_params = [{transform_indices = @transform_0, window_bounds = array<i64: 1, 8, 32>}, {transform_indices = @transform_1, window_bounds = array<i64: 1, 1, 8>}, {transform_indices = @transform_2, window_bounds = array<i64: 1, 32, 32>}, {transform_indices = @transform_3, window_bounds = array<i64: 1, 32, 32>}, {transform_indices = @transform_4, window_bounds = array<i64: 1, 32, 32>}, {transform_indices = @transform_5, window_bounds = array<i64: 1, 32, 32>}, {transform_indices = @transform_6, window_bounds = array<i64: 1, 1, 32>}, {transform_indices = @transform_7, window_bounds = array<i64: 1, 1, 32>}, {transform_indices = @transform_8, window_bounds = array<i64: 1, 32, 64>}, {transform_indices = @transform_9, window_bounds = array<i64: 1, 1, 64>}, {transform_indices = @transform_10, window_bounds = array<i64: 1, 64, 32>}, {transform_indices = @transform_11, window_bounds = array<i64: 1, 1, 32>}, {transform_indices = @transform_12, window_bounds = array<i64: 1, 1, 32>}, {transform_indices = @transform_13, window_bounds = array<i64: 1, 1, 32>}, {transform_indices = @transform_14, window_bounds = array<i64: 1, 8, 32>}]} {
    %c0_i32 = arith.constant 0 : i32
    %0 = arith.cmpi eq, %arg1, %c0_i32 : i32
    %1 = arith.extui %0 : i1 to i32
    %c0_i32_0 = arith.constant 0 : i32
    %2 = arith.cmpi ne, %1, %c0_i32_0 : i32
    scf.if %2 {
      %c0_69 = arith.constant 0 : index
      %c0_70 = arith.constant 0 : index
      %c0_71 = arith.constant 0 : index
      %126 = vector.load %arg2[%c0_69, %c0_70, %c0_71] : memref<1x8x32xbf16, #tpu.memory_space<vmem>>, vector<1x8x32xbf16>
      %c0_72 = arith.constant 0 : index
      %c0_73 = arith.constant 0 : index
      %c0_74 = arith.constant 0 : index
      %127 = vector.load %arg16[%c0_72, %c0_73, %c0_74] : memref<1x8x32xbf16, #tpu.memory_space<vmem>>, vector<1x8x32xbf16>
      tpu.vector_store %arg16[%c0_72, %c0_73, %c0_74], %126 {strides = array<i32>} : memref<1x8x32xbf16, #tpu.memory_space<vmem>>, vector<1x8x32xbf16>,
    } else {
    }
    %c0 = arith.constant 0 : index
    %c0_1 = arith.constant 0 : index
    %c0_2 = arith.constant 0 : index
    %3 = vector.load %arg16[%c0, %c0_1, %c0_2] : memref<1x8x32xbf16, #tpu.memory_space<vmem>>, vector<1x8x32xbf16>
    %4 = vector.shape_cast %3 : vector<1x8x32xbf16> to vector<8x32xbf16>
    %5 = arith.extf %4 : vector<8x32xbf16> to vector<8x32xf32>
    %c0_3 = arith.constant 0 : index
    %c0_4 = arith.constant 0 : index
    %c0_5 = arith.constant 0 : index
    %6 = vector.load %arg3[%c0_3, %c0_4, %c0_5] : memref<1x1x8xi32, #tpu.memory_space<vmem>>, vector<1x1x8xi32>
    %7 = vector.shape_cast %6 : vector<1x1x8xi32> to vector<1x8xi32>
    %c0_i32_6 = arith.constant 0 : i32
    %8 = vector.broadcast %c0_i32_6 : i32 to vector<1x8xi32>
    %9 = arith.cmpi ne, %7, %8 : vector<1x8xi32>
    %cst = arith.constant 0.000000e+00 : f32
    %cst_7 = arith.constant -1.000000e+09 : f32
    %10 = vector.broadcast %cst : f32 to vector<1x8xf32>
    %11 = vector.broadcast %cst_7 : f32 to vector<1x8xf32>
    %12 = arith.select %9, %10, %11 : vector<1x8xi1>, vector<1x8xf32>
    %13 = vector.shape_cast %12 : vector<1x8xf32> to vector<1x1x8xf32>
    %c0_8 = arith.constant 0 : index
    %c0_9 = arith.constant 0 : index
    %c0_10 = arith.constant 0 : index
    %14 = vector.load %arg4[%c0_8, %c0_9, %c0_10] : memref<1x32x32xbf16, #tpu.memory_space<vmem>>, vector<1x32x32xbf16>
    %15 = vector.shape_cast %14 : vector<1x32x32xbf16> to vector<32x32xbf16>
    %c0_11 = arith.constant 0 : index
    %c0_12 = arith.constant 0 : index
    %c0_13 = arith.constant 0 : index
    %16 = vector.load %arg5[%c0_11, %c0_12, %c0_13] : memref<1x32x32xbf16, #tpu.memory_space<vmem>>, vector<1x32x32xbf16>
    %17 = vector.shape_cast %16 : vector<1x32x32xbf16> to vector<32x32xbf16>
    %c0_14 = arith.constant 0 : index
    %c0_15 = arith.constant 0 : index
    %c0_16 = arith.constant 0 : index
    %18 = vector.load %arg6[%c0_14, %c0_15, %c0_16] : memref<1x32x32xbf16, #tpu.memory_space<vmem>>, vector<1x32x32xbf16>
    %19 = vector.shape_cast %18 : vector<1x32x32xbf16> to vector<32x32xbf16>
    %c0_17 = arith.constant 0 : index
    %c0_18 = arith.constant 0 : index
    %c0_19 = arith.constant 0 : index
    %20 = vector.load %arg7[%c0_17, %c0_18, %c0_19] : memref<1x32x32xbf16, #tpu.memory_space<vmem>>, vector<1x32x32xbf16>
    %21 = vector.shape_cast %20 : vector<1x32x32xbf16> to vector<32x32xbf16>
    %cst_20 = arith.constant dense<0.000000e+00> : vector<8x32xf32>
    %22 = tpu.matmul %4, %15, %cst_20 {dimension_numbers = #tpu.dot_dimension_numbers<[1], [0], [0], [1], [0, 0, 1, 1], [], []>} : vector<8x32xbf16>, vector<32x32xbf16>, vector<8x32xf32> -> vector<8x32xf32>
    %cst_21 = arith.constant 0.353553385 : f32
    %23 = vector.broadcast %cst_21 : f32 to vector<8x32xf32>
    %24 = arith.mulf %22, %23 : vector<8x32xf32>
    %cst_22 = arith.constant dense<0.000000e+00> : vector<8x32xf32>
    %25 = tpu.matmul %4, %17, %cst_22 {dimension_numbers = #tpu.dot_dimension_numbers<[1], [0], [0], [1], [0, 0, 1, 1], [], []>} : vector<8x32xbf16>, vector<32x32xbf16>, vector<8x32xf32> -> vector<8x32xf32>
    %cst_23 = arith.constant dense<0.000000e+00> : vector<8x32xf32>
    %26 = tpu.matmul %4, %19, %cst_23 {dimension_numbers = #tpu.dot_dimension_numbers<[1], [0], [0], [1], [0, 0, 1, 1], [], []>} : vector<8x32xbf16>, vector<32x32xbf16>, vector<8x32xf32> -> vector<8x32xf32>
    %27 = vector.shape_cast %24 : vector<8x32xf32> to vector<8x4x8xf32>
    %28 = tpu.transpose %27, [1, 0, 2] : vector<8x4x8xf32> -> vector<4x8x8xf32>
    %29 = vector.shape_cast %25 : vector<8x32xf32> to vector<8x4x8xf32>
    %30 = tpu.transpose %29, [1, 0, 2] : vector<8x4x8xf32> -> vector<4x8x8xf32>
    %31 = vector.shape_cast %26 : vector<8x32xf32> to vector<8x4x8xf32>
    %32 = tpu.transpose %31, [1, 0, 2] : vector<8x4x8xf32> -> vector<4x8x8xf32>
    "tpu.trace_start"() <{level = 10 : i32, message = "hqd,hkd->hqk"}> : () -> ()
    %cst_24 = arith.constant dense<0.000000e+00> : vector<4x8x8xf32>
    %33 = tpu.matmul %28, %30, %cst_24 {dimension_numbers = #tpu.dot_dimension_numbers<[2], [2], [1], [1], [0, 0, 0, 1, 1, 1], [0], [0]>} : vector<4x8x8xf32>, vector<4x8x8xf32>, vector<4x8x8xf32> -> vector<4x8x8xf32>
    "tpu.trace_stop"() : () -> ()
    %34 = vector.broadcast %13 : vector<1x1x8xf32> to vector<4x8x8xf32>
    %35 = arith.addf %33, %34 : vector<4x8x8xf32>
    %cst_25 = arith.constant dense<0xFF800000> : vector<4x8xf32>
    %36 = vector.multi_reduction <maximumf>, %35, %cst_25 [2] : vector<4x8x8xf32> to vector<4x8xf32>
    %37 = vector.shape_cast %36 : vector<4x8xf32> to vector<4x8x1xf32>
    %38 = vector.broadcast %37 : vector<4x8x1xf32> to vector<4x8x8xf32>
    %39 = arith.subf %35, %38 : vector<4x8x8xf32>
    %40 = math.exp %39 : vector<4x8x8xf32>
    %cst_26 = arith.constant dense<0.000000e+00> : vector<4x8xf32>
    %41 = vector.multi_reduction <add>, %40, %cst_26 [2] : vector<4x8x8xf32> to vector<4x8xf32>
    %42 = vector.shape_cast %41 : vector<4x8xf32> to vector<4x8x1xf32>
    %43 = tpu.reciprocal %42 {approx = true} : vector<4x8x1xf32> -> vector<4x8x1xf32>
    %44 = vector.broadcast %43 : vector<4x8x1xf32> to vector<4x8x8xf32>
    %45 = arith.mulf %40, %44 : vector<4x8x8xf32>
    "tpu.trace_start"() <{level = 10 : i32, message = "hqk,hkd->hqd"}> : () -> ()
    %cst_27 = arith.constant dense<0.000000e+00> : vector<4x8x8xf32>
    %46 = tpu.matmul %45, %32, %cst_27 {dimension_numbers = #tpu.dot_dimension_numbers<[2], [1], [1], [2], [0, 0, 0, 1, 1, 2], [0], [0]>} : vector<4x8x8xf32>, vector<4x8x8xf32>, vector<4x8x8xf32> -> vector<4x8x8xf32>
    "tpu.trace_stop"() : () -> ()
    %47 = tpu.transpose %46, [1, 0, 2] : vector<4x8x8xf32> -> vector<8x4x8xf32>
    %48 = vector.shape_cast %47 : vector<8x4x8xf32> to vector<8x32xf32>
    %49 = arith.truncf %48 : vector<8x32xf32> to vector<8x32xbf16>
    %cst_28 = arith.constant dense<0.000000e+00> : vector<8x32xf32>
    %50 = tpu.matmul %49, %21, %cst_28 {dimension_numbers = #tpu.dot_dimension_numbers<[1], [0], [0], [1], [0, 0, 1, 1], [], []>} : vector<8x32xbf16>, vector<32x32xbf16>, vector<8x32xf32> -> vector<8x32xf32>
    %51 = arith.addf %50, %5 : vector<8x32xf32>
    %c0_29 = arith.constant 0 : index
    %c0_30 = arith.constant 0 : index
    %c0_31 = arith.constant 0 : index
    %52 = vector.load %arg8[%c0_29, %c0_30, %c0_31] : memref<1x1x32xf32, #tpu.memory_space<vmem>>, vector<1x1x32xf32>
    %53 = vector.shape_cast %52 : vector<1x1x32xf32> to vector<1x32xf32>
    %c0_32 = arith.constant 0 : index
    %c0_33 = arith.constant 0 : index
    %c0_34 = arith.constant 0 : index
    %54 = vector.load %arg9[%c0_32, %c0_33, %c0_34] : memref<1x1x32xf32, #tpu.memory_space<vmem>>, vector<1x1x32xf32>
    %55 = vector.shape_cast %54 : vector<1x1x32xf32> to vector<1x32xf32>
    %cst_35 = arith.constant dense<0.000000e+00> : vector<8xf32>
    %56 = vector.multi_reduction <add>, %51, %cst_35 [1] : vector<8x32xf32> to vector<8xf32>
    %57 = vector.shape_cast %56 : vector<8xf32> to vector<8x1xf32>
    %cst_36 = arith.constant 3.200000e+01 : f32
    %58 = vector.broadcast %cst_36 : f32 to vector<8x1xf32>
    %59 = arith.divf %57, %58 : vector<8x1xf32>
    %60 = vector.broadcast %59 : vector<8x1xf32> to vector<8x32xf32>
    %61 = arith.subf %51, %60 : vector<8x32xf32>
    %62 = arith.mulf %61, %61 : vector<8x32xf32>
    %cst_37 = arith.constant dense<0.000000e+00> : vector<8xf32>
    %63 = vector.multi_reduction <add>, %62, %cst_37 [1] : vector<8x32xf32> to vector<8xf32>
    %64 = vector.shape_cast %63 : vector<8xf32> to vector<8x1xf32>
    %cst_38 = arith.constant 3.200000e+01 : f32
    %65 = vector.broadcast %cst_38 : f32 to vector<8x1xf32>
    %66 = arith.divf %64, %65 : vector<8x1xf32>
    %67 = vector.broadcast %59 : vector<8x1xf32> to vector<8x32xf32>
    %68 = arith.subf %51, %67 : vector<8x32xf32>
    %cst_39 = arith.constant 9.99999997E-7 : f32
    %69 = vector.broadcast %cst_39 : f32 to vector<8x1xf32>
    %70 = arith.addf %66, %69 : vector<8x1xf32>
    %71 = math.rsqrt %70 : vector<8x1xf32>
    %72 = vector.broadcast %71 : vector<8x1xf32> to vector<8x32xf32>
    %73 = arith.mulf %68, %72 : vector<8x32xf32>
    %74 = vector.broadcast %53 : vector<1x32xf32> to vector<8x32xf32>
    %75 = arith.mulf %73, %74 : vector<8x32xf32>
    %76 = vector.broadcast %55 : vector<1x32xf32> to vector<8x32xf32>
    %77 = arith.addf %75, %76 : vector<8x32xf32>
    %78 = arith.truncf %77 : vector<8x32xf32> to vector<8x32xbf16>
    %c0_40 = arith.constant 0 : index
    %c0_41 = arith.constant 0 : index
    %c0_42 = arith.constant 0 : index
    %79 = vector.load %arg10[%c0_40, %c0_41, %c0_42] : memref<1x32x64xbf16, #tpu.memory_space<vmem>>, vector<1x32x64xbf16>
    %80 = vector.shape_cast %79 : vector<1x32x64xbf16> to vector<32x64xbf16>
    %c0_43 = arith.constant 0 : index
    %c0_44 = arith.constant 0 : index
    %c0_45 = arith.constant 0 : index
    %81 = vector.load %arg11[%c0_43, %c0_44, %c0_45] : memref<1x1x64xf32, #tpu.memory_space<vmem>>, vector<1x1x64xf32>
    %82 = vector.shape_cast %81 : vector<1x1x64xf32> to vector<1x64xf32>
    %c0_46 = arith.constant 0 : index
    %c0_47 = arith.constant 0 : index
    %c0_48 = arith.constant 0 : index
    %83 = vector.load %arg12[%c0_46, %c0_47, %c0_48] : memref<1x64x32xbf16, #tpu.memory_space<vmem>>, vector<1x64x32xbf16>
    %84 = vector.shape_cast %83 : vector<1x64x32xbf16> to vector<64x32xbf16>
    %c0_49 = arith.constant 0 : index
    %c0_50 = arith.constant 0 : index
    %c0_51 = arith.constant 0 : index
    %85 = vector.load %arg13[%c0_49, %c0_50, %c0_51] : memref<1x1x32xf32, #tpu.memory_space<vmem>>, vector<1x1x32xf32>
    %86 = vector.shape_cast %85 : vector<1x1x32xf32> to vector<1x32xf32>
    %cst_52 = arith.constant dense<0.000000e+00> : vector<8x64xf32>
    %87 = tpu.matmul %78, %80, %cst_52 {dimension_numbers = #tpu.dot_dimension_numbers<[1], [0], [0], [1], [0, 0, 1, 1], [], []>} : vector<8x32xbf16>, vector<32x64xbf16>, vector<8x64xf32> -> vector<8x64xf32>
    %88 = vector.broadcast %82 : vector<1x64xf32> to vector<8x64xf32>
    %89 = arith.addf %87, %88 : vector<8x64xf32>
    %cst_53 = arith.constant 0.000000e+00 : f32
    %90 = vector.broadcast %cst_53 : f32 to vector<8x64xf32>
    %91 = arith.maximumf %89, %90 : vector<8x64xf32>
    %92 = arith.truncf %91 : vector<8x64xf32> to vector<8x64xbf16>
    %cst_54 = arith.constant dense<0.000000e+00> : vector<8x32xf32>
    %93 = tpu.matmul %92, %84, %cst_54 {dimension_numbers = #tpu.dot_dimension_numbers<[1], [0], [0], [1], [0, 0, 1, 1], [], []>} : vector<8x64xbf16>, vector<64x32xbf16>, vector<8x32xf32> -> vector<8x32xf32>
    %94 = vector.broadcast %86 : vector<1x32xf32> to vector<8x32xf32>
    %95 = arith.addf %93, %94 : vector<8x32xf32>
    %96 = arith.addf %95, %77 : vector<8x32xf32>
    %c0_55 = arith.constant 0 : index
    %c0_56 = arith.constant 0 : index
    %c0_57 = arith.constant 0 : index
    %97 = vector.load %arg14[%c0_55, %c0_56, %c0_57] : memref<1x1x32xf32, #tpu.memory_space<vmem>>, vector<1x1x32xf32>
    %98 = vector.shape_cast %97 : vector<1x1x32xf32> to vector<1x32xf32>
    %c0_58 = arith.constant 0 : index
    %c0_59 = arith.constant 0 : index
    %c0_60 = arith.constant 0 : index
    %99 = vector.load %arg15[%c0_58, %c0_59, %c0_60] : memref<1x1x32xf32, #tpu.memory_space<vmem>>, vector<1x1x32xf32>
    %100 = vector.shape_cast %99 : vector<1x1x32xf32> to vector<1x32xf32>
    %cst_61 = arith.constant dense<0.000000e+00> : vector<8xf32>
    %101 = vector.multi_reduction <add>, %96, %cst_61 [1] : vector<8x32xf32> to vector<8xf32>
    %102 = vector.shape_cast %101 : vector<8xf32> to vector<8x1xf32>
    %cst_62 = arith.constant 3.200000e+01 : f32
    %103 = vector.broadcast %cst_62 : f32 to vector<8x1xf32>
    %104 = arith.divf %102, %103 : vector<8x1xf32>
    %105 = vector.broadcast %104 : vector<8x1xf32> to vector<8x32xf32>
    %106 = arith.subf %96, %105 : vector<8x32xf32>
    %107 = arith.mulf %106, %106 : vector<8x32xf32>
    %cst_63 = arith.constant dense<0.000000e+00> : vector<8xf32>
    %108 = vector.multi_reduction <add>, %107, %cst_63 [1] : vector<8x32xf32> to vector<8xf32>
    %109 = vector.shape_cast %108 : vector<8xf32> to vector<8x1xf32>
    %cst_64 = arith.constant 3.200000e+01 : f32
    %110 = vector.broadcast %cst_64 : f32 to vector<8x1xf32>
    %111 = arith.divf %109, %110 : vector<8x1xf32>
    %112 = vector.broadcast %104 : vector<8x1xf32> to vector<8x32xf32>
    %113 = arith.subf %96, %112 : vector<8x32xf32>
    %cst_65 = arith.constant 9.99999997E-7 : f32
    %114 = vector.broadcast %cst_65 : f32 to vector<8x1xf32>
    %115 = arith.addf %111, %114 : vector<8x1xf32>
    %116 = math.rsqrt %115 : vector<8x1xf32>
    %117 = vector.broadcast %116 : vector<8x1xf32> to vector<8x32xf32>
    %118 = arith.mulf %113, %117 : vector<8x32xf32>
    %119 = vector.broadcast %98 : vector<1x32xf32> to vector<8x32xf32>
    %120 = arith.mulf %118, %119 : vector<8x32xf32>
    %121 = vector.broadcast %100 : vector<1x32xf32> to vector<8x32xf32>
    %122 = arith.addf %120, %121 : vector<8x32xf32>
    %123 = vector.shape_cast %122 : vector<8x32xf32> to vector<1x8x32xf32>
    %124 = arith.truncf %123 : vector<1x8x32xf32> to vector<1x8x32xbf16>
    %c0_66 = arith.constant 0 : index
    %c0_67 = arith.constant 0 : index
    %c0_68 = arith.constant 0 : index
    %125 = vector.load %arg16[%c0_66, %c0_67, %c0_68] : memref<1x8x32xbf16, #tpu.memory_space<vmem>>, vector<1x8x32xbf16>
    tpu.vector_store %arg16[%c0_66, %c0_67, %c0_68], %124 {strides = array<i32>} : memref<1x8x32xbf16, #tpu.memory_space<vmem>>, vector<1x8x32xbf16>,
    return
  }
  func.func @transform_0(%arg0: i32, %arg1: i32) -> (i32, i32, i32) {
    %c0_i32 = arith.constant 0 : i32
    %c0_i32_0 = arith.constant 0 : i32
    %c0_i32_1 = arith.constant 0 : i32
    return %arg0, %c0_i32, %c0_i32_0 : i32, i32, i32
  }
  func.func @transform_1(%arg0: i32, %arg1: i32) -> (i32, i32, i32) {
    %c0_i32 = arith.constant 0 : i32
    %c0_i32_0 = arith.constant 0 : i32
    %c0_i32_1 = arith.constant 0 : i32
    return %arg0, %c0_i32, %c0_i32_0 : i32, i32, i32
  }
  func.func @transform_2(%arg0: i32, %arg1: i32) -> (i32, i32, i32) {
    %c0_i32 = arith.constant 0 : i32
    %c0_i32_0 = arith.constant 0 : i32
    %c0_i32_1 = arith.constant 0 : i32
    return %arg1, %c0_i32, %c0_i32_0 : i32, i32, i32
  }
  func.func @transform_3(%arg0: i32, %arg1: i32) -> (i32, i32, i32) {
    %c0_i32 = arith.constant 0 : i32
    %c0_i32_0 = arith.constant 0 : i32
    %c0_i32_1 = arith.constant 0 : i32
    return %arg1, %c0_i32, %c0_i32_0 : i32, i32, i32
  }
  func.func @transform_4(%arg0: i32, %arg1: i32) -> (i32, i32, i32) {
    %c0_i32 = arith.constant 0 : i32
    %c0_i32_0 = arith.constant 0 : i32
    %c0_i32_1 = arith.constant 0 : i32
    return %arg1, %c0_i32, %c0_i32_0 : i32, i32, i32
  }
  func.func @transform_5(%arg0: i32, %arg1: i32) -> (i32, i32, i32) {
    %c0_i32 = arith.constant 0 : i32
    %c0_i32_0 = arith.constant 0 : i32
    %c0_i32_1 = arith.constant 0 : i32
    return %arg1, %c0_i32, %c0_i32_0 : i32, i32, i32
  }
  func.func @transform_6(%arg0: i32, %arg1: i32) -> (i32, i32, i32) {
    %c0_i32 = arith.constant 0 : i32
    %c0_i32_0 = arith.constant 0 : i32
    %c0_i32_1 = arith.constant 0 : i32
    return %arg1, %c0_i32, %c0_i32_0 : i32, i32, i32
  }
  func.func @transform_7(%arg0: i32, %arg1: i32) -> (i32, i32, i32) {
    %c0_i32 = arith.constant 0 : i32
    %c0_i32_0 = arith.constant 0 : i32
    %c0_i32_1 = arith.constant 0 : i32
    return %arg1, %c0_i32, %c0_i32_0 : i32, i32, i32
  }
  func.func @transform_8(%arg0: i32, %arg1: i32) -> (i32, i32, i32) {
    %c0_i32 = arith.constant 0 : i32
    %c0_i32_0 = arith.constant 0 : i32
    %c0_i32_1 = arith.constant 0 : i32
    return %arg1, %c0_i32, %c0_i32_0 : i32, i32, i32
  }
  func.func @transform_9(%arg0: i32, %arg1: i32) -> (i32, i32, i32) {
    %c0_i32 = arith.constant 0 : i32
    %c0_i32_0 = arith.constant 0 : i32
    %c0_i32_1 = arith.constant 0 : i32
    return %arg1, %c0_i32, %c0_i32_0 : i32, i32, i32
  }
  func.func @transform_10(%arg0: i32, %arg1: i32) -> (i32, i32, i32) {
    %c0_i32 = arith.constant 0 : i32
    %c0_i32_0 = arith.constant 0 : i32
    %c0_i32_1 = arith.constant 0 : i32
    return %arg1, %c0_i32, %c0_i32_0 : i32, i32, i32
  }
  func.func @transform_11(%arg0: i32, %arg1: i32) -> (i32, i32, i32) {
    %c0_i32 = arith.constant 0 : i32
    %c0_i32_0 = arith.constant 0 : i32
    %c0_i32_1 = arith.constant 0 : i32
    return %arg1, %c0_i32, %c0_i32_0 : i32, i32, i32
  }
  func.func @transform_12(%arg0: i32, %arg1: i32) -> (i32, i32, i32) {
    %c0_i32 = arith.constant 0 : i32
    %c0_i32_0 = arith.constant 0 : i32
    %c0_i32_1 = arith.constant 0 : i32
    return %arg1, %c0_i32, %c0_i32_0 : i32, i32, i32
  }
  func.func @transform_13(%arg0: i32, %arg1: i32) -> (i32, i32, i32) {
    %c0_i32 = arith.constant 0 : i32
    %c0_i32_0 = arith.constant 0 : i32
    %c0_i32_1 = arith.constant 0 : i32
    return %arg1, %c0_i32, %c0_i32_0 : i32, i32, i32
  }
  func.func @transform_14(%arg0: i32, %arg1: i32) -> (i32, i32, i32) {
    %c0_i32 = arith.constant 0 : i32
    %c0_i32_0 = arith.constant 0 : i32
    %c0_i32_1 = arith.constant 0 : i32
    return %arg0, %c0_i32, %c0_i32_0 : i32, i32, i32
  }
}

module attributes {stable_mosaic.version = 11 : i64} {
  func.func @dec_stack_kernel(%arg0: i32, %arg1: i32, %arg2: memref<1x8x32xbf16, #tpu.memory_space<vmem>>, %arg3: memref<1x8x32xbf16, #tpu.memory_space<vmem>>, %arg4: memref<1x1x8xi32, #tpu.memory_space<vmem>>, %arg5: memref<1x1x8xi32, #tpu.memory_space<vmem>>, %arg6: memref<1x32x32xbf16, #tpu.memory_space<vmem>>, %arg7: memref<1x32x32xbf16, #tpu.memory_space<vmem>>, %arg8: memref<1x32x32xbf16, #tpu.memory_space<vmem>>, %arg9: memref<1x32x32xbf16, #tpu.memory_space<vmem>>, %arg10: memref<1x1x32xf32, #tpu.memory_space<vmem>>, %arg11: memref<1x1x32xf32, #tpu.memory_space<vmem>>, %arg12: memref<1x32x32xbf16, #tpu.memory_space<vmem>>, %arg13: memref<1x32x32xbf16, #tpu.memory_space<vmem>>, %arg14: memref<1x32x32xbf16, #tpu.memory_space<vmem>>, %arg15: memref<1x32x32xbf16, #tpu.memory_space<vmem>>, %arg16: memref<1x1x32xf32, #tpu.memory_space<vmem>>, %arg17: memref<1x1x32xf32, #tpu.memory_space<vmem>>, %arg18: memref<1x32x64xbf16, #tpu.memory_space<vmem>>, %arg19: memref<1x1x64xf32, #tpu.memory_space<vmem>>, %arg20: memref<1x64x32xbf16, #tpu.memory_space<vmem>>, %arg21: memref<1x1x32xf32, #tpu.memory_space<vmem>>, %arg22: memref<1x1x32xf32, #tpu.memory_space<vmem>>, %arg23: memref<1x1x32xf32, #tpu.memory_space<vmem>>, %arg24: memref<1x8x32xbf16, #tpu.memory_space<vmem>>) attributes {dimension_semantics = [#tpu.dimension_semantics<parallel>, #tpu.dimension_semantics<arbitrary>], iteration_bounds = array<i64: 2, 2>, scalar_prefetch = 0 : i64, scratch_operands = 0 : i64, tpu.core_type = #tpu.core_type<tc>, window_params = [{transform_indices = @transform_0, window_bounds = array<i64: 1, 8, 32>}, {transform_indices = @transform_1, window_bounds = array<i64: 1, 8, 32>}, {transform_indices = @transform_2, window_bounds = array<i64: 1, 1, 8>}, {transform_indices = @transform_3, window_bounds = array<i64: 1, 1, 8>}, {transform_indices = @transform_4, window_bounds = array<i64: 1, 32, 32>}, {transform_indices = @transform_5, window_bounds = array<i64: 1, 32, 32>}, {transform_indices = @transform_6, window_bounds = array<i64: 1, 32, 32>}, {transform_indices = @transform_7, window_bounds = array<i64: 1, 32, 32>}, {transform_indices = @transform_8, window_bounds = array<i64: 1, 1, 32>}, {transform_indices = @transform_9, window_bounds = array<i64: 1, 1, 32>}, {transform_indices = @transform_10, window_bounds = array<i64: 1, 32, 32>}, {transform_indices = @transform_11, window_bounds = array<i64: 1, 32, 32>}, {transform_indices = @transform_12, window_bounds = array<i64: 1, 32, 32>}, {transform_indices = @transform_13, window_bounds = array<i64: 1, 32, 32>}, {transform_indices = @transform_14, window_bounds = array<i64: 1, 1, 32>}, {transform_indices = @transform_15, window_bounds = array<i64: 1, 1, 32>}, {transform_indices = @transform_16, window_bounds = array<i64: 1, 32, 64>}, {transform_indices = @transform_17, window_bounds = array<i64: 1, 1, 64>}, {transform_indices = @transform_18, window_bounds = array<i64: 1, 64, 32>}, {transform_indices = @transform_19, window_bounds = array<i64: 1, 1, 32>}, {transform_indices = @transform_20, window_bounds = array<i64: 1, 1, 32>}, {transform_indices = @transform_21, window_bounds = array<i64: 1, 1, 32>}, {transform_indices = @transform_22, window_bounds = array<i64: 1, 8, 32>}]} {
    %c0_i32 = arith.constant 0 : i32
    %0 = arith.cmpi eq, %arg1, %c0_i32 : i32
    %1 = arith.extui %0 : i1 to i32
    %c0_i32_0 = arith.constant 0 : i32
    %2 = arith.cmpi ne, %1, %c0_i32_0 : i32
    scf.if %2 {
      %c0_112 = arith.constant 0 : index
      %c0_113 = arith.constant 0 : index
      %c0_114 = arith.constant 0 : index
      %210 = vector.load %arg2[%c0_112, %c0_113, %c0_114] : memref<1x8x32xbf16, #tpu.memory_space<vmem>>, vector<1x8x32xbf16>
      %c0_115 = arith.constant 0 : index
      %c0_116 = arith.constant 0 : index
      %c0_117 = arith.constant 0 : index
      %211 = vector.load %arg24[%c0_115, %c0_116, %c0_117] : memref<1x8x32xbf16, #tpu.memory_space<vmem>>, vector<1x8x32xbf16>
      tpu.vector_store %arg24[%c0_115, %c0_116, %c0_117], %210 {strides = array<i32>} : memref<1x8x32xbf16, #tpu.memory_space<vmem>>, vector<1x8x32xbf16>,
    } else {
    }
    %c0 = arith.constant 0 : index
    %c0_1 = arith.constant 0 : index
    %c0_2 = arith.constant 0 : index
    %3 = vector.load %arg24[%c0, %c0_1, %c0_2] : memref<1x8x32xbf16, #tpu.memory_space<vmem>>, vector<1x8x32xbf16>
    %4 = vector.shape_cast %3 : vector<1x8x32xbf16> to vector<8x32xbf16>
    %5 = arith.extf %4 : vector<8x32xbf16> to vector<8x32xf32>
    %c0_3 = arith.constant 0 : index
    %c0_4 = arith.constant 0 : index
    %c0_5 = arith.constant 0 : index
    %6 = vector.load %arg3[%c0_3, %c0_4, %c0_5] : memref<1x8x32xbf16, #tpu.memory_space<vmem>>, vector<1x8x32xbf16>
    %7 = vector.shape_cast %6 : vector<1x8x32xbf16> to vector<8x32xbf16>
    %8 = tpu.iota {dimensions = array<i32: 0>} : vector<8x8xi32>
    %9 = tpu.iota {dimensions = array<i32: 1>} : vector<8x8xi32>
    %10 = arith.cmpi sge, %8, %9 : vector<8x8xi32>
    %cst = arith.constant 0.000000e+00 : f32
    %cst_6 = arith.constant -1.000000e+09 : f32
    %11 = vector.broadcast %cst : f32 to vector<8x8xf32>
    %12 = vector.broadcast %cst_6 : f32 to vector<8x8xf32>
    %13 = arith.select %10, %11, %12 : vector<8x8xi1>, vector<8x8xf32>
    %14 = vector.shape_cast %13 : vector<8x8xf32> to vector<1x8x8xf32>
    %c0_7 = arith.constant 0 : index
    %c0_8 = arith.constant 0 : index
    %c0_9 = arith.constant 0 : index
    %15 = vector.load %arg4[%c0_7, %c0_8, %c0_9] : memref<1x1x8xi32, #tpu.memory_space<vmem>>, vector<1x1x8xi32>
    %16 = vector.shape_cast %15 : vector<1x1x8xi32> to vector<1x8xi32>
    %c0_i32_10 = arith.constant 0 : i32
    %17 = vector.broadcast %c0_i32_10 : i32 to vector<1x8xi32>
    %18 = arith.cmpi ne, %16, %17 : vector<1x8xi32>
    %cst_11 = arith.constant 0.000000e+00 : f32
    %cst_12 = arith.constant -1.000000e+09 : f32
    %19 = vector.broadcast %cst_11 : f32 to vector<1x8xf32>
    %20 = vector.broadcast %cst_12 : f32 to vector<1x8xf32>
    %21 = arith.select %18, %19, %20 : vector<1x8xi1>, vector<1x8xf32>
    %22 = vector.shape_cast %21 : vector<1x8xf32> to vector<1x1x8xf32>
    %23 = vector.broadcast %22 : vector<1x1x8xf32> to vector<1x8x8xf32>
    %24 = arith.addf %23, %14 : vector<1x8x8xf32>
    %c0_13 = arith.constant 0 : index
    %c0_14 = arith.constant 0 : index
    %c0_15 = arith.constant 0 : index
    %25 = vector.load %arg5[%c0_13, %c0_14, %c0_15] : memref<1x1x8xi32, #tpu.memory_space<vmem>>, vector<1x1x8xi32>
    %26 = vector.shape_cast %25 : vector<1x1x8xi32> to vector<1x8xi32>
    %c0_i32_16 = arith.constant 0 : i32
    %27 = vector.broadcast %c0_i32_16 : i32 to vector<1x8xi32>
    %28 = arith.cmpi ne, %26, %27 : vector<1x8xi32>
    %cst_17 = arith.constant 0.000000e+00 : f32
    %cst_18 = arith.constant -1.000000e+09 : f32
    %29 = vector.broadcast %cst_17 : f32 to vector<1x8xf32>
    %30 = vector.broadcast %cst_18 : f32 to vector<1x8xf32>
    %31 = arith.select %28, %29, %30 : vector<1x8xi1>, vector<1x8xf32>
    %32 = vector.shape_cast %31 : vector<1x8xf32> to vector<1x1x8xf32>
    %c0_19 = arith.constant 0 : index
    %c0_20 = arith.constant 0 : index
    %c0_21 = arith.constant 0 : index
    %33 = vector.load %arg6[%c0_19, %c0_20, %c0_21] : memref<1x32x32xbf16, #tpu.memory_space<vmem>>, vector<1x32x32xbf16>
    %34 = vector.shape_cast %33 : vector<1x32x32xbf16> to vector<32x32xbf16>
    %c0_22 = arith.constant 0 : index
    %c0_23 = arith.constant 0 : index
    %c0_24 = arith.constant 0 : index
    %35 = vector.load %arg7[%c0_22, %c0_23, %c0_24] : memref<1x32x32xbf16, #tpu.memory_space<vmem>>, vector<1x32x32xbf16>
    %36 = vector.shape_cast %35 : vector<1x32x32xbf16> to vector<32x32xbf16>
    %c0_25 = arith.constant 0 : index
    %c0_26 = arith.constant 0 : index
    %c0_27 = arith.constant 0 : index
    %37 = vector.load %arg8[%c0_25, %c0_26, %c0_27] : memref<1x32x32xbf16, #tpu.memory_space<vmem>>, vector<1x32x32xbf16>
    %38 = vector.shape_cast %37 : vector<1x32x32xbf16> to vector<32x32xbf16>
    %c0_28 = arith.constant 0 : index
    %c0_29 = arith.constant 0 : index
    %c0_30 = arith.constant 0 : index
    %39 = vector.load %arg9[%c0_28, %c0_29, %c0_30] : memref<1x32x32xbf16, #tpu.memory_space<vmem>>, vector<1x32x32xbf16>
    %40 = vector.shape_cast %39 : vector<1x32x32xbf16> to vector<32x32xbf16>
    %cst_31 = arith.constant dense<0.000000e+00> : vector<8x32xf32>
    %41 = tpu.matmul %4, %34, %cst_31 {dimension_numbers = #tpu.dot_dimension_numbers<[1], [0], [0], [1], [0, 0, 1, 1], [], []>} : vector<8x32xbf16>, vector<32x32xbf16>, vector<8x32xf32> -> vector<8x32xf32>
    %cst_32 = arith.constant 0.353553385 : f32
    %42 = vector.broadcast %cst_32 : f32 to vector<8x32xf32>
    %43 = arith.mulf %41, %42 : vector<8x32xf32>
    %cst_33 = arith.constant dense<0.000000e+00> : vector<8x32xf32>
    %44 = tpu.matmul %4, %36, %cst_33 {dimension_numbers = #tpu.dot_dimension_numbers<[1], [0], [0], [1], [0, 0, 1, 1], [], []>} : vector<8x32xbf16>, vector<32x32xbf16>, vector<8x32xf32> -> vector<8x32xf32>
    %cst_34 = arith.constant dense<0.000000e+00> : vector<8x32xf32>
    %45 = tpu.matmul %4, %38, %cst_34 {dimension_numbers = #tpu.dot_dimension_numbers<[1], [0], [0], [1], [0, 0, 1, 1], [], []>} : vector<8x32xbf16>, vector<32x32xbf16>, vector<8x32xf32> -> vector<8x32xf32>
    %46 = vector.shape_cast %43 : vector<8x32xf32> to vector<8x4x8xf32>
    %47 = tpu.transpose %46, [1, 0, 2] : vector<8x4x8xf32> -> vector<4x8x8xf32>
    %48 = vector.shape_cast %44 : vector<8x32xf32> to vector<8x4x8xf32>
    %49 = tpu.transpose %48, [1, 0, 2] : vector<8x4x8xf32> -> vector<4x8x8xf32>
    %50 = vector.shape_cast %45 : vector<8x32xf32> to vector<8x4x8xf32>
    %51 = tpu.transpose %50, [1, 0, 2] : vector<8x4x8xf32> -> vector<4x8x8xf32>
    "tpu.trace_start"() <{level = 10 : i32, message = "hqd,hkd->hqk"}> : () -> ()
    %cst_35 = arith.constant dense<0.000000e+00> : vector<4x8x8xf32>
    %52 = tpu.matmul %47, %49, %cst_35 {dimension_numbers = #tpu.dot_dimension_numbers<[2], [2], [1], [1], [0, 0, 0, 1, 1, 1], [0], [0]>} : vector<4x8x8xf32>, vector<4x8x8xf32>, vector<4x8x8xf32> -> vector<4x8x8xf32>
    "tpu.trace_stop"() : () -> ()
    %53 = vector.broadcast %24 : vector<1x8x8xf32> to vector<4x8x8xf32>
    %54 = arith.addf %52, %53 : vector<4x8x8xf32>
    %cst_36 = arith.constant dense<0xFF800000> : vector<4x8xf32>
    %55 = vector.multi_reduction <maximumf>, %54, %cst_36 [2] : vector<4x8x8xf32> to vector<4x8xf32>
    %56 = vector.shape_cast %55 : vector<4x8xf32> to vector<4x8x1xf32>
    %57 = vector.broadcast %56 : vector<4x8x1xf32> to vector<4x8x8xf32>
    %58 = arith.subf %54, %57 : vector<4x8x8xf32>
    %59 = math.exp %58 : vector<4x8x8xf32>
    %cst_37 = arith.constant dense<0.000000e+00> : vector<4x8xf32>
    %60 = vector.multi_reduction <add>, %59, %cst_37 [2] : vector<4x8x8xf32> to vector<4x8xf32>
    %61 = vector.shape_cast %60 : vector<4x8xf32> to vector<4x8x1xf32>
    %62 = tpu.reciprocal %61 {approx = true} : vector<4x8x1xf32> -> vector<4x8x1xf32>
    %63 = vector.broadcast %62 : vector<4x8x1xf32> to vector<4x8x8xf32>
    %64 = arith.mulf %59, %63 : vector<4x8x8xf32>
    "tpu.trace_start"() <{level = 10 : i32, message = "hqk,hkd->hqd"}> : () -> ()
    %cst_38 = arith.constant dense<0.000000e+00> : vector<4x8x8xf32>
    %65 = tpu.matmul %64, %51, %cst_38 {dimension_numbers = #tpu.dot_dimension_numbers<[2], [1], [1], [2], [0, 0, 0, 1, 1, 2], [0], [0]>} : vector<4x8x8xf32>, vector<4x8x8xf32>, vector<4x8x8xf32> -> vector<4x8x8xf32>
    "tpu.trace_stop"() : () -> ()
    %66 = tpu.transpose %65, [1, 0, 2] : vector<4x8x8xf32> -> vector<8x4x8xf32>
    %67 = vector.shape_cast %66 : vector<8x4x8xf32> to vector<8x32xf32>
    %68 = arith.truncf %67 : vector<8x32xf32> to vector<8x32xbf16>
    %cst_39 = arith.constant dense<0.000000e+00> : vector<8x32xf32>
    %69 = tpu.matmul %68, %40, %cst_39 {dimension_numbers = #tpu.dot_dimension_numbers<[1], [0], [0], [1], [0, 0, 1, 1], [], []>} : vector<8x32xbf16>, vector<32x32xbf16>, vector<8x32xf32> -> vector<8x32xf32>
    %70 = arith.addf %69, %5 : vector<8x32xf32>
    %c0_40 = arith.constant 0 : index
    %c0_41 = arith.constant 0 : index
    %c0_42 = arith.constant 0 : index
    %71 = vector.load %arg10[%c0_40, %c0_41, %c0_42] : memref<1x1x32xf32, #tpu.memory_space<vmem>>, vector<1x1x32xf32>
    %72 = vector.shape_cast %71 : vector<1x1x32xf32> to vector<1x32xf32>
    %c0_43 = arith.constant 0 : index
    %c0_44 = arith.constant 0 : index
    %c0_45 = arith.constant 0 : index
    %73 = vector.load %arg11[%c0_43, %c0_44, %c0_45] : memref<1x1x32xf32, #tpu.memory_space<vmem>>, vector<1x1x32xf32>
    %74 = vector.shape_cast %73 : vector<1x1x32xf32> to vector<1x32xf32>
    %cst_46 = arith.constant dense<0.000000e+00> : vector<8xf32>
    %75 = vector.multi_reduction <add>, %70, %cst_46 [1] : vector<8x32xf32> to vector<8xf32>
    %76 = vector.shape_cast %75 : vector<8xf32> to vector<8x1xf32>
    %cst_47 = arith.constant 3.200000e+01 : f32
    %77 = vector.broadcast %cst_47 : f32 to vector<8x1xf32>
    %78 = arith.divf %76, %77 : vector<8x1xf32>
    %79 = vector.broadcast %78 : vector<8x1xf32> to vector<8x32xf32>
    %80 = arith.subf %70, %79 : vector<8x32xf32>
    %81 = arith.mulf %80, %80 : vector<8x32xf32>
    %cst_48 = arith.constant dense<0.000000e+00> : vector<8xf32>
    %82 = vector.multi_reduction <add>, %81, %cst_48 [1] : vector<8x32xf32> to vector<8xf32>
    %83 = vector.shape_cast %82 : vector<8xf32> to vector<8x1xf32>
    %cst_49 = arith.constant 3.200000e+01 : f32
    %84 = vector.broadcast %cst_49 : f32 to vector<8x1xf32>
    %85 = arith.divf %83, %84 : vector<8x1xf32>
    %86 = vector.broadcast %78 : vector<8x1xf32> to vector<8x32xf32>
    %87 = arith.subf %70, %86 : vector<8x32xf32>
    %cst_50 = arith.constant 9.99999997E-7 : f32
    %88 = vector.broadcast %cst_50 : f32 to vector<8x1xf32>
    %89 = arith.addf %85, %88 : vector<8x1xf32>
    %90 = math.rsqrt %89 : vector<8x1xf32>
    %91 = vector.broadcast %90 : vector<8x1xf32> to vector<8x32xf32>
    %92 = arith.mulf %87, %91 : vector<8x32xf32>
    %93 = vector.broadcast %72 : vector<1x32xf32> to vector<8x32xf32>
    %94 = arith.mulf %92, %93 : vector<8x32xf32>
    %95 = vector.broadcast %74 : vector<1x32xf32> to vector<8x32xf32>
    %96 = arith.addf %94, %95 : vector<8x32xf32>
    %97 = arith.truncf %96 : vector<8x32xf32> to vector<8x32xbf16>
    %c0_51 = arith.constant 0 : index
    %c0_52 = arith.constant 0 : index
    %c0_53 = arith.constant 0 : index
    %98 = vector.load %arg12[%c0_51, %c0_52, %c0_53] : memref<1x32x32xbf16, #tpu.memory_space<vmem>>, vector<1x32x32xbf16>
    %99 = vector.shape_cast %98 : vector<1x32x32xbf16> to vector<32x32xbf16>
    %c0_54 = arith.constant 0 : index
    %c0_55 = arith.constant 0 : index
    %c0_56 = arith.constant 0 : index
    %100 = vector.load %arg13[%c0_54, %c0_55, %c0_56] : memref<1x32x32xbf16, #tpu.memory_space<vmem>>, vector<1x32x32xbf16>
    %101 = vector.shape_cast %100 : vector<1x32x32xbf16> to vector<32x32xbf16>
    %c0_57 = arith.constant 0 : index
    %c0_58 = arith.constant 0 : index
    %c0_59 = arith.constant 0 : index
    %102 = vector.load %arg14[%c0_57, %c0_58, %c0_59] : memref<1x32x32xbf16, #tpu.memory_space<vmem>>, vector<1x32x32xbf16>
    %103 = vector.shape_cast %102 : vector<1x32x32xbf16> to vector<32x32xbf16>
    %c0_60 = arith.constant 0 : index
    %c0_61 = arith.constant 0 : index
    %c0_62 = arith.constant 0 : index
    %104 = vector.load %arg15[%c0_60, %c0_61, %c0_62] : memref<1x32x32xbf16, #tpu.memory_space<vmem>>, vector<1x32x32xbf16>
    %105 = vector.shape_cast %104 : vector<1x32x32xbf16> to vector<32x32xbf16>
    %cst_63 = arith.constant dense<0.000000e+00> : vector<8x32xf32>
    %106 = tpu.matmul %97, %99, %cst_63 {dimension_numbers = #tpu.dot_dimension_numbers<[1], [0], [0], [1], [0, 0, 1, 1], [], []>} : vector<8x32xbf16>, vector<32x32xbf16>, vector<8x32xf32> -> vector<8x32xf32>
    %cst_64 = arith.constant 0.353553385 : f32
    %107 = vector.broadcast %cst_64 : f32 to vector<8x32xf32>
    %108 = arith.mulf %106, %107 : vector<8x32xf32>
    %cst_65 = arith.constant dense<0.000000e+00> : vector<8x32xf32>
    %109 = tpu.matmul %7, %101, %cst_65 {dimension_numbers = #tpu.dot_dimension_numbers<[1], [0], [0], [1], [0, 0, 1, 1], [], []>} : vector<8x32xbf16>, vector<32x32xbf16>, vector<8x32xf32> -> vector<8x32xf32>
    %cst_66 = arith.constant dense<0.000000e+00> : vector<8x32xf32>
    %110 = tpu.matmul %7, %103, %cst_66 {dimension_numbers = #tpu.dot_dimension_numbers<[1], [0], [0], [1], [0, 0, 1, 1], [], []>} : vector<8x32xbf16>, vector<32x32xbf16>, vector<8x32xf32> -> vector<8x32xf32>
    %111 = vector.shape_cast %108 : vector<8x32xf32> to vector<8x4x8xf32>
    %112 = tpu.transpose %111, [1, 0, 2] : vector<8x4x8xf32> -> vector<4x8x8xf32>
    %113 = vector.shape_cast %109 : vector<8x32xf32> to vector<8x4x8xf32>
    %114 = tpu.transpose %113, [1, 0, 2] : vector<8x4x8xf32> -> vector<4x8x8xf32>
    %115 = vector.shape_cast %110 : vector<8x32xf32> to vector<8x4x8xf32>
    %116 = tpu.transpose %115, [1, 0, 2] : vector<8x4x8xf32> -> vector<4x8x8xf32>
    "tpu.trace_start"() <{level = 10 : i32, message = "hqd,hkd->hqk"}> : () -> ()
    %cst_67 = arith.constant dense<0.000000e+00> : vector<4x8x8xf32>
    %117 = tpu.matmul %112, %114, %cst_67 {dimension_numbers = #tpu.dot_dimension_numbers<[2], [2], [1], [1], [0, 0, 0, 1, 1, 1], [0], [0]>} : vector<4x8x8xf32>, vector<4x8x8xf32>, vector<4x8x8xf32> -> vector<4x8x8xf32>
    "tpu.trace_stop"() : () -> ()
    %118 = vector.broadcast %32 : vector<1x1x8xf32> to vector<4x8x8xf32>
    %119 = arith.addf %117, %118 : vector<4x8x8xf32>
    %cst_68 = arith.constant dense<0xFF800000> : vector<4x8xf32>
    %120 = vector.multi_reduction <maximumf>, %119, %cst_68 [2] : vector<4x8x8xf32> to vector<4x8xf32>
    %121 = vector.shape_cast %120 : vector<4x8xf32> to vector<4x8x1xf32>
    %122 = vector.broadcast %121 : vector<4x8x1xf32> to vector<4x8x8xf32>
    %123 = arith.subf %119, %122 : vector<4x8x8xf32>
    %124 = math.exp %123 : vector<4x8x8xf32>
    %cst_69 = arith.constant dense<0.000000e+00> : vector<4x8xf32>
    %125 = vector.multi_reduction <add>, %124, %cst_69 [2] : vector<4x8x8xf32> to vector<4x8xf32>
    %126 = vector.shape_cast %125 : vector<4x8xf32> to vector<4x8x1xf32>
    %127 = tpu.reciprocal %126 {approx = true} : vector<4x8x1xf32> -> vector<4x8x1xf32>
    %128 = vector.broadcast %127 : vector<4x8x1xf32> to vector<4x8x8xf32>
    %129 = arith.mulf %124, %128 : vector<4x8x8xf32>
    "tpu.trace_start"() <{level = 10 : i32, message = "hqk,hkd->hqd"}> : () -> ()
    %cst_70 = arith.constant dense<0.000000e+00> : vector<4x8x8xf32>
    %130 = tpu.matmul %129, %116, %cst_70 {dimension_numbers = #tpu.dot_dimension_numbers<[2], [1], [1], [2], [0, 0, 0, 1, 1, 2], [0], [0]>} : vector<4x8x8xf32>, vector<4x8x8xf32>, vector<4x8x8xf32> -> vector<4x8x8xf32>
    "tpu.trace_stop"() : () -> ()
    %131 = tpu.transpose %130, [1, 0, 2] : vector<4x8x8xf32> -> vector<8x4x8xf32>
    %132 = vector.shape_cast %131 : vector<8x4x8xf32> to vector<8x32xf32>
    %133 = arith.truncf %132 : vector<8x32xf32> to vector<8x32xbf16>
    %cst_71 = arith.constant dense<0.000000e+00> : vector<8x32xf32>
    %134 = tpu.matmul %133, %105, %cst_71 {dimension_numbers = #tpu.dot_dimension_numbers<[1], [0], [0], [1], [0, 0, 1, 1], [], []>} : vector<8x32xbf16>, vector<32x32xbf16>, vector<8x32xf32> -> vector<8x32xf32>
    %135 = arith.addf %134, %96 : vector<8x32xf32>
    %c0_72 = arith.constant 0 : index
    %c0_73 = arith.constant 0 : index
    %c0_74 = arith.constant 0 : index
    %136 = vector.load %arg16[%c0_72, %c0_73, %c0_74] : memref<1x1x32xf32, #tpu.memory_space<vmem>>, vector<1x1x32xf32>
    %137 = vector.shape_cast %136 : vector<1x1x32xf32> to vector<1x32xf32>
    %c0_75 = arith.constant 0 : index
    %c0_76 = arith.constant 0 : index
    %c0_77 = arith.constant 0 : index
    %138 = vector.load %arg17[%c0_75, %c0_76, %c0_77] : memref<1x1x32xf32, #tpu.memory_space<vmem>>, vector<1x1x32xf32>
    %139 = vector.shape_cast %138 : vector<1x1x32xf32> to vector<1x32xf32>
    %cst_78 = arith.constant dense<0.000000e+00> : vector<8xf32>
    %140 = vector.multi_reduction <add>, %135, %cst_78 [1] : vector<8x32xf32> to vector<8xf32>
    %141 = vector.shape_cast %140 : vector<8xf32> to vector<8x1xf32>
    %cst_79 = arith.constant 3.200000e+01 : f32
    %142 = vector.broadcast %cst_79 : f32 to vector<8x1xf32>
    %143 = arith.divf %141, %142 : vector<8x1xf32>
    %144 = vector.broadcast %143 : vector<8x1xf32> to vector<8x32xf32>
    %145 = arith.subf %135, %144 : vector<8x32xf32>
    %146 = arith.mulf %145, %145 : vector<8x32xf32>
    %cst_80 = arith.constant dense<0.000000e+00> : vector<8xf32>
    %147 = vector.multi_reduction <add>, %146, %cst_80 [1] : vector<8x32xf32> to vector<8xf32>
    %148 = vector.shape_cast %147 : vector<8xf32> to vector<8x1xf32>
    %cst_81 = arith.constant 3.200000e+01 : f32
    %149 = vector.broadcast %cst_81 : f32 to vector<8x1xf32>
    %150 = arith.divf %148, %149 : vector<8x1xf32>
    %151 = vector.broadcast %143 : vector<8x1xf32> to vector<8x32xf32>
    %152 = arith.subf %135, %151 : vector<8x32xf32>
    %cst_82 = arith.constant 9.99999997E-7 : f32
    %153 = vector.broadcast %cst_82 : f32 to vector<8x1xf32>
    %154 = arith.addf %150, %153 : vector<8x1xf32>
    %155 = math.rsqrt %154 : vector<8x1xf32>
    %156 = vector.broadcast %155 : vector<8x1xf32> to vector<8x32xf32>
    %157 = arith.mulf %152, %156 : vector<8x32xf32>
    %158 = vector.broadcast %137 : vector<1x32xf32> to vector<8x32xf32>
    %159 = arith.mulf %157, %158 : vector<8x32xf32>
    %160 = vector.broadcast %139 : vector<1x32xf32> to vector<8x32xf32>
    %161 = arith.addf %159, %160 : vector<8x32xf32>
    %162 = arith.truncf %161 : vector<8x32xf32> to vector<8x32xbf16>
    %c0_83 = arith.constant 0 : index
    %c0_84 = arith.constant 0 : index
    %c0_85 = arith.constant 0 : index
    %163 = vector.load %arg18[%c0_83, %c0_84, %c0_85] : memref<1x32x64xbf16, #tpu.memory_space<vmem>>, vector<1x32x64xbf16>
    %164 = vector.shape_cast %163 : vector<1x32x64xbf16> to vector<32x64xbf16>
    %c0_86 = arith.constant 0 : index
    %c0_87 = arith.constant 0 : index
    %c0_88 = arith.constant 0 : index
    %165 = vector.load %arg19[%c0_86, %c0_87, %c0_88] : memref<1x1x64xf32, #tpu.memory_space<vmem>>, vector<1x1x64xf32>
    %166 = vector.shape_cast %165 : vector<1x1x64xf32> to vector<1x64xf32>
    %c0_89 = arith.constant 0 : index
    %c0_90 = arith.constant 0 : index
    %c0_91 = arith.constant 0 : index
    %167 = vector.load %arg20[%c0_89, %c0_90, %c0_91] : memref<1x64x32xbf16, #tpu.memory_space<vmem>>, vector<1x64x32xbf16>
    %168 = vector.shape_cast %167 : vector<1x64x32xbf16> to vector<64x32xbf16>
    %c0_92 = arith.constant 0 : index
    %c0_93 = arith.constant 0 : index
    %c0_94 = arith.constant 0 : index
    %169 = vector.load %arg21[%c0_92, %c0_93, %c0_94] : memref<1x1x32xf32, #tpu.memory_space<vmem>>, vector<1x1x32xf32>
    %170 = vector.shape_cast %169 : vector<1x1x32xf32> to vector<1x32xf32>
    %cst_95 = arith.constant dense<0.000000e+00> : vector<8x64xf32>
    %171 = tpu.matmul %162, %164, %cst_95 {dimension_numbers = #tpu.dot_dimension_numbers<[1], [0], [0], [1], [0, 0, 1, 1], [], []>} : vector<8x32xbf16>, vector<32x64xbf16>, vector<8x64xf32> -> vector<8x64xf32>
    %172 = vector.broadcast %166 : vector<1x64xf32> to vector<8x64xf32>
    %173 = arith.addf %171, %172 : vector<8x64xf32>
    %cst_96 = arith.constant 0.000000e+00 : f32
    %174 = vector.broadcast %cst_96 : f32 to vector<8x64xf32>
    %175 = arith.maximumf %173, %174 : vector<8x64xf32>
    %176 = arith.truncf %175 : vector<8x64xf32> to vector<8x64xbf16>
    %cst_97 = arith.constant dense<0.000000e+00> : vector<8x32xf32>
    %177 = tpu.matmul %176, %168, %cst_97 {dimension_numbers = #tpu.dot_dimension_numbers<[1], [0], [0], [1], [0, 0, 1, 1], [], []>} : vector<8x64xbf16>, vector<64x32xbf16>, vector<8x32xf32> -> vector<8x32xf32>
    %178 = vector.broadcast %170 : vector<1x32xf32> to vector<8x32xf32>
    %179 = arith.addf %177, %178 : vector<8x32xf32>
    %180 = arith.addf %179, %161 : vector<8x32xf32>
    %c0_98 = arith.constant 0 : index
    %c0_99 = arith.constant 0 : index
    %c0_100 = arith.constant 0 : index
    %181 = vector.load %arg22[%c0_98, %c0_99, %c0_100] : memref<1x1x32xf32, #tpu.memory_space<vmem>>, vector<1x1x32xf32>
    %182 = vector.shape_cast %181 : vector<1x1x32xf32> to vector<1x32xf32>
    %c0_101 = arith.constant 0 : index
    %c0_102 = arith.constant 0 : index
    %c0_103 = arith.constant 0 : index
    %183 = vector.load %arg23[%c0_101, %c0_102, %c0_103] : memref<1x1x32xf32, #tpu.memory_space<vmem>>, vector<1x1x32xf32>
    %184 = vector.shape_cast %183 : vector<1x1x32xf32> to vector<1x32xf32>
    %cst_104 = arith.constant dense<0.000000e+00> : vector<8xf32>
    %185 = vector.multi_reduction <add>, %180, %cst_104 [1] : vector<8x32xf32> to vector<8xf32>
    %186 = vector.shape_cast %185 : vector<8xf32> to vector<8x1xf32>
    %cst_105 = arith.constant 3.200000e+01 : f32
    %187 = vector.broadcast %cst_105 : f32 to vector<8x1xf32>
    %188 = arith.divf %186, %187 : vector<8x1xf32>
    %189 = vector.broadcast %188 : vector<8x1xf32> to vector<8x32xf32>
    %190 = arith.subf %180, %189 : vector<8x32xf32>
    %191 = arith.mulf %190, %190 : vector<8x32xf32>
    %cst_106 = arith.constant dense<0.000000e+00> : vector<8xf32>
    %192 = vector.multi_reduction <add>, %191, %cst_106 [1] : vector<8x32xf32> to vector<8xf32>
    %193 = vector.shape_cast %192 : vector<8xf32> to vector<8x1xf32>
    %cst_107 = arith.constant 3.200000e+01 : f32
    %194 = vector.broadcast %cst_107 : f32 to vector<8x1xf32>
    %195 = arith.divf %193, %194 : vector<8x1xf32>
    %196 = vector.broadcast %188 : vector<8x1xf32> to vector<8x32xf32>
    %197 = arith.subf %180, %196 : vector<8x32xf32>
    %cst_108 = arith.constant 9.99999997E-7 : f32
    %198 = vector.broadcast %cst_108 : f32 to vector<8x1xf32>
    %199 = arith.addf %195, %198 : vector<8x1xf32>
    %200 = math.rsqrt %199 : vector<8x1xf32>
    %201 = vector.broadcast %200 : vector<8x1xf32> to vector<8x32xf32>
    %202 = arith.mulf %197, %201 : vector<8x32xf32>
    %203 = vector.broadcast %182 : vector<1x32xf32> to vector<8x32xf32>
    %204 = arith.mulf %202, %203 : vector<8x32xf32>
    %205 = vector.broadcast %184 : vector<1x32xf32> to vector<8x32xf32>
    %206 = arith.addf %204, %205 : vector<8x32xf32>
    %207 = vector.shape_cast %206 : vector<8x32xf32> to vector<1x8x32xf32>
    %208 = arith.truncf %207 : vector<1x8x32xf32> to vector<1x8x32xbf16>
    %c0_109 = arith.constant 0 : index
    %c0_110 = arith.constant 0 : index
    %c0_111 = arith.constant 0 : index
    %209 = vector.load %arg24[%c0_109, %c0_110, %c0_111] : memref<1x8x32xbf16, #tpu.memory_space<vmem>>, vector<1x8x32xbf16>
    tpu.vector_store %arg24[%c0_109, %c0_110, %c0_111], %208 {strides = array<i32>} : memref<1x8x32xbf16, #tpu.memory_space<vmem>>, vector<1x8x32xbf16>,
    return
  }
  func.func @transform_0(%arg0: i32, %arg1: i32) -> (i32, i32, i32) {
    %c0_i32 = arith.constant 0 : i32
    %c0_i32_0 = arith.constant 0 : i32
    %c0_i32_1 = arith.constant 0 : i32
    return %arg0, %c0_i32, %c0_i32_0 : i32, i32, i32
  }
  func.func @transform_1(%arg0: i32, %arg1: i32) -> (i32, i32, i32) {
    %c0_i32 = arith.constant 0 : i32
    %c0_i32_0 = arith.constant 0 : i32
    %c0_i32_1 = arith.constant 0 : i32
    return %arg0, %c0_i32, %c0_i32_0 : i32, i32, i32
  }
  func.func @transform_2(%arg0: i32, %arg1: i32) -> (i32, i32, i32) {
    %c0_i32 = arith.constant 0 : i32
    %c0_i32_0 = arith.constant 0 : i32
    %c0_i32_1 = arith.constant 0 : i32
    return %arg0, %c0_i32, %c0_i32_0 : i32, i32, i32
  }
  func.func @transform_3(%arg0: i32, %arg1: i32) -> (i32, i32, i32) {
    %c0_i32 = arith.constant 0 : i32
    %c0_i32_0 = arith.constant 0 : i32
    %c0_i32_1 = arith.constant 0 : i32
    return %arg0, %c0_i32, %c0_i32_0 : i32, i32, i32
  }
  func.func @transform_4(%arg0: i32, %arg1: i32) -> (i32, i32, i32) {
    %c0_i32 = arith.constant 0 : i32
    %c0_i32_0 = arith.constant 0 : i32
    %c0_i32_1 = arith.constant 0 : i32
    return %arg1, %c0_i32, %c0_i32_0 : i32, i32, i32
  }
  func.func @transform_5(%arg0: i32, %arg1: i32) -> (i32, i32, i32) {
    %c0_i32 = arith.constant 0 : i32
    %c0_i32_0 = arith.constant 0 : i32
    %c0_i32_1 = arith.constant 0 : i32
    return %arg1, %c0_i32, %c0_i32_0 : i32, i32, i32
  }
  func.func @transform_6(%arg0: i32, %arg1: i32) -> (i32, i32, i32) {
    %c0_i32 = arith.constant 0 : i32
    %c0_i32_0 = arith.constant 0 : i32
    %c0_i32_1 = arith.constant 0 : i32
    return %arg1, %c0_i32, %c0_i32_0 : i32, i32, i32
  }
  func.func @transform_7(%arg0: i32, %arg1: i32) -> (i32, i32, i32) {
    %c0_i32 = arith.constant 0 : i32
    %c0_i32_0 = arith.constant 0 : i32
    %c0_i32_1 = arith.constant 0 : i32
    return %arg1, %c0_i32, %c0_i32_0 : i32, i32, i32
  }
  func.func @transform_8(%arg0: i32, %arg1: i32) -> (i32, i32, i32) {
    %c0_i32 = arith.constant 0 : i32
    %c0_i32_0 = arith.constant 0 : i32
    %c0_i32_1 = arith.constant 0 : i32
    return %arg1, %c0_i32, %c0_i32_0 : i32, i32, i32
  }
  func.func @transform_9(%arg0: i32, %arg1: i32) -> (i32, i32, i32) {
    %c0_i32 = arith.constant 0 : i32
    %c0_i32_0 = arith.constant 0 : i32
    %c0_i32_1 = arith.constant 0 : i32
    return %arg1, %c0_i32, %c0_i32_0 : i32, i32, i32
  }
  func.func @transform_10(%arg0: i32, %arg1: i32) -> (i32, i32, i32) {
    %c0_i32 = arith.constant 0 : i32
    %c0_i32_0 = arith.constant 0 : i32
    %c0_i32_1 = arith.constant 0 : i32
    return %arg1, %c0_i32, %c0_i32_0 : i32, i32, i32
  }
  func.func @transform_11(%arg0: i32, %arg1: i32) -> (i32, i32, i32) {
    %c0_i32 = arith.constant 0 : i32
    %c0_i32_0 = arith.constant 0 : i32
    %c0_i32_1 = arith.constant 0 : i32
    return %arg1, %c0_i32, %c0_i32_0 : i32, i32, i32
  }
  func.func @transform_12(%arg0: i32, %arg1: i32) -> (i32, i32, i32) {
    %c0_i32 = arith.constant 0 : i32
    %c0_i32_0 = arith.constant 0 : i32
    %c0_i32_1 = arith.constant 0 : i32
    return %arg1, %c0_i32, %c0_i32_0 : i32, i32, i32
  }
  func.func @transform_13(%arg0: i32, %arg1: i32) -> (i32, i32, i32) {
    %c0_i32 = arith.constant 0 : i32
    %c0_i32_0 = arith.constant 0 : i32
    %c0_i32_1 = arith.constant 0 : i32
    return %arg1, %c0_i32, %c0_i32_0 : i32, i32, i32
  }
  func.func @transform_14(%arg0: i32, %arg1: i32) -> (i32, i32, i32) {
    %c0_i32 = arith.constant 0 : i32
    %c0_i32_0 = arith.constant 0 : i32
    %c0_i32_1 = arith.constant 0 : i32
    return %arg1, %c0_i32, %c0_i32_0 : i32, i32, i32
  }
  func.func @transform_15(%arg0: i32, %arg1: i32) -> (i32, i32, i32) {
    %c0_i32 = arith.constant 0 : i32
    %c0_i32_0 = arith.constant 0 : i32
    %c0_i32_1 = arith.constant 0 : i32
    return %arg1, %c0_i32, %c0_i32_0 : i32, i32, i32
  }
  func.func @transform_16(%arg0: i32, %arg1: i32) -> (i32, i32, i32) {
    %c0_i32 = arith.constant 0 : i32
    %c0_i32_0 = arith.constant 0 : i32
    %c0_i32_1 = arith.constant 0 : i32
    return %arg1, %c0_i32, %c0_i32_0 : i32, i32, i32
  }
  func.func @transform_17(%arg0: i32, %arg1: i32) -> (i32, i32, i32) {
    %c0_i32 = arith.constant 0 : i32
    %c0_i32_0 = arith.constant 0 : i32
    %c0_i32_1 = arith.constant 0 : i32
    return %arg1, %c0_i32, %c0_i32_0 : i32, i32, i32
  }
  func.func @transform_18(%arg0: i32, %arg1: i32) -> (i32, i32, i32) {
    %c0_i32 = arith.constant 0 : i32
    %c0_i32_0 = arith.constant 0 : i32
    %c0_i32_1 = arith.constant 0 : i32
    return %arg1, %c0_i32, %c0_i32_0 : i32, i32, i32
  }
  func.func @transform_19(%arg0: i32, %arg1: i32) -> (i32, i32, i32) {
    %c0_i32 = arith.constant 0 : i32
    %c0_i32_0 = arith.constant 0 : i32
    %c0_i32_1 = arith.constant 0 : i32
    return %arg1, %c0_i32, %c0_i32_0 : i32, i32, i32
  }
  func.func @transform_20(%arg0: i32, %arg1: i32) -> (i32, i32, i32) {
    %c0_i32 = arith.constant 0 : i32
    %c0_i32_0 = arith.constant 0 : i32
    %c0_i32_1 = arith.constant 0 : i32
    return %arg1, %c0_i32, %c0_i32_0 : i32, i32, i32
  }
  func.func @transform_21(%arg0: i32, %arg1: i32) -> (i32, i32, i32) {
    %c0_i32 = arith.constant 0 : i32
    %c0_i32_0 = arith.constant 0 : i32
    %c0_i32_1 = arith.constant 0 : i32
    return %arg1, %c0_i32, %c0_i32_0 : i32, i32, i32
  }
  func.func @transform_22(%arg0: i32, %arg1: i32) -> (i32, i32, i32) {
    %c0_i32 = arith.constant 0 : i32
    %c0_i32_0 = arith.constant 0 : i32
    %c0_i32_1 = arith.constant 0 : i32
    return %arg0, %c0_i32, %c0_i32_0 : i32, i32, i32
  }
}

module attributes {stable_mosaic.version = 11 : i64} {
  func.func @proj_kernel(%arg0: i32, %arg1: i32, %arg2: memref<16x32xbf16, #tpu.memory_space<vmem>>, %arg3: memref<32x64xbf16, #tpu.memory_space<vmem>>, %arg4: memref<16x64xf32, #tpu.memory_space<vmem>>) attributes {dimension_semantics = [#tpu.dimension_semantics<parallel>, #tpu.dimension_semantics<parallel>], iteration_bounds = array<i64: 1, 1>, scalar_prefetch = 0 : i64, scratch_operands = 0 : i64, tpu.core_type = #tpu.core_type<tc>, window_params = [{transform_indices = @transform_0, window_bounds = array<i64: 16, 32>}, {transform_indices = @transform_1, window_bounds = array<i64: 32, 64>}, {transform_indices = @transform_2, window_bounds = array<i64: 16, 64>}]} {
    %c0 = arith.constant 0 : index
    %c0_0 = arith.constant 0 : index
    %0 = vector.load %arg2[%c0, %c0_0] : memref<16x32xbf16, #tpu.memory_space<vmem>>, vector<16x32xbf16>
    %c0_1 = arith.constant 0 : index
    %c0_2 = arith.constant 0 : index
    %1 = vector.load %arg3[%c0_1, %c0_2] : memref<32x64xbf16, #tpu.memory_space<vmem>>, vector<32x64xbf16>
    %cst = arith.constant dense<0.000000e+00> : vector<16x64xf32>
    %2 = tpu.matmul %0, %1, %cst {dimension_numbers = #tpu.dot_dimension_numbers<[1], [0], [0], [1], [0, 0, 1, 1], [], []>} : vector<16x32xbf16>, vector<32x64xbf16>, vector<16x64xf32> -> vector<16x64xf32>
    %c0_3 = arith.constant 0 : index
    %c0_4 = arith.constant 0 : index
    %3 = vector.load %arg4[%c0_3, %c0_4] : memref<16x64xf32, #tpu.memory_space<vmem>>, vector<16x64xf32>
    tpu.vector_store %arg4[%c0_3, %c0_4], %2 {strides = array<i32>} : memref<16x64xf32, #tpu.memory_space<vmem>>, vector<16x64xf32>,
    return
  }
  func.func @transform_0(%arg0: i32, %arg1: i32) -> (i32, i32) {
    %c0_i32 = arith.constant 0 : i32
    %c0_i32_0 = arith.constant 0 : i32
    return %arg0, %c0_i32 : i32, i32
  }
  func.func @transform_1(%arg0: i32, %arg1: i32) -> (i32, i32) {
    %c0_i32 = arith.constant 0 : i32
    %c0_i32_0 = arith.constant 0 : i32
    return %c0_i32, %arg1 : i32, i32
  }
  func.func @transform_2(%arg0: i32, %arg1: i32) -> (i32, i32) {
    %c0_i32 = arith.constant 0 : i32
    return %arg0, %arg1 : i32, i32
  }
}

</mosaic_0001>

<bundles_post_ra>
// kernel: transformer_forward.5
= control target key start
LH: loop header
LB: loop body
LE: loop exit
PB: predicated region body
PF: predicated region fallthrough
CT: control target
= control target key end

     0   :  { %9 = vsyncpa [#allocation3], 0  ;;  %s152_s18 = smov [#allocation2]   ;;  %s201_s0 = inlined_call_operand.vmem [shape: bf16[2,8,32], index: 0, kind: input, shape index: {}]   ;;  %s202_s1 = inlined_call_operand.hbm [shape: f32[8,32], index: 1, kind: input, shape index: {}]   ;;  %s203_s2 = inlined_call_operand.vmem [shape: f32[1,32], index: 2, kind: input, shape index: {}]   ;;  %s204_s3 = inlined_call_operand.vmem [shape: f32[1,32], index: 3, kind: input, shape index: {}]   ;;  %s205_s4 = inlined_call_operand.vmem [shape: bf16[2,8,32], index: 4, kind: output, shape index: {}]  }
   0x1   :  { %s17_s17 = sshll.u32 %s202_s1, 4  ;;  %s19_s19 = sshll.u32 %s152_s18, 4  ;;  %s18_s17 = int_to_ptr.hbm [resolvable:$true] %s17_s17  ;;  %s20_s19 = int_to_ptr.vmem [resolvable:$true] %s19_s19 }
   0x2   :  { %22 = dma.hbm_to_vmem [thread:$0]  %s18_s17, 128, %s20_s19, [#allocation3]  }
   0x3   :  { %150 = dma.done.wait [#allocation3], 128  }
   0x4   :  { %151 = vsyncadd [#allocation3], 4294967168  ;;  %v113_v0 = vld [vmem:[%s201_s0] sm:$0xff]   ;;  %vm40_vm0 = vcmask 261120   ;;  %v153_v8 = vmov 32.0   ;;  %vm104_vm6 = vcmask 257024  }
   0x5   :  { %v35_v1 = vld [vmem:[#allocation2] sm:$0xff]  ;;  %v114_v2 = vunpack.c.l.bf16 %v113_v0  ;;  %v115_v4 = vunpack.c.h.bf16 %v113_v0  ;;  %120 = vrcp.f32 %v153_v8 }
   0x6   :  { %v118_v39 = vld [vmem:[%s203_s2] ss:$0 sm:$0xff] }
   0x7   :  { %v36_v3 = vadd.f32 %v114_v2, %v35_v1  ;;  %v37_v6 = vadd.f32 %v115_v4, %v35_v1  ;;  %v119_v42 = vld [vmem:[%s204_s3] ss:$0 sm:$0xff] }
   0x9   :  { %v41_v5 = vsel %vm40_vm0, %v36_v3, 0.0  ;;  %v44_v7 = vsel %vm40_vm0, %v37_v6, 0.0 }
   0xa   :  { %42 = vadd.xlane.f32.xlu0 %v41_v5 }
   0xb   :  { %v121_v9 = vpop.eup %120 }
   0xc   :  { %v48_v10 = vmul.f32 32.0, %v121_v9  ;;  %vm52_vm1 = vweird.f32 %v121_v9 }
   0xe   :  { %v49_v11 = vsub.f32 1.0, %v48_v10 }
  0x10   :  { %v50_v12 = vmul.f32 %v121_v9, %v49_v11 }
  0x12   :  { %45 = vadd.xlane.f32.xlu0 %v44_v7  ;;  %v51_v13 = vadd.f32 %v121_v9, %v50_v12 }
  0x14   :  { %v53_v14 = vsel %vm52_vm1, %v121_v9, %v51_v13 }
  0x7d   :  { %v43_v15 = vpop.xlane.xlu0 %42 }
  0x7e   :  { %v54_v16 = vmul.f32 %v53_v14, %v43_v15 }
  0x80   :  { %v56_v17 = vsub.f32 %v36_v3, %v54_v16 }
  0x82   :  { %v58_v18 = vmul.f32 %v56_v17, %v56_v17 }
  0x84   :  { %v60_v19 = vsel %vm40_vm0, %v58_v18, 0.0 }
  0x85   :  { %61 = vadd.xlane.f32.xlu1 %v60_v19  ;;  %v46_v20 = vpop.xlane.xlu0 %45 }
  0x86   :  { %v55_v21 = vmul.f32 %v53_v14, %v46_v20 }
  0x88   :  { %v57_v22 = vsub.f32 %v37_v6, %v55_v21 }
  0x8a   :  { %v59_v23 = vmul.f32 %v57_v22, %v57_v22 }
  0x8c   :  { %v63_v24 = vsel %vm40_vm0, %v59_v23, 0.0 }
  0x8d   :  { %64 = vadd.xlane.f32.xlu1 %v63_v24 }
  0xf8   :  { %v62_v25 = vpop.xlane.xlu1 %61 }
  0xf9   :  { %v66_v26 = vmul.f32 %v62_v25, %v53_v14 }
  0xfb   :  { %v68_v27 = vadd.f32 1e-06, %v66_v26 }
  0xfd   :  { %122 = vrsqrt.f32 %v68_v27  ;;  %vm76_vm3 = vweird.f32 %v68_v27 }
 0x100   :  { %v65_v28 = vpop.xlane.xlu1 %64 }
 0x101   :  { %v67_v29 = vmul.f32 %v65_v28, %v53_v14 }
 0x103   :  { %v123_v30 = vpop.eup %122  ;;  %v69_v31 = vadd.f32 1e-06, %v67_v29 }
 0x104   :  { %v71_v32 = vmul.f32 %v123_v30, %v68_v27  ;;  %vm77_vm2 = vweird.f32 %v123_v30 }
 0x105   :  { %124 = vrsqrt.f32 %v69_v31  ;;  %vm78_vm4 = vmor %vm76_vm3, %vm77_vm2  ;;  %vm86_vm7 = vweird.f32 %v69_v31 }
 0x106   :  { %v72_v33 = vmul.f32 %v123_v30, %v71_v32 }
 0x108   :  { %v73_v34 = vmul.f32 0.5, %v72_v33 }
 0x10a   :  { %v74_v35 = vsub.f32 1.5, %v73_v34 }
 0x10b   :  { %v125_v36 = vpop.eup %124 }
 0x10c   :  { %v75_v37 = vmul.f32 %v123_v30, %v74_v35  ;;  %v81_v38 = vmul.f32 %v125_v36, %v69_v31  ;;  %vm87_vm5 = vweird.f32 %v125_v36 }
 0x10d   :  { %vm88_vm8 = vmor %vm86_vm7, %vm87_vm5 }
 0x10e   :  { %v79_v40 = vsel %vm78_vm4, %v123_v30, %v75_v37  ;;  %v82_v41 = vmul.f32 %v125_v36, %v81_v38 }
 0x10f   :  { %v90_v43 = vmul.f32 %v79_v40, %v56_v17 }
 0x110   :  { %v83_v44 = vmul.f32 0.5, %v82_v41 }
 0x111   :  { %v95_v45 = vmul.f32 %v118_v39, %v90_v43 }
 0x112   :  { %v84_v46 = vsub.f32 1.5, %v83_v44 }
 0x113   :  { %v100_v47 = vadd.f32 %v119_v42, %v95_v45 }
 0x114   :  { %v85_v48 = vmul.f32 %v125_v36, %v84_v46 }
 0x115   :  { %v102_v49 = vpack.c.bf16 %v100_v47, %v100_v47 }
 0x116   :  { %v89_v50 = vsel %vm88_vm8, %v125_v36, %v85_v48 }
 0x117   :  { %105 = vst.msk [vmem:[%s205_s4] sm:$0xf] %vm104_vm6, %v102_v49  ;;  %v91_v51 = vmul.f32 %v89_v50, %v57_v22 }
 0x119   :  { %v96_v52 = vmul.f32 %v118_v39, %v91_v51 }
 0x11b   :  { %v101_v53 = vadd.f32 %v119_v42, %v96_v52 }
 0x11d   :  { %v103_v54 = vpack.c.bf16 %v101_v53, %v101_v53 }
 0x11f   :  { %106 = vst.msk [vmem:[%s205_s4 + $0x4] sm:$0xf] %vm104_vm6, %v103_v54 }
 0x120   :  { %111 = vsyncpa [#allocation3], 1 }

// kernel: transformer_forward.7
= control target key start
LH: loop header
LB: loop body
LE: loop exit
PB: predicated region body
PF: predicated region fallthrough
CT: control target
= control target key end

     0   :  { %vm26_vm0 = vcmask 261120   ;;  %v110_v8 = vmov 32.0   ;;  %vm90_vm6 = vcmask 257024   ;;  %s158_s0 = inlined_call_operand.vmem [shape: bf16[2,8,32], index: 0, kind: input, shape index: {}]   ;;  %s159_s1 = inlined_call_operand.vmem [shape: f32[8,32], index: 1, kind: input, shape index: {}]   ;;  %s160_s2 = inlined_call_operand.vmem [shape: f32[1,32], index: 2, kind: input, shape index: {}]   ;;  %s161_s3 = inlined_call_operand.vmem [shape: f32[1,32], index: 3, kind: input, shape index: {}]   ;;  %s162_s4 = inlined_call_operand.vmem [shape: bf16[2,8,32], index: 4, kind: output, shape index: {}]  }
   0x1   :  { %v98_v0 = vld [vmem:[%s158_s0] sm:$0xff]   ;;  %104 = vrcp.f32 %v110_v8 }
   0x2   :  { %v21_v1 = vld [vmem:[%s159_s1] sm:$0xff]  ;;  %v99_v2 = vunpack.c.l.bf16 %v98_v0  ;;  %v100_v4 = vunpack.c.h.bf16 %v98_v0 }
   0x3   :  { %v102_v39 = vld [vmem:[%s160_s2] ss:$0 sm:$0xff] }
   0x4   :  { %v22_v3 = vadd.f32 %v99_v2, %v21_v1  ;;  %v23_v6 = vadd.f32 %v100_v4, %v21_v1  ;;  %v103_v42 = vld [vmem:[%s161_s3] ss:$0 sm:$0xff] }
   0x6   :  { %v27_v5 = vsel %vm26_vm0, %v22_v3, 0.0  ;;  %v30_v7 = vsel %vm26_vm0, %v23_v6, 0.0 }
   0x7   :  { %28 = vadd.xlane.f32.xlu0 %v27_v5  ;;  %v105_v9 = vpop.eup %104 }
   0x8   :  { %v34_v10 = vmul.f32 32.0, %v105_v9  ;;  %vm38_vm1 = vweird.f32 %v105_v9 }
   0xa   :  { %v35_v11 = vsub.f32 1.0, %v34_v10 }
   0xc   :  { %v36_v12 = vmul.f32 %v105_v9, %v35_v11 }
   0xe   :  { %v37_v13 = vadd.f32 %v105_v9, %v36_v12 }
   0xf   :  { %31 = vadd.xlane.f32.xlu0 %v30_v7 }
  0x10   :  { %v39_v14 = vsel %vm38_vm1, %v105_v9, %v37_v13 }
  0x7a   :  { %v29_v15 = vpop.xlane.xlu0 %28 }
  0x7b   :  { %v40_v16 = vmul.f32 %v39_v14, %v29_v15 }
  0x7d   :  { %v42_v17 = vsub.f32 %v22_v3, %v40_v16 }
  0x7f   :  { %v44_v18 = vmul.f32 %v42_v17, %v42_v17 }
  0x81   :  { %v46_v19 = vsel %vm26_vm0, %v44_v18, 0.0 }
  0x82   :  { %47 = vadd.xlane.f32.xlu1 %v46_v19  ;;  %v32_v20 = vpop.xlane.xlu0 %31 }
  0x83   :  { %v41_v21 = vmul.f32 %v39_v14, %v32_v20 }
  0x85   :  { %v43_v22 = vsub.f32 %v23_v6, %v41_v21 }
  0x87   :  { %v45_v23 = vmul.f32 %v43_v22, %v43_v22 }
  0x89   :  { %v49_v24 = vsel %vm26_vm0, %v45_v23, 0.0 }
  0x8a   :  { %50 = vadd.xlane.f32.xlu1 %v49_v24 }
  0xf5   :  { %v48_v25 = vpop.xlane.xlu1 %47 }
  0xf6   :  { %v52_v26 = vmul.f32 %v48_v25, %v39_v14 }
  0xf8   :  { %v54_v27 = vadd.f32 1e-06, %v52_v26 }
  0xfa   :  { %106 = vrsqrt.f32 %v54_v27  ;;  %vm62_vm3 = vweird.f32 %v54_v27 }
  0xfd   :  { %v51_v28 = vpop.xlane.xlu1 %50 }
  0xfe   :  { %v53_v29 = vmul.f32 %v51_v28, %v39_v14 }
 0x100   :  { %v107_v30 = vpop.eup %106  ;;  %v55_v31 = vadd.f32 1e-06, %v53_v29 }
 0x101   :  { %v57_v32 = vmul.f32 %v107_v30, %v54_v27  ;;  %vm63_vm2 = vweird.f32 %v107_v30 }
 0x102   :  { %108 = vrsqrt.f32 %v55_v31  ;;  %vm64_vm4 = vmor %vm62_vm3, %vm63_vm2  ;;  %vm72_vm7 = vweird.f32 %v55_v31 }
 0x103   :  { %v58_v33 = vmul.f32 %v107_v30, %v57_v32 }
 0x105   :  { %v59_v34 = vmul.f32 0.5, %v58_v33 }
 0x107   :  { %v60_v35 = vsub.f32 1.5, %v59_v34 }
 0x108   :  { %v109_v36 = vpop.eup %108 }
 0x109   :  { %v61_v37 = vmul.f32 %v107_v30, %v60_v35  ;;  %v67_v38 = vmul.f32 %v109_v36, %v55_v31  ;;  %vm73_vm5 = vweird.f32 %v109_v36 }
 0x10a   :  { %vm74_vm8 = vmor %vm72_vm7, %vm73_vm5 }
 0x10b   :  { %v65_v40 = vsel %vm64_vm4, %v107_v30, %v61_v37  ;;  %v68_v41 = vmul.f32 %v109_v36, %v67_v38 }
 0x10c   :  { %v76_v43 = vmul.f32 %v65_v40, %v42_v17 }
 0x10d   :  { %v69_v44 = vmul.f32 0.5, %v68_v41 }
 0x10e   :  { %v81_v45 = vmul.f32 %v102_v39, %v76_v43 }
 0x10f   :  { %v70_v46 = vsub.f32 1.5, %v69_v44 }
 0x110   :  { %v86_v47 = vadd.f32 %v103_v42, %v81_v45 }
 0x111   :  { %v71_v48 = vmul.f32 %v109_v36, %v70_v46 }
 0x112   :  { %v88_v49 = vpack.c.bf16 %v86_v47, %v86_v47 }
 0x113   :  { %v75_v50 = vsel %vm74_vm8, %v109_v36, %v71_v48 }
 0x114   :  { %91 = vst.msk [vmem:[%s162_s4] sm:$0xf] %vm90_vm6, %v88_v49  ;;  %v77_v51 = vmul.f32 %v75_v50, %v43_v22 }
 0x116   :  { %v82_v52 = vmul.f32 %v102_v39, %v77_v51 }
 0x118   :  { %v87_v53 = vadd.f32 %v103_v42, %v82_v52 }
 0x11a   :  { %v89_v54 = vpack.c.bf16 %v87_v53, %v87_v53 }
 0x11c   :  { %92 = vst.msk [vmem:[%s162_s4 + $0x4] sm:$0xf] %vm90_vm6, %v89_v54 }

// kernel: transformer_forward.6
= control target key start
LH: loop header
LB: loop body
LE: loop exit
PB: predicated region body
PF: predicated region fallthrough
CT: control target
= control target key end

     0   :  { %s3263_s0 = inlined_call_operand.vmem [shape: bf16[2,8,32], index: 0, kind: input, shape index: {}]   ;;  %s3264_s1 = inlined_call_operand.vmem [shape: s32[2,1,8], index: 1, kind: input, shape index: {}]   ;;  %s3265_s2 = inlined_call_operand.hbm [shape: bf16[2,32,32], index: 2, kind: input, shape index: {}]   ;;  %s3266_s3 = inlined_call_operand.hbm [shape: bf16[2,32,32], index: 3, kind: input, shape index: {}]   ;;  %s3267_s4 = inlined_call_operand.hbm [shape: bf16[2,32,32], index: 4, kind: input, shape index: {}]   ;;  %s3268_s5 = inlined_call_operand.hbm [shape: bf16[2,32,32], index: 5, kind: input, shape index: {}]   ;;  %s3269_s6 = inlined_call_operand.vmem [shape: f32[2,1,32], index: 6, kind: input, shape index: {}, may-alias: {6,12}]   ;;  %s3270_s7 = inlined_call_operand.vmem [shape: f32[2,1,32], index: 7, kind: input, shape index: {}, may-alias: {7,11,13}]   ;;  %s3271_s8 = inlined_call_operand.hbm [shape: bf16[2,32,64], index: 8, kind: input, shape index: {}]   ;;  %s3272_s9 = inlined_call_operand.vmem [shape: f32[2,1,64], index: 9, kind: input, shape index: {}]   ;;  %s3273_s10 = inlined_call_operand.hbm [shape: bf16[2,64,32], index: 10, kind: input, shape index: {}]   ;;  %s3274_s11 = inlined_call_operand.vmem [shape: f32[2,1,32], index: 11, kind: input, shape index: {}, may-alias: {7,11,13}]   ;;  %s3275_s12 = inlined_call_operand.vmem [shape: f32[2,1,32], index: 12, kind: input, shape index: {}, may-alias: {6,12}]   ;;  %s3276_s13 = inlined_call_operand.vmem [shape: f32[2,1,32], index: 13, kind: input, shape index: {}, may-alias: {7,11,13}]   ;;  %s3277_s14 = inlined_call_operand.vmem [shape: bf16[2,8,32], index: 14, kind: output, shape index: {}]  }
   0x1   :  { %3284 = sst [smem:[#allocation23_spill]] %s3263_s0 }
   0x2   :  { %3285 = sst [smem:[#allocation24_spill]] %s3265_s2 }
   0x3   :  { %3286 = sst [smem:[#allocation25_spill]] %s3266_s3 }
   0x4   :  { %3287 = sst [smem:[#allocation26_spill]] %s3267_s4 }
   0x5   :  { %3288 = sst [smem:[#allocation27_spill]] %s3268_s5 }
   0x6   :  { %3289 = sst [smem:[#allocation28_spill]] %s3269_s6 }
   0x7   :  { %3290 = sst [smem:[#allocation29_spill]] %s3270_s7 }
   0x8   :  { %3291 = sst [smem:[#allocation30_spill]] %s3271_s8 }
   0x9   :  { %3292 = sst [smem:[#allocation31_spill]] %s3272_s9 }
   0xa   :  { %3293 = sst [smem:[#allocation32_spill]] %s3273_s10 }
   0xb   :  { %3294 = sst [smem:[#allocation33_spill]] %s3274_s11 }
   0xc   :  { %3295 = sst [smem:[#allocation34_spill]] %s3275_s12 }
   0xd   :  { %3296 = sst [smem:[#allocation35_spill]] %s3276_s13 }
   0xe   :  { %3297 = sst [smem:[#allocation36_spill]] %s3277_s14 }
   0xf   :  { %19 = vsyncpa [#allocation3], 0 }
  0x10   :  { %21 = vsyncpa [#allocation3 + $0x1], 0 }
  0x11   :  { %22 = vsyncpa [#allocation5], 0 }
  0x12   :  { %24 = vsyncpa [#allocation5 + $0x1], 0 }
  0x13   :  { %25 = vsyncpa [#allocation8], 0 }
  0x14   :  { %27 = vsyncpa [#allocation8 + $0x1], 0 }
  0x15   :  { %28 = vsyncpa [#allocation11], 0 }
  0x16   :  { %30 = vsyncpa [#allocation11 + $0x1], 0  ;;  %s2727_s29 = smov 0   ;;  %s2729_s30 = smov 0  }
  0x17   :  { %s2731_s15 = smov 0   ;;  %s2733_s16 = smov 0  }
  0x18   :  { %s2735_s17 = smov 0   ;;  %s2737_s18 = smov 0  }
  0x19   :  { %s2739_s19 = smov 0   ;;  %s2741_s20 = smov 0  }
  0x1a LB: > { %3298 = sst [smem:[#allocation16_spill]] %s2614_s30  ;;  %s3279_s21 = sadd.s32 4294967295, %s2638_s20   ;;  %s2638_s20 = sphi %s2741_s20, %s36_s20   ;;  %s2634_s19 = sphi %s2739_s19, %s3347_s19   ;;  %s2630_s18 = sphi %s2737_s18, %s3346_s18   ;;  %s2626_s17 = sphi %s2735_s17, %s3345_s17   ;;  %s2622_s16 = sphi %s2733_s16, %s3344_s16   ;;  %s2618_s15 = sphi %s2731_s15, %s3343_s15   ;;  %s2614_s30 = sphi %s2729_s30, %s3342_s30   ;;  %s2610_s29 = sphi %s2727_s29, %s3341_s29  }
  0x1b   : > { %3299 = sst [smem:[#allocation17_spill]] %s2618_s15  ;;  %s45_s22 = sadd.s32 1, %s2630_s18 }
  0x1c   : > { %3300 = sst [smem:[#allocation18_spill]] %s2630_s18  ;;  %p46_p0 = scmp.ge.s32.totalorder %s45_s22, 2 }
  0x1d   : > { %3301 = sst [smem:[#allocation19_spill]] %s2634_s19  ;;  %s48_s23 = sadd.s32 1, %s2634_s19 }
  0x1e   : > { %s107_s24 = sadd.s32 1, %s2618_s15  ;;  %p114_p1 = scmp.ne.s32.totalorder %s2618_s15, %s2614_s30 }
  0x1f   : > { %s3349_s22 = smov (%p46_p0, %s45_s22), 0  ;;  %s3351_s23 = smov (!%p46_p0, %s48_s23), %s2634_s19 }
  0x20   : > { %3302 = sst [smem:[#allocation20_spill]] %s3349_s22  ;;  %s104_s25 = ssub.s32 %s2630_s18, %s3349_s22 }
  0x21   : > { %p115_p2 = scmp.eq.s32.totalorder %s2638_s20, 0  ;;  %p50_p3 = scmp.ge.s32.totalorder %s3351_s23, 2 }
  0x22   : > { %p105_p4 = scmp.eq.s32.totalorder %s104_s25, 0  ;;  %p120_p6 = scmp.ne.s32.totalorder %s2614_s30, %s2610_s29 }
  0x23   : > { %p116_p5 = por %p115_p2, %p114_p1  ;;  %s3353_s23 = smov (%p50_p3, %s3351_s23), 0 }
  0x24   : > { %3303 = sst [smem:[#allocation21_spill]] %s3353_s23  ;;  %p121_p7 = scmp.eq.s32.totalorder %s3279_s21, 0 }
  0x25   : > { %s2781_s26 = scalar_select %p105_p4, %s2618_s15, %s107_s24  }
  0x26   : > { %p2275_p8 = scmp.lt.s32.totalorder %s2638_s20, 4  ;;  %s2787_s27 = sand.u32 1, %s2618_s15  }
  0x27   : > { %3304 = sst [smem:[#allocation22_spill]] %s2781_s26  ;;  %p2789_p9 = por %p121_p7, %p120_p6 }
  0x28   : > { %s2794_s22 = sshll.u32 %s2787_s27, 4  ;;  %s2797_s29 = sshll.u32 %s2630_s18, 4 }
  0x29   : > { %p2799_p10 = pnand %p2275_p8, %p116_p5  ;;  %s491_s25 = sand.u32 1, %s2638_s20  }
  0x2a   : > { %s3307_s3 = sld [smem:[#allocation25_spill]]  ;;  %s495_s26 = scalar_lea.vmem [#allocation4], %s2794_s22 }
  0x2b   : > { %s503_s15 = sshll.u32 %s495_s26, 4  ;;  %p2138_p11 = scmp.ge.s32.totalorder %s2638_s20, 1  ;;  %s504_s15 = int_to_ptr.vmem [resolvable:$true] %s503_s15 }
  0x2c   : > { %s2810_s13 = scalar_lea.sflag [#allocation5], %s491_s25  ;;  %s2640_s12 = smov 64  }
  0x2d   : > { %s2641_s11 = smov 4   ;;  %p635_p12 = scmp.lt.s32.totalorder %s2638_s20, 5 }
  0x2e   : > { %s3308_s5 = sld [smem:[#allocation27_spill]]  ;;  %s539_s9 = scalar_lea.vmem [#allocation7], %s2794_s22 }
  0x2f   : > { %p2823_p13 = pnand %p2138_p11, %p635_p12  ;;  %s547_s7 = sshll.u32 %s539_s9, 4  ;;  %s548_s7 = int_to_ptr.vmem [resolvable:$true] %s547_s7 }
  0x30   : > { %s500_s19 = scalar_lea.hbm %s3307_s3, %s2797_s29  ;;  %s536_s6 = scalar_lea.sflag [#allocation8], %s491_s25 }
  0x31   : > { %s501_s14 = sshll.u32 %s500_s19, 4  ;;  %s3310_s2 = sld [smem:[#allocation24_spill]]  ;;  %s502_s14 = int_to_ptr.hbm [resolvable:$true] %s501_s14 }
  0x32   : > { %2262 = dma.hbm_to_vmem [thread:$0]  (!%p2799_p10), %s502_s14, 256, %s504_s15, %s2810_s13, %s2640_s12, %s2640_s12, %s2641_s11  }
  0x33   : > { %s470_s9 = scalar_lea.sflag [#allocation3], %s2787_s27  ;;  %s3311_s4 = sld [smem:[#allocation26_spill]] }
  0x34   : > { %s544_s19 = scalar_lea.hbm %s3308_s5, %s2797_s29  ;;  %s517_s15 = scalar_lea.vmem [#allocation6], %s2794_s22 }
  0x35   : > { %s545_s3 = sshll.u32 %s544_s19, 4  ;;  %s473_s19 = scalar_lea.vmem [#allocation2], %s2794_s22  ;;  %s546_s3 = int_to_ptr.hbm [resolvable:$true] %s545_s3 }
  0x36   : > { %2268 = dma.hbm_to_vmem [thread:$0]  (!%p2799_p10), %s546_s3, 256, %s548_s7, %s536_s6, %s2640_s12, %s2640_s12, %s2641_s11  }
  0x37   : > { %s478_s21 = scalar_lea.hbm %s3310_s2, %s2797_s29  ;;  %s481_s5 = sshll.u32 %s473_s19, 4  ;;  %s482_s5 = int_to_ptr.vmem [resolvable:$true] %s481_s5 }
  0x38   : > { %s479_s23 = sshll.u32 %s478_s21, 4  ;;  %s525_s21 = sshll.u32 %s517_s15, 4  ;;  %s480_s23 = int_to_ptr.hbm [resolvable:$true] %s479_s23  ;;  %s526_s21 = int_to_ptr.vmem [resolvable:$true] %s525_s21 }
  0x39   : > { %2259 = dma.hbm_to_vmem [thread:$0]  (!%p2799_p10), %s480_s23, 256, %s482_s5, %s470_s9, %s2640_s12, %s2640_s12, %s2641_s11  }
  0x3a   : > { %s522_s25 = scalar_lea.hbm %s3311_s4, %s2797_s29  ;;  %s3312_s8 = sld [smem:[#allocation30_spill]] }
  0x3b   : > { %s523_s14 = sshll.u32 %s522_s25, 4  ;;  %s573_s9 = scalar_lea.vmem [#allocation9], %s2794_s22  ;;  %s524_s14 = int_to_ptr.hbm [resolvable:$true] %s523_s14 }
  0x3c   : > { %2265 = dma.hbm_to_vmem [thread:$0]  (!%p2799_p10), %s524_s14, 256, %s526_s21, %s2810_s13, %s2640_s12, %s2640_s12, %s2641_s11  }
  0x3d   : > { %s581_s3 = sshll.u32 %s573_s9, 4  ;;  %s2135_s7 = sshll.u32 %s2787_s27, 5  ;;  %s582_s3 = int_to_ptr.vmem [resolvable:$true] %s581_s3 }
  0x3e   : > { %s2229_s25 = sshll.u32 %s2630_s18, 5  ;;  %s3313_s10 = sld [smem:[#allocation32_spill]] }
  0x3f   : > { %s601_s2 = scalar_lea.vmem [#allocation10], %s2135_s7  ;;  %s598_s22 = scalar_lea.sflag [#allocation11], %s2787_s27 }
  0x40   : > { %s578_s5 = scalar_lea.hbm %s3312_s8, %s2797_s29  ;;  %s609_s21 = sshll.u32 %s601_s2, 4  ;;  %s610_s21 = int_to_ptr.vmem [resolvable:$true] %s609_s21 }
  0x41   : > { %s579_s23 = sshll.u32 %s578_s5, 4  ;;  %s580_s23 = int_to_ptr.hbm [resolvable:$true] %s579_s23 }
  0x42   : > { %2271 = dma.hbm_to_vmem [thread:$0]  (!%p2799_p10), %s580_s23, 256, %s582_s3, %s536_s6, %s2640_s12, %s2640_s12, %s2641_s11  }
  0x43   : > { %639 = sbr.rel (%p2823_p13) target bundleno = 2002 (0x7d2), region = 76  ;;  %s641_s6 = sand.u32 (!%p2823_p13), 1, %s2614_s30  }
  0x44   : > { %s606_s14 = scalar_lea.hbm %s3313_s10, %s2229_s25  ;;  %s2879_s19 = sshll.u32 (!%p2823_p13), %s641_s6, 4 }
  0x45   : > { %s607_s29 = sshll.u32 %s606_s14, 4  ;;  %s642_s5 = scalar_lea.sflag (!%p2823_p13), [#allocation3], %s641_s6  ;;  %s608_s29 = int_to_ptr.hbm [resolvable:$true] %s607_s29 }
  0x46   : > { %2274 = dma.hbm_to_vmem [thread:$0]  (!%p2799_p10), %s608_s29, 512, %s610_s21, %s598_s22, %s2640_s12, %s2640_s12, %s2641_s11  }
  0x48   : > { %2593 = dma.done.wait (%p2789_p9), %s642_s5, 256  }
  0x49   : > { %2595 = vsyncadd (%p2789_p9), %s642_s5, 4294967040  ;;  %s3314_s27 = sadd.s32 4294967295, %s2638_s20  }
  0x4a   : > { %s651_s11 = sand.u32 1, %s3314_s27  }
  0x4b   : > { %s652_s12 = scalar_lea.sflag [#allocation5], %s651_s11 }
  0x4c   : > { %2597 = dma.done.wait (%p2789_p9), %s652_s12, 512  }
  0x4d   : > { %2599 = vsyncadd (%p2789_p9), %s652_s12, 4294966784  ;;  %s672_s9 = scalar_lea.sflag [#allocation8], %s651_s11 }
  0x4e   : > { %2601 = dma.done.wait (%p2789_p9), %s672_s9, 512  }
  0x4f   : > { %2603 = vsyncadd (%p2789_p9), %s672_s9, 4294966784  ;;  %s2144_s7 = sshll.u32 %s641_s6, 5  ;;  %s692_s15 = scalar_lea.sflag [#allocation11], %s641_s6 }
  0x50   : > { %s2900_s13 = scalar_lea.vmem [#allocation10], %s2144_s7 }
  0x51   : > { %2605 = dma.done.wait (%p2789_p9), %s692_s15, 512  }
  0x52   : > { %2607 = vsyncadd (%p2789_p9), %s692_s15, 4294966784  ;;  %p790_p0 = scmp.lt.s32.totalorder %s2626_s17, 1  ;;  %p797_p1 = scmp.lt.s32.totalorder %s2622_s16, 1 }
  0x53   : > { %s3315_s0 = sld [smem:[#allocation23_spill]]  ;;  %p2147_p2 = scmp.ne.s32.totalorder %s2622_s16, 0 }
  0x54   : > { %s3355_s17 = smov (!%p790_p0, %s2626_s17), 1  ;;  %s3317_s25 = sld [smem:[#allocation29_spill]] }
  0x55   : > { %s2912_s14 = scalar_select %p797_p1, %s2622_s16, 1 }
  0x56   : > { %s2145_s28 = sshll.u32 %s3355_s17, 2  ;;  %s3318_s23 = sld [smem:[#allocation31_spill]] }
  0x57   : > { %s3319_s2 = sld [smem:[#allocation33_spill]] }
  0x58   : > { %s3320_s22 = sld [smem:[#allocation34_spill]] }
  0x59   : > { %s793_s5 = scalar_lea.vmem %s3315_s0, %s2145_s28  ;;  %s3321_s27 = sld [smem:[#allocation35_spill]] }
  0x5a   : > { %s802_s3 = scalar_lea.vmem %s3317_s25, %s2912_s14  ;;  %s3322_s7 = sld [smem:[#allocation36_spill]] }
  0x5c   : > { %s805_s4 = scalar_lea.vmem %s3318_s23, %s2912_s14  ;;  %823 = sbr.rel (%p2147_p2) target bundleno = 99 (0x63), region = 104 }
  0x5d   : > { %s808_s21 = scalar_lea.vmem %s3319_s2, %s2912_s14 }
  0x5e   : > { %s811_s6 = scalar_lea.vmem %s3320_s22, %s2912_s14 }
  0x5f   : > { %s814_s11 = scalar_lea.vmem %s3321_s27, %s2912_s14 }
  0x60   : > { %s2949_s25 = scalar_lea.vmem %s3322_s7, %s2145_s28 }
  0x61   : > { %v824_v0 = vld [vmem:[%s793_s5] sm:$0xf]  ;;  %vm825_vm0 = vcmask 257024  }
  0x62   : > { %826 = vst.msk [vmem:[%s2949_s25] sm:$0xf] %vm825_vm0, %v824_v0 }
  0x63 PF: > { %s3323_s8 = scalar_lea.vmem [#allocation2], %s2879_s19  ;;  %s3324_s0 = scalar_lea.vmem [#allocation4], %s2879_s19  ;;  %vm860_vm1 = vcmask 261120   ;;  %v2645_v13 = vmov 1983009808   ;;  %vm939_vm2 = vcmask 1047556  }
  0x64   : > { %v2231_v1 = vld [vmem:[%s3323_s8 + $0x8] sm:$0xff]  ;;  %s3325_s10 = smov %s3323_s8  ;;  %s3326_s30 = smov %s3324_s0  ;;  %v944_v14 = vunpack.c.l.s4 %v2645_v13  ;;  %v2646_v20 = vmov 1934713408   ;;  %vm1292_vm3 = vcmask 64512   ;;  %vm1656_vm5 = vcmask 130048  }
  0x65   : > { %v2233_v2 = vld [vmem:[%s3324_s0 + $0x8] sm:$0xff]  ;;  %v2230_v3 = vld [vmem:[%s3325_s10] sm:$0xff]  ;;  %870 = vmatpush.bf16.msra.mxu0 %v2231_v1  ;;  %s2642_s16 = smov 112   ;;  %s2643_s18 = smov 104   ;;  %v968_v21 = vunpack.c.l.s4 %v2646_v20  ;;  %vm1658_vm6 = vcmask 195584   ;;  %vm1803_vm11 = vcmask 523264  }
  0x66   : > { %v2232_v4 = vld [vmem:[%s3326_s30] sm:$0xff]  ;;  %896 = vmatpush.bf16.msra.mxu1 %v2233_v2  ;;  %s2644_s23 = smov 120   ;;  %v2974_v17 = vunpack.c.0.s8 %v944_v14  ;;  %s3327_s24 = scalar_lea.vmem [#allocation6], %s2879_s19  ;;  %vm1854_vm15 = vcmask 257024  }
  0x67   : > { %v2980_v29 = vunpack.c.0.s8 %v968_v21  ;;  %s3328_s26 = smov %s3327_s24  ;;  %s3329_s5 = scalar_lea.vmem %s3264_s1, %s3355_s17 }
  0x68   : > { %s2648_s17 = smov 16   ;;  %s2649_s9 = smov 24  }
  0x69   : > { %871 = vmatpush.bf16.msra.mxu0 %v2230_v3  ;;  %v2962_v5 = vld [vmem:[%s2949_s25] sm:$0xf]  ;;  %s2650_s15 = smov 8   ;;  %s3330_s2 = scalar_lea.vmem [#allocation7], %s2879_s19 }
  0x6a   : > { %897 = vmatpush.bf16.msra.mxu1 %v2232_v4  ;;  %s3331_s22 = smov %s3330_s2  ;;  %s3332_s27 = scalar_lea.vmem [#allocation9], %s2879_s19 }
  0x6b   : > { %s3333_s12 = smov %s3332_s27  ;;  %s3334_s8 = sld [smem:[#allocation28_spill]] }
  0x6c   : > { %2156 = vmatmul.msk.bf16.vlgmr.msra.gmra.mxu0 %vm860_vm1, %v2962_v5 }
  0x6d   : > { %2165 = vmatmul.msk.bf16.vlgmr.msra.gmra.mxu1 %vm860_vm1, %v2962_v5 }
  0x71   : > { %s3335_s0 = scalar_lea.vmem %s3334_s8, %s2912_s14 }
  0xe9   : > { %v873_v6 = vpop.f32.mrf.mxu0 }
  0xea   : > { %v899_v7 = vpop.f32.mrf.mxu1  ;;  %v877_v8 = vmul.f32 0.35355338, %v873_v6 }
  0xeb   : > { %1053 = vrot.lane.b32.xlu0 %v899_v7, %s2642_s16  ;;  %v1061_v28 = vrot.slane %v899_v7, 4 }
  0xec   : > { %935 = vrot.lane.b32.xlu2 %v877_v8, %s2643_s18  ;;  %932 = vrot.lane.b32.xlu1 %v877_v8, %s2642_s16  ;;  %v941_v25 = vrot.slane %v877_v8, 4 }
  0xf1   : > { %v875_v9 = vpop.f32.mrf.mxu0 }
  0xf2   : > { %v901_v10 = vpop.f32.mrf.mxu1  ;;  %v2235_v9 = vld [vmem:[%s3327_s24 + $0x8] sm:$0xff] }
  0xf3   : > { %1056 = vrot.lane.b32.xlu0 %v899_v7, %s2643_s18  ;;  %921 = vmatpush.bf16.msra.mxu2 %v2235_v9 }
  0xf4   : > { %929 = vrot.lane.b32.xlu2 %v877_v8, %s2644_s23  ;;  %1050 = vrot.lane.b32.xlu1 %v899_v7, %s2644_s23 }
 0x146   : > { %v936_v11 = vpop.permute.xlu2 %935 }
 0x147   : > { %v951_v16 = vrot.slane %v936_v11, 4 }
 0x14e   : > { %v930_v12 = vpop.permute.xlu2 %929 }
 0x14f   : > { %v953_v15 = vrot.slane %v930_v12, 4  ;;  %v952_v19 = vsel %vm939_vm2, %v951_v16, %v930_v12 }
 0x150   : > { %v958_v24 = vperm.slane %v952_v19, %v2974_v17  ;;  %v2234_v19 = vld [vmem:[%s3328_s26] sm:$0xff] }
 0x151   : > { %v954_v18 = vsel %vm939_vm2, %v936_v11, %v953_v15  ;;  %922 = vmatpush.bf16.msra.mxu2 %v2234_v19 }
 0x152   : > { %v962_v22 = vperm.slane %v954_v18, %v2974_v17  ;;  %v963_v34 = vrot.slane %v958_v24, 4 }
 0x154   : > { %v975_v32 = vrot.slane %v962_v22, 4  ;;  %2174 = vmatmul.msk.bf16.vlgmr.msra.gmra.mxu2 %vm860_vm1, %v2962_v5 }
 0x15d   : > { %v1054_v23 = vpop.permute.xlu0 %1053 }
 0x15e   : > { %v1059_v26 = vrot.slane %v1054_v23, 4  ;;  %v933_v27 = vpop.permute.xlu1 %932  ;;  %v1062_v35 = vsel %vm939_vm2, %v1054_v23, %v1061_v28 }
 0x15f   : > { %v938_v30 = vrot.slane %v933_v27, 4  ;;  %v942_v31 = vsel %vm939_vm2, %v933_v27, %v941_v25  ;;  %v1070_v42 = vperm.slane %v1062_v35, %v2974_v17 }
 0x160   : > { %v950_v33 = vperm.slane %v942_v31, %v2974_v17  ;;  %v1060_v37 = vsel %vm939_vm2, %v1059_v26, %v899_v7 }
 0x161   : > { %v940_v36 = vsel %vm939_vm2, %v938_v30, %v877_v8  ;;  %v1066_v47 = vperm.slane %v1060_v37, %v2974_v17  ;;  %v1097_v57 = vrot.slane %v1070_v42, 4 }
 0x162   : > { %v946_v38 = vperm.slane %v940_v36, %v2974_v17  ;;  %v976_v39 = vsel %vm939_vm2, %v975_v32, %v950_v33  ;;  %v977_v40 = vrot.slane %v950_v33, 4 }
 0x163   : > { %v982_v41 = vperm.slane %v976_v39, %v2980_v29  ;;  %v1085_v60 = vrot.slane %v1066_v47, 4 }
 0x164   : > { %v964_v43 = vsel %vm939_vm2, %v963_v34, %v946_v38  ;;  %v965_v44 = vrot.slane %v946_v38, 4  ;;  %v978_v45 = vsel %vm939_vm2, %v962_v22, %v977_v40 }
 0x165   : > { %v1057_v46 = vpop.permute.xlu0 %1056  ;;  %v970_v48 = vperm.slane %v964_v43, %v2980_v29  ;;  %v986_v49 = vperm.slane %v978_v45, %v2980_v29  ;;  %v991_v52 = vrot.slane %v982_v41, 4 }
 0x166   : > { %v1071_v50 = vrot.slane %v1057_v46, 4  ;;  %v966_v51 = vsel %vm939_vm2, %v958_v24, %v965_v44  ;;  %v1051_v53 = vpop.permute.xlu1 %1050 }
 0x167   : > { %v974_v54 = vperm.slane %v966_v51, %v2980_v29  ;;  %v987_v55 = vrot.slane %v970_v48, 4  ;;  %v993_v56 = vrot.slane %v986_v49, 4  ;;  %v1073_v59 = vrot.slane %v1051_v53, 4 }
 0x168   : > { %v1072_v58 = vsel %vm939_vm2, %v1071_v50, %v1051_v53  ;;  %v992_v1 = vsel %vm939_vm2, 0.0, %v991_v52 }
 0x169   : > { %v989_v61 = vrot.slane %v974_v54, 4  ;;  %v994_v62 = vsel %vm939_vm2, 0.0, %v993_v56  ;;  %v1078_v63 = vperm.slane %v1072_v58, %v2974_v17  ;;  %v988_v0 = vsel %vm939_vm2, 0.0, %v987_v55 }
 0x16a   : > { %v1011_v2 = vrot.slane %v994_v62, 4  ;;  %v1074_v3 = vsel %vm939_vm2, %v1057_v46, %v1073_v59  ;;  %v1006_v18 = vsel %vm939_vm2, %v993_v56, %v982_v41 }
 0x16b   : > { %v990_v4 = vsel %vm939_vm2, 0.0, %v989_v61  ;;  %v1082_v6 = vperm.slane %v1074_v3, %v2974_v17  ;;  %v1083_v7 = vrot.slane %v1078_v63, 4  ;;  %v1086_v8 = vsel %vm939_vm2, %v1078_v63, %v1085_v60 }
 0x16c   : > { %v1000_v10 = vrot.slane %v990_v4, 4  ;;  %v1012_v11 = vsel %vm939_vm2, %v1011_v2, %v992_v1  ;;  %v1094_v12 = vperm.slane %v1086_v8, %v2980_v29  ;;  %v995_v13 = vsel %vm939_vm2, %v989_v61, %v970_v48 }
 0x16d   : > { %v1084_v14 = vsel %vm939_vm2, %v1083_v7, %v1066_v47  ;;  %v1095_v15 = vrot.slane %v1082_v6, 4  ;;  %v1098_v16 = vsel %vm939_vm2, %v1082_v6, %v1097_v57  ;;  %v999_v25 = vperm.slane %v995_v13, %v2974_v17 }
 0x16e   : > { %v1090_v20 = vperm.slane %v1084_v14, %v2980_v29  ;;  %v1106_v21 = vperm.slane %v1098_v16, %v2980_v29  ;;  %v1109_v22 = vrot.slane %v1094_v12, 4  ;;  %v1001_v23 = vsel %vm939_vm2, %v1000_v10, %v988_v0 }
 0x16f   : > { %v1096_v24 = vsel %vm939_vm2, %v1095_v15, %v1070_v42  ;;  %v1005_v26 = vperm.slane %v1001_v23, %v2974_v17  ;;  %v1016_v27 = vperm.slane %v1012_v11, %v2974_v17  ;;  %v1010_v50 = vperm.slane %v1006_v18, %v2974_v17 }
 0x170   : > { %v1102_v28 = vperm.slane %v1096_v24, %v2980_v29  ;;  %v1107_v30 = vrot.slane %v1090_v20, 4  ;;  %v1110_v31 = vsel %vm939_vm2, 0.0, %v1109_v22  ;;  %v1113_v32 = vrot.slane %v1106_v21, 4 }
 0x171   : > { %v1115_v33 = vsel %vm939_vm2, %v1109_v22, %v1090_v20  ;;  %v1120_v34 = vrot.slane %v1110_v31, 4  ;;  %v1017_v35 = vrot.slane %v1005_v26, 4  ;;  %v1029_v36 = vrot.slane %v1016_v27, 4 }
 0x172   : > { %v1108_v37 = vsel %vm939_vm2, 0.0, %v1107_v30  ;;  %v1111_v38 = vrot.slane %v1102_v28, 4  ;;  %v1114_v39 = vsel %vm939_vm2, 0.0, %v1113_v32  ;;  %v1119_v40 = vperm.slane %v1115_v33, %v2974_v17 }
 0x173   : > { %v1131_v41 = vrot.slane %v1114_v39, 4  ;;  %v1121_v42 = vsel %vm939_vm2, %v1120_v34, %v1108_v37  ;;  %v1126_v43 = vsel %vm939_vm2, %v1113_v32, %v1102_v28  ;;  %v1018_v44 = vsel %vm939_vm2, %v1017_v35, %v999_v25 }
 0x174   : > { %v1112_v45 = vsel %vm939_vm2, 0.0, %v1111_v38  ;;  %v1125_v46 = vperm.slane %v1121_v42, %v2974_v17  ;;  %v1130_v47 = vperm.slane %v1126_v43, %v2974_v17  ;;  %v1139_v48 = vrot.slane %v1119_v40, 4 }
 0x175   : > { %v1132_v49 = vsel %vm939_vm2, %v1131_v41, %v1112_v45  ;;  %v1024_v55 = vperm.slane %v1018_v44, %v2980_v29  ;;  %v1030_v56 = vsel %vm939_vm2, %v1029_v36, %v1010_v50  ;;  %v1031_v63 = vrot.slane %v1010_v50, 4 }
 0x176   : > { %v1136_v51 = vperm.slane %v1132_v49, %v2974_v17  ;;  %v1137_v52 = vrot.slane %v1125_v46, 4  ;;  %v1151_v53 = vrot.slane %v1130_v47, 4  ;;  %v1140_v54 = vsel %vm939_vm2, %v1125_v46, %v1139_v48 }
 0x177   : > { %v1148_v59 = vperm.slane %v1140_v54, %v2980_v29  ;;  %v1036_v1 = vperm.slane %v1030_v56, %v2980_v29  ;;  %v1019_v6 = vrot.slane %v999_v25, 4  ;;  %v1043_v8 = vrot.slane %v1024_v55, 4 }
 0x178   : > { %v1138_v57 = vsel %vm939_vm2, %v1137_v52, %v1119_v40  ;;  %v1149_v58 = vrot.slane %v1136_v51, 4  ;;  %v1152_v60 = vsel %vm939_vm2, %v1136_v51, %v1151_v53  ;;  %v1032_v12 = vsel %vm939_vm2, %v1016_v27, %v1031_v63 }
 0x179   : > { %v1144_v61 = vperm.slane %v1138_v57, %v2980_v29  ;;  %v1160_v62 = vperm.slane %v1152_v60, %v2980_v29  ;;  %v1167_v7 = vrot.slane %v1148_v59, 4  ;;  %v1041_v13 = vrot.slane %v1036_v1, 4 }
 0x17a   : > { %v1150_v0 = vsel %vm939_vm2, %v1149_v58, %v1130_v47  ;;  %v1020_v15 = vsel %vm939_vm2, %v1005_v26, %v1019_v6  ;;  %v1044_v16 = vsel %vm939_vm2, %v1036_v1, %v1043_v8  ;;  %v1040_v19 = vperm.slane %v1032_v12, %v2980_v29  ;;  %v829_v26 = vld [vmem:[%s3329_s5] sm:$0x1] }
 0x17b   : > { %v1156_v2 = vperm.slane %v1150_v0, %v2980_v29  ;;  %v1163_v3 = vrot.slane %v1144_v61, 4  ;;  %v1165_v4 = vrot.slane %v1160_v62, 4  ;;  %v1168_v18 = vsel %vm939_vm2, %v1160_v62, %v1167_v7 }
 0x17c   : > { %v1042_v20 = vsel %vm939_vm2, %v1041_v13, %v1024_v55  ;;  %v1028_v21 = vperm.slane %v1020_v15, %v2980_v29  ;;  %v1045_v22 = vrot.slane %v1040_v19, 4  ;;  %vm830_vm4 = vcmp.ne.s32.totalorder %v829_v26, 0 }
 0x17d   : > { %v1164_v9 = vsel %vm939_vm2, %v1156_v2, %v1163_v3  ;;  %v1166_v10 = vsel %vm939_vm2, %v1165_v4, %v1148_v59  ;;  %v1161_v11 = vrot.slane %v1156_v2, 4  ;;  %v2647_v28 = vmov -1e+09  }
 0x17e   : > { %2177 = vmatpush.xpose.msk.msra.mxu3 %vm1292_vm3, %v1164_v9  ;;  %v1047_v23 = vrot.slane %v1028_v21, 4  ;;  %v1046_v24 = vsel %vm939_vm2, %v1045_v22, %v1028_v21  ;;  %v831_v30 = vsel %vm830_vm4, 0.0, %v2647_v28 }
 0x17f   : > { %v1162_v14 = vsel %vm939_vm2, %v1161_v11, %v1144_v61  ;;  %v1290_v31 = vperm.slane %v831_v30, 0 }
 0x180   : > { %2175 = vmatpush.xpose.msk.msrb.mxu0 %vm1292_vm3, %v1162_v14  ;;  %v1048_v25 = vsel %vm939_vm2, %v1040_v19, %v1047_v23 }
 0x181   : > { %2178 = vmatmul.msk.f32.vlgmr.msra.gmra.mxu3 %vm1292_vm3, %v1044_v16 }
 0x182   : > { %2179 = vmatpush.xpose.msk.msrb.mxu3 %vm1292_vm3, %v1166_v10 }
 0x183   : > { %2176 = vmatmul.msk.f32.vlgmr.msrb.gmra.mxu0 %vm1292_vm3, %v1042_v20 }
 0x184   : > { %2181 = vmatpush.xpose.msk.msra.mxu0 %vm1292_vm3, %v1168_v18 }
 0x189   : > { %2180 = vmatmul.msk.f32.vlgmr.msrb.gmra.mxu3 %vm1292_vm3, %v1046_v24 }
 0x18b   : > { %2182 = vmatmul.msk.f32.vlgmr.msra.gmra.mxu0 %vm1292_vm3, %v1048_v25 }
 0x1d7   : > { %v924_v27 = vpop.f32.mrf.mxu2 }
 0x1d8   : > { %v1181_v0 = vrot.slane %v924_v27, 4 }
 0x1df   : > { %v926_v32 = vpop.f32.mrf.mxu2 }
 0x200   : > { %v1316_v33 = vpop.f32.mrf.mxu0 }
 0x201   : > { %v1317_v34 = vadd.f32 %v1316_v33, %v1290_v31 }
 0x203   : > { %v1397_v35 = vsel %vm1292_vm3, %v1317_v34, -inf }
 0x204   : > { %v1342_v36 = vpop.f32.mrf.mxu3  ;;  %1398 = vmax.xlane.f32.xlu2 %v1397_v35 }
 0x205   : > { %v1343_v37 = vadd.f32 %v1342_v36, %v1290_v31 }
 0x207   : > { %v1400_v38 = vsel %vm1292_vm3, %v1343_v37, -inf }
 0x208   : > { %1401 = vmax.xlane.f32.xlu1 %v1400_v38  ;;  %v1394_v39 = vpop.f32.mrf.mxu0 }
 0x209   : > { %v1395_v40 = vadd.f32 %v1394_v39, %v1290_v31 }
 0x20b   : > { %v1406_v41 = vsel %vm1292_vm3, %v1395_v40, -inf }
 0x20c   : > { %v1368_v42 = vpop.f32.mrf.mxu3  ;;  %1407 = vmax.xlane.f32.xlu2 %v1406_v41 }
 0x20d   : > { %v1369_v43 = vadd.f32 %v1368_v42, %v1290_v31 }
 0x20f   : > { %v1403_v44 = vsel %vm1292_vm3, %v1369_v43, -inf }
 0x210   : > { %1404 = vmax.xlane.f32.xlu0 %v1403_v44 }
 0x221   : > { %1173 = vrot.lane.b32.xlu1 %v924_v27, %s2642_s16 }
 0x224   : > { %1170 = vrot.lane.b32.xlu0 %v924_v27, %s2644_s23  ;;  %1176 = vrot.lane.b32.xlu2 %v924_v27, %s2643_s18 }
 0x277   : > { %v1399_v45 = vpop.xlane.xlu2 %1398 }
 0x278   : > { %v1409_v46 = vsub.f32 %v1317_v34, %v1399_v45 }
 0x27a   : > { %v1413_v47 = vmul.f32 1.442695, %v1409_v46 }
 0x27b   : > { %v1402_v48 = vpop.xlane.xlu1 %1401 }
 0x27c   : > { %2358 = vpow2.f32 %v1413_v47  ;;  %v1410_v49 = vsub.f32 %v1343_v37, %v1402_v48 }
 0x27e   : > { %v1415_v50 = vmul.f32 1.442695, %v1410_v49 }
 0x27f   : > { %v1408_v52 = vpop.xlane.xlu2 %1407 }
 0x280   : > { %2360 = vpow2.f32 %v1415_v50  ;;  %v1412_v57 = vsub.f32 %v1395_v40, %v1408_v52 }
 0x282   : > { %v3084_v51 = vpop.eup %2358  ;;  %v1419_v60 = vmul.f32 1.442695, %v1412_v57 }
 0x283   : > { %v1405_v53 = vpop.xlane.xlu0 %1404  ;;  %v1421_v54 = vsel %vm1292_vm3, %v3084_v51, 0.0 }
 0x284   : > { %v1411_v55 = vsub.f32 %v1369_v43, %v1405_v53  ;;  %1422 = vadd.xlane.f32.xlu2 %v1421_v54 }
 0x286   : > { %v3088_v56 = vpop.eup %2360  ;;  %v1417_v58 = vmul.f32 1.442695, %v1411_v55 }
 0x287   : > { %v1424_v59 = vsel %vm1292_vm3, %v3088_v56, 0.0  ;;  %v1177_v63 = vpop.permute.xlu2 %1176 }
 0x288   : > { %2362 = vpow2.f32 %v1417_v58  ;;  %1425 = vadd.xlane.f32.xlu1 %v1424_v59  ;;  %v1191_v2 = vrot.slane %v1177_v63, 4 }
 0x289   : > { %2364 = vpow2.f32 %v1419_v60 }
 0x28e   : > { %v3092_v61 = vpop.eup %2362 }
 0x28f   : > { %v1427_v62 = vsel %vm1292_vm3, %v3092_v61, 0.0  ;;  %v3096_v3 = vpop.eup %2364 }
 0x290   : > { %1428 = vadd.xlane.f32.xlu0 %v1427_v62  ;;  %v1430_v13 = vsel %vm1292_vm3, %v3096_v3, 0.0 }
 0x293   : > { %v1174_v1 = vpop.permute.xlu1 %1173 }
 0x294   : > { %v1179_v4 = vrot.slane %v1174_v1, 4  ;;  %v1182_v6 = vsel %vm939_vm2, %v1174_v1, %v1181_v0 }
 0x295   : > { %v1190_v8 = vperm.slane %v1182_v6, %v2974_v17 }
 0x296   : > { %v1180_v7 = vsel %vm939_vm2, %v1179_v4, %v924_v27  ;;  %v1171_v9 = vpop.permute.xlu0 %1170 }
 0x297   : > { %v1186_v10 = vperm.slane %v1180_v7, %v2974_v17  ;;  %v1192_v11 = vsel %vm939_vm2, %v1191_v2, %v1171_v9  ;;  %v1193_v12 = vrot.slane %v1171_v9, 4  ;;  %v1217_v18 = vrot.slane %v1190_v8, 4 }
 0x298   : > { %v1198_v14 = vperm.slane %v1192_v11, %v2974_v17  ;;  %1431 = vadd.xlane.f32.xlu0 %v1430_v13 }
 0x299   : > { %v1205_v15 = vrot.slane %v1186_v10, 4  ;;  %v1194_v16 = vsel %vm939_vm2, %v1177_v63, %v1193_v12 }
 0x29a   : > { %v1202_v19 = vperm.slane %v1194_v16, %v2974_v17  ;;  %v1203_v20 = vrot.slane %v1198_v14, 4 }
 0x29b   : > { %v1206_v21 = vsel %vm939_vm2, %v1198_v14, %v1205_v15 }
 0x29c   : > { %v1204_v22 = vsel %vm939_vm2, %v1203_v20, %v1186_v10  ;;  %v1214_v23 = vperm.slane %v1206_v21, %v2980_v29  ;;  %v1215_v24 = vrot.slane %v1202_v19, 4  ;;  %v1218_v25 = vsel %vm939_vm2, %v1202_v19, %v1217_v18 }
 0x29d   : > { %v1210_v26 = vperm.slane %v1204_v22, %v2980_v29  ;;  %v1226_v27 = vperm.slane %v1218_v25, %v2980_v29 }
 0x29e   : > { %v1216_v28 = vsel %vm939_vm2, %v1215_v24, %v1190_v8  ;;  %v1229_v30 = vrot.slane %v1214_v23, 4 }
 0x29f   : > { %v1222_v31 = vperm.slane %v1216_v28, %v2980_v29  ;;  %v1227_v32 = vrot.slane %v1210_v26, 4  ;;  %v1233_v33 = vrot.slane %v1226_v27, 4 }
 0x2a0   : > { %v1230_v34 = vsel %vm939_vm2, 0.0, %v1229_v30  ;;  %v1235_v35 = vsel %vm939_vm2, %v1229_v30, %v1210_v26 }
 0x2a1   : > { %v1228_v36 = vsel %vm939_vm2, 0.0, %v1227_v32  ;;  %v1231_v37 = vrot.slane %v1222_v31, 4  ;;  %v1234_v38 = vsel %vm939_vm2, 0.0, %v1233_v33  ;;  %v1239_v39 = vperm.slane %v1235_v35, %v2974_v17 }
 0x2a2   : > { %v1240_v40 = vrot.slane %v1230_v34, 4  ;;  %v1251_v41 = vrot.slane %v1234_v38, 4  ;;  %v1246_v42 = vsel %vm939_vm2, %v1233_v33, %v1222_v31 }
 0x2a3   : > { %v1232_v43 = vsel %vm939_vm2, 0.0, %v1231_v37  ;;  %v1250_v44 = vperm.slane %v1246_v42, %v2974_v17  ;;  %v1259_v45 = vrot.slane %v1239_v39, 4 }
 0x2a4   : > { %v1241_v46 = vsel %vm939_vm2, %v1240_v40, %v1228_v36  ;;  %v1252_v47 = vsel %vm939_vm2, %v1251_v41, %v1232_v43 }
 0x2a5   : > { %v1245_v48 = vperm.slane %v1241_v46, %v2974_v17  ;;  %v1256_v49 = vperm.slane %v1252_v47, %v2974_v17  ;;  %v1271_v50 = vrot.slane %v1250_v44, 4 }
 0x2a7   : > { %v1260_v52 = vsel %vm939_vm2, %v1245_v48, %v1259_v45  ;;  %v1272_v53 = vsel %vm939_vm2, %v1256_v49, %v1271_v50  ;;  %v1257_v54 = vrot.slane %v1245_v48, 4  ;;  %v1269_v55 = vrot.slane %v1256_v49, 4 }
 0x2a8   : > { %v1268_v57 = vperm.slane %v1260_v52, %v2980_v29  ;;  %v1280_v58 = vperm.slane %v1272_v53, %v2980_v29 }
 0x2a9   : > { %v1258_v59 = vsel %vm939_vm2, %v1257_v54, %v1239_v39  ;;  %v1270_v60 = vsel %vm939_vm2, %v1269_v55, %v1250_v44 }
 0x2aa   : > { %v1287_v62 = vrot.slane %v1268_v57, 4  ;;  %v1285_v63 = vrot.slane %v1280_v58, 4  ;;  %v1264_v0 = vperm.slane %v1258_v59, %v2980_v29  ;;  %v1276_v1 = vperm.slane %v1270_v60, %v2980_v29 }
 0x2ac   : > { %v1288_v2 = vsel %vm939_vm2, %v1280_v58, %v1287_v62  ;;  %v1286_v4 = vsel %vm939_vm2, %v1285_v63, %v1268_v57  ;;  %v1283_v6 = vrot.slane %v1264_v0, 4  ;;  %v1281_v7 = vrot.slane %v1276_v1, 4 }
 0x2ad   : > { %1528 = vmatpush.msrb.mxu0 %v1288_v2  ;;  %1505 = vmatpush.msra.mxu3 %v1286_v4 }
 0x2ae   : > { %v1284_v8 = vsel %vm939_vm2, %v1276_v1, %v1283_v6  ;;  %v1282_v9 = vsel %vm939_vm2, %v1281_v7, %v1264_v0 }
 0x2af   : > { %1482 = vmatpush.msrb.mxu2 %v1284_v8  ;;  %1459 = vmatpush.msrb.mxu1 %v1282_v9 }
 0x2f7   : > { %v1423_v10 = vpop.xlane.xlu2 %1422 }
 0x2f8   : > { %2366 = vrcp.f32 %v1423_v10 }
 0x2fb   : > { %v1426_v11 = vpop.xlane.xlu1 %1425 }
 0x2fc   : > { %2368 = vrcp.f32 %v1426_v11 }
 0x2fe   : > { %v2367_v12 = vpop.eup %2366 }
 0x2ff   : > { %v1437_v13 = vmul.f32 %v2367_v12, %v3084_v51 }
 0x301   : > { %2183 = vmatmul.msk.f32.vlgmr.msrb.gmra.mxu1 %vm1292_vm3, %v1437_v13 }
 0x302   : > { %v2369_v14 = vpop.eup %2368 }
 0x303   : > { %v1429_v15 = vpop.xlane.xlu0 %1428  ;;  %v1438_v16 = vmul.f32 %v2369_v14, %v3088_v56 }
 0x304   : > { %2370 = vrcp.f32 %v1429_v15 }
 0x305   : > { %2184 = vmatmul.msk.f32.vlgmr.msrb.gmra.mxu2 %vm1292_vm3, %v1438_v16 }
 0x30a   : > { %v2371_v18 = vpop.eup %2370 }
 0x30b   : > { %v1439_v19 = vmul.f32 %v2371_v18, %v3092_v61  ;;  %v1432_v20 = vpop.xlane.xlu0 %1431 }
 0x30c   : > { %2372 = vrcp.f32 %v1432_v20 }
 0x30d   : > { %2185 = vmatmul.msk.f32.vlgmr.msra.gmra.mxu3 %vm1292_vm3, %v1439_v19 }
 0x312   : > { %v2373_v21 = vpop.eup %2372 }
 0x313   : > { %v1440_v22 = vmul.f32 %v2373_v21, %v3096_v3 }
 0x315   : > { %2186 = vmatmul.msk.f32.vlgmr.msrb.gmra.mxu0 %vm1292_vm3, %v1440_v22 }
 0x37e   : > { %v1461_v51 = vpop.f32.mrf.mxu1 }
 0x37f   : > { %v1535_v24 = vrot.slane %v1461_v51, 4 }
 0x388   : > { %v1484_v23 = vpop.f32.mrf.mxu2 }
 0x389   : > { %v1547_v56 = vrot.slane %v1484_v23, 4 }
 0x390   : > { %v1507_v25 = vpop.f32.mrf.mxu3 }
 0x391   : > { %v1533_v26 = vrot.slane %v1507_v25, 4  ;;  %v1536_v27 = vsel %vm939_vm2, %v1507_v25, %v1535_v24 }
 0x392   : > { %v1544_v28 = vperm.slane %v1536_v27, %v2974_v17  ;;  %v1530_v61 = vpop.f32.mrf.mxu0 }
 0x393   : > { %v1534_v30 = vsel %vm939_vm2, %v1533_v26, %v1461_v51  ;;  %v1545_v31 = vrot.slane %v1530_v61, 4  ;;  %v1548_v32 = vsel %vm939_vm2, %v1530_v61, %v1547_v56  ;;  %v2237_v56 = vld [vmem:[%s3330_s2 + $0x8] sm:$0xff]  ;;  %v2236_v26 = vld [vmem:[%s3331_s22] sm:$0xff] }
 0x394   : > { %v1540_v3 = vperm.slane %v1534_v30, %v2974_v17  ;;  %v1571_v33 = vrot.slane %v1544_v28, 4  ;;  %v1556_v34 = vperm.slane %v1548_v32, %v2974_v17  ;;  %1682 = vmatpush.bf16.msra.mxu1 %v2237_v56 }
 0x395   : > { %v1546_v35 = vsel %vm939_vm2, %v1545_v31, %v1484_v23 }
 0x396   : > { %v1559_v36 = vrot.slane %v1540_v3, 4  ;;  %v1552_v37 = vperm.slane %v1546_v35, %v2974_v17  ;;  %v1569_v38 = vrot.slane %v1556_v34, 4  ;;  %v1572_v39 = vsel %vm939_vm2, %v1556_v34, %v1571_v33 }
 0x397   : > { %v1580_v40 = vperm.slane %v1572_v39, %v2980_v29 }
 0x398   : > { %v1557_v41 = vrot.slane %v1552_v37, 4  ;;  %v1560_v42 = vsel %vm939_vm2, %v1552_v37, %v1559_v36  ;;  %v1570_v43 = vsel %vm939_vm2, %v1569_v38, %v1544_v28  ;;  %1683 = vmatpush.bf16.msra.mxu1 %v2236_v26  ;;  %v2651_v37 = vmov 32.0  }
 0x399   : > { %v1568_v44 = vperm.slane %v1560_v42, %v2980_v29  ;;  %v1576_v45 = vperm.slane %v1570_v43, %v2980_v29  ;;  %v1587_v46 = vrot.slane %v1580_v40, 4  ;;  %2374 = vrcp.f32 %v2651_v37 }
 0x39a   : > { %v1558_v47 = vsel %vm939_vm2, %v1557_v41, %v1540_v3  ;;  %v828_v3 = vunpack.c.l.bf16 %v2962_v5 }
 0x39b   : > { %v1564_v48 = vperm.slane %v1558_v47, %v2980_v29  ;;  %v1583_v49 = vrot.slane %v1568_v44, 4  ;;  %v1585_v50 = vrot.slane %v1576_v45, 4  ;;  %v1588_v52 = vsel %vm939_vm2, 0.0, %v1587_v46 }
 0x39c   : > { %v1600_v53 = vsel %vm939_vm2, %v1587_v46, %v1576_v45  ;;  %v1605_v54 = vrot.slane %v1588_v52, 4 }
 0x39d   : > { %v1581_v55 = vrot.slane %v1564_v48, 4  ;;  %v1584_v57 = vsel %vm939_vm2, 0.0, %v1583_v49  ;;  %v1586_v58 = vsel %vm939_vm2, 0.0, %v1585_v50  ;;  %v1604_v59 = vperm.slane %v1600_v53, %v2974_v17  ;;  %v2243_v50 = vld [vmem:[%s2900_s13 + $0x18] sm:$0xff] }
 0x39e   : > { %v1594_v60 = vrot.slane %v1584_v57, 4  ;;  %v1589_v62 = vsel %vm939_vm2, %v1583_v49, %v1564_v48  ;;  %v1606_v63 = vsel %vm939_vm2, %v1605_v54, %v1586_v58  ;;  %v2239_v48 = vld [vmem:[%s3332_s27 + $0x8] sm:$0xff]  ;;  %v2238_v49 = vld [vmem:[%s3333_s12] sm:$0xff]  ;;  %1811 = vmatpush.bf16.msrb.mxu3 %v2243_v50  ;;  %v2242_v54 = vld [vmem:[%s2900_s13 + $0x10] sm:$0xff] }
 0x39f   : > { %v1582_v0 = vsel %vm939_vm2, 0.0, %v1581_v55  ;;  %v1593_v1 = vperm.slane %v1589_v62, %v2974_v17  ;;  %v1610_v2 = vperm.slane %v1606_v63, %v2974_v17  ;;  %v1625_v4 = vrot.slane %v1604_v59, 4  ;;  %v2375_v38 = vpop.eup %2374  ;;  %1767 = vmatpush.bf16.msra.mxu2 %v2239_v48 }
 0x3a0   : > { %v1595_v6 = vsel %vm939_vm2, %v1594_v60, %v1582_v0  ;;  %v1695_v39 = vmul.f32 32.0, %v2375_v38  ;;  %vm1699_vm7 = vweird.f32 %v2375_v38  ;;  %v2352_v0 = vld [vmem:[%s3335_s0] ss:$0 sm:$0xff] }
 0x3a1   : > { %v1599_v7 = vperm.slane %v1595_v6, %v2974_v17  ;;  %v1613_v8 = vrot.slane %v1593_v1, 4  ;;  %v1626_v9 = vsel %vm939_vm2, %v1610_v2, %v1625_v4  ;;  %v1623_v10 = vrot.slane %v1610_v2, 4  ;;  %v2353_v2 = vld [vmem:[%s802_s3] ss:$0 sm:$0xff] }
 0x3a2   : > { %v1634_v11 = vperm.slane %v1626_v9, %v2980_v29  ;;  %v1696_v40 = vsub.f32 1.0, %v1695_v39  ;;  %1812 = vmatpush.bf16.msrb.mxu3 %v2242_v54  ;;  %v2241_v9 = vld [vmem:[%s2900_s13 + $0x8] sm:$0xff] }
 0x3a3   : > { %v1614_v12 = vsel %vm939_vm2, %v1599_v7, %v1613_v8  ;;  %v1611_v13 = vrot.slane %v1599_v7, 4  ;;  %v1624_v14 = vsel %vm939_vm2, %v1623_v10, %v1604_v59  ;;  %1768 = vmatpush.bf16.msra.mxu2 %v2238_v49  ;;  %v2240_v10 = vld [vmem:[%s2900_s13] sm:$0xff] }
 0x3a4   : > { %v1622_v15 = vperm.slane %v1614_v12, %v2980_v29  ;;  %v1639_v16 = vrot.slane %v1634_v11, 4  ;;  %v1630_v18 = vperm.slane %v1624_v14, %v2980_v29  ;;  %v1697_v41 = vmul.f32 %v2375_v38, %v1696_v40 }
 0x3a5   : > { %v1612_v19 = vsel %vm939_vm2, %v1611_v13, %v1593_v1 }
 0x3a6   : > { %v1640_v17 = vsel %vm939_vm2, %v1639_v16, %v1622_v15  ;;  %v1641_v20 = vrot.slane %v1622_v15, 4  ;;  %v1618_v21 = vperm.slane %v1612_v19, %v2980_v29  ;;  %v1635_v22 = vrot.slane %v1630_v18, 4  ;;  %1813 = vmatpush.bf16.msrb.mxu3 %v2241_v9 }
 0x3a7   : > { %1648 = vrot.lane.b32.xlu0 %v1640_v17, %s2648_s17  ;;  %v1698_v42 = vadd.f32 %v2375_v38, %v1697_v41 }
 0x3a8   : > { %v1642_v51 = vsel %vm939_vm2, %v1634_v11, %v1641_v20  ;;  %v1637_v23 = vrot.slane %v1618_v21, 4  ;;  %v1636_v24 = vsel %vm939_vm2, %v1635_v22, %v1618_v21  ;;  %v2354_v11 = vld [vmem:[%s805_s4] ss:$0 sm:$0xff] }
 0x3a9   : > { %1652 = vrot.lane.b32.xlu2 %v1642_v51, %s2649_s9  ;;  %v1700_v43 = vsel %vm1699_vm7, %v2375_v38, %v1698_v42 }
 0x3aa   : > { %v1638_v25 = vsel %vm939_vm2, %v1630_v18, %v1637_v23  ;;  %1814 = vmatpush.bf16.msrb.mxu3 %v2240_v10  ;;  %v2355_v18 = vld [vmem:[%s808_s21] ss:$0 sm:$0xff] }
 0x3ab   : > { %1644 = vrot.lane.b32.xlu1 %v1638_v25, %s2650_s15 }
 0x403   : > { %v1653_v61 = vpop.permute.xlu2 %1652 }
 0x419   : > { %v1649_v27 = vpop.permute.xlu0 %1648 }
 0x41d   : > { %v1645_v29 = vpop.permute.xlu1 %1644 }
 0x41e   : > { %v1655_v28 = vsel %vm1292_vm3, %v1636_v24, %v1645_v29 }
 0x41f   : > { %v1657_v30 = vsel %vm1656_vm5, %v1655_v28, %v1649_v27 }
 0x420   : > { %v1659_v31 = vsel %vm1658_vm6, %v1657_v30, %v1653_v61 }
 0x421   : > { %v1660_v32 = vpack.c.bf16 %v1659_v31, %v1659_v31 }
 0x423   : > { %2195 = vmatmul.msk.bf16.vlgmr.msra.gmra.mxu1 %vm860_vm1, %v1660_v32 }
 0x4a0   : > { %v1685_v33 = vpop.f32.mrf.mxu1 }
 0x4a1   : > { %v1686_v34 = vadd.f32 %v1685_v33, %v828_v3  ;;  %v2356_v33 = vld [vmem:[%s811_s6] ss:$0 sm:$0xff] }
 0x4a3   : > { %v1691_v35 = vsel %vm860_vm1, %v1686_v34, 0.0 }
 0x4a4   : > { %1692 = vadd.xlane.f32.xlu0 %v1691_v35  ;;  %v2357_v35 = vld [vmem:[%s814_s11] ss:$0 sm:$0xff] }
 0x4a8   : > { %v1687_v36 = vpop.f32.mrf.mxu1 }
 0x517   : > { %v1693_v5 = vpop.xlane.xlu0 %1692 }
 0x518   : > { %v1701_v44 = vmul.f32 %v1700_v43, %v1693_v5 }
 0x51a   : > { %v1702_v45 = vsub.f32 %v1686_v34, %v1701_v44 }
 0x51c   : > { %v1703_v46 = vmul.f32 %v1702_v45, %v1702_v45 }
 0x51e   : > { %v1704_v47 = vsel %vm860_vm1, %v1703_v46, 0.0 }
 0x51f   : > { %1705 = vadd.xlane.f32.xlu1 %v1704_v47 }
 0x592   : > { %v1706_v52 = vpop.xlane.xlu1 %1705 }
 0x593   : > { %v1707_v53 = vmul.f32 %v1706_v52, %v1700_v43 }
 0x595   : > { %v1708_v55 = vadd.f32 1e-06, %v1707_v53 }
 0x597   : > { %2376 = vrsqrt.f32 %v1708_v55  ;;  %vm1715_vm9 = vweird.f32 %v1708_v55 }
 0x59d   : > { %v2377_v57 = vpop.eup %2376 }
 0x59e   : > { %v1710_v58 = vmul.f32 %v2377_v57, %v1708_v55  ;;  %vm1716_vm8 = vweird.f32 %v2377_v57 }
 0x59f   : > { %vm1717_vm10 = vmor %vm1715_vm9, %vm1716_vm8 }
 0x5a0   : > { %v1711_v59 = vmul.f32 %v2377_v57, %v1710_v58 }
 0x5a2   : > { %v1712_v60 = vmul.f32 0.5, %v1711_v59 }
 0x5a4   : > { %v1713_v62 = vsub.f32 1.5, %v1712_v60 }
 0x5a6   : > { %v1714_v63 = vmul.f32 %v2377_v57, %v1713_v62 }
 0x5a8   : > { %v1718_v1 = vsel %vm1717_vm10, %v2377_v57, %v1714_v63 }
 0x5a9   : > { %v1719_v4 = vmul.f32 %v1718_v1, %v1702_v45 }
 0x5ab   : > { %v1723_v6 = vmul.f32 %v2352_v0, %v1719_v4 }
 0x5ad   : > { %v1727_v7 = vadd.f32 %v2353_v2, %v1723_v6 }
 0x5af   : > { %v1728_v8 = vpack.c.bf16 %v1727_v7, %v1727_v7 }
 0x5b1   : > { %2204 = vmatmul.msk.bf16.vlgmr.msra.gmra.mxu2 %vm860_vm1, %v1728_v8 }
 0x634   : > { %v1770_v12 = vpop.f32.mrf.mxu2 }
 0x635   : > { %v1771_v13 = vadd.f32 %v2354_v11, %v1770_v12 }
 0x637   : > { %v1774_v14 = vmax.f32 %v1771_v13, 0.0 }
 0x639   : > { %v1775_v15 = vpack.c.bf16 %v1774_v14, %v1774_v14 }
 0x63b   : > { %2221 = vmatmul.msk.bf16.vlgmr.msrb.gmra.mxu3 %vm1803_vm11, %v1775_v15 }
 0x63c   : > { %v1772_v16 = vpop.f32.mrf.mxu2 }
 0x6be   : > { %v1816_v19 = vpop.f32.mrf.mxu3 }
 0x6bf   : > { %v1817_v17 = vadd.f32 %v2355_v18, %v1816_v19 }
 0x6c1   : > { %v1820_v20 = vadd.f32 %v1817_v17, %v1727_v7 }
 0x6c3   : > { %v1823_v21 = vsel %vm860_vm1, %v1820_v20, 0.0 }
 0x6c4   : > { %1824 = vadd.xlane.f32.xlu2 %v1823_v21 }
 0x6c6   : > { %v1818_v22 = vpop.f32.mrf.mxu3 }
 0x737   : > { %v1825_v51 = vpop.xlane.xlu2 %1824 }
 0x738   : > { %v1826_v23 = vmul.f32 %v1825_v51, %v1700_v43 }
 0x73a   : > { %v1827_v24 = vsub.f32 %v1820_v20, %v1826_v23 }
 0x73c   : > { %v1828_v25 = vmul.f32 %v1827_v24, %v1827_v24 }
 0x73e   : > { %v1829_v56 = vsel %vm860_vm1, %v1828_v25, 0.0 }
 0x73f   : > { %1830 = vadd.xlane.f32.xlu0 %v1829_v56 }
 0x7b2   : > { %v1831_v26 = vpop.xlane.xlu0 %1830 }
 0x7b3   : > { %v1832_v29 = vmul.f32 %v1831_v26, %v1700_v43 }
 0x7b5   : > { %v1833_v27 = vadd.f32 1e-06, %v1832_v29 }
 0x7b7   : > { %2378 = vrsqrt.f32 %v1833_v27  ;;  %vm1840_vm13 = vweird.f32 %v1833_v27 }
 0x7bd   : > { %v2379_v28 = vpop.eup %2378 }
 0x7be   : > { %v1835_v61 = vmul.f32 %v2379_v28, %v1833_v27  ;;  %vm1841_vm12 = vweird.f32 %v2379_v28 }
 0x7bf   : > { %vm1842_vm14 = vmor %vm1840_vm13, %vm1841_vm12 }
 0x7c0   : > { %v1836_v30 = vmul.f32 %v2379_v28, %v1835_v61 }
 0x7c2   : > { %v1837_v31 = vmul.f32 0.5, %v1836_v30 }
 0x7c4   : > { %v1838_v32 = vsub.f32 1.5, %v1837_v31 }
 0x7c6   : > { %v1839_v3 = vmul.f32 %v2379_v28, %v1838_v32 }
 0x7c8   : > { %v1843_v34 = vsel %vm1842_vm14, %v2379_v28, %v1839_v3 }
 0x7c9   : > { %v1844_v36 = vmul.f32 %v1843_v34, %v1827_v24 }
 0x7cb   : > { %v1848_v37 = vmul.f32 %v2356_v33, %v1844_v36 }
 0x7cd   : > { %v1852_v38 = vadd.f32 %v2357_v35, %v1848_v37 }
 0x7cf   : > { %v1853_v39 = vpack.c.bf16 %v1852_v38, %v1852_v38 }
 0x7d1   : > { %1855 = vst.msk [vmem:[%s2949_s25] sm:$0xf] %vm1854_vm15, %v1853_v39 }
 0x7d2 PF: > { %s36_s20 = sadd.s32 1, %s2638_s20   ;;  %s3341_s29 = sld [smem:[#allocation16_spill]] }
 0x7d3   : > { %p33_p3 = scmp.ge.s32.totalorder %s36_s20, 6   ;;  %s3342_s30 = sld [smem:[#allocation17_spill]] }
 0x7d4   : > { %s3343_s15 = sld [smem:[#allocation22_spill]] }
 0x7d5   : > { %s3344_s16 = sld [smem:[#allocation18_spill]]  ;;  %35 = sbr.rel (!%p33_p3) target bundleno = 26 (0x1a), region = 205 }
 0x7d6   : > { %s3345_s17 = sld [smem:[#allocation19_spill]] }
 0x7d7   : > { %s3346_s18 = sld [smem:[#allocation20_spill]] }
 0x7d8   : > { %s3347_s19 = sld [smem:[#allocation21_spill]] }
 0x7da   :  { %1875 = vsyncpa [#allocation3], 1 }
 0x7db   :  { %1877 = vsyncpa [#allocation3 + $0x1], 1 }
 0x7dc   :  { %1878 = vsyncpa [#allocation5], 1 }
 0x7dd   :  { %1880 = vsyncpa [#allocation5 + $0x1], 1 }
 0x7de   :  { %1881 = vsyncpa [#allocation8], 1 }
 0x7df   :  { %1883 = vsyncpa [#allocation8 + $0x1], 1 }
 0x7e0   :  { %1884 = vsyncpa [#allocation11], 1 }
 0x7e1   :  { %1886 = vsyncpa [#allocation11 + $0x1], 1 }

// kernel: transformer_forward.9
= control target key start
LH: loop header
LB: loop body
LE: loop exit
PB: predicated region body
PF: predicated region fallthrough
CT: control target
= control target key end

     0   :  { %s150_s0 = inlined_call_operand.vmem [shape: bf16[16,32], index: 0, kind: input, shape index: {}]   ;;  %s151_s1 = inlined_call_operand.vmem [shape: bf16[32,64], index: 1, kind: input, shape index: {}]   ;;  %s152_s2 = inlined_call_operand.hbm [shape: f32[16,64], index: 2, kind: output, shape index: {}]  }
   0x1   :  { %v90_v0 = vld [vmem:[%s151_s1 + $0x8] sm:$0xff] }
   0x2   :  { %7 = vsyncpa [#allocation3], 0  ;;  %46 = vmatpush.bf16.msra.mxu0 %v90_v0  ;;  %v89_v1 = vld [vmem:[%s151_s1] sm:$0xff]  ;;  %vm36_vm0 = vcmask 261120   ;;  %vm54_vm1 = vcmask 523264   ;;  %s120_s15 = smov [#allocation2]  }
   0x3   :  { %v88_v2 = vld [vmem:[%s150_s0] sm:$0xff]  ;;  %s61_s16 = sshll.u32 %s120_s15, 4  ;;  %s63_s19 = sshll.u32 %s152_s2, 4  ;;  %s62_s16 = int_to_ptr.vmem [resolvable:$true] %s61_s16  ;;  %s64_s19 = int_to_ptr.hbm [resolvable:$true] %s63_s19 }
   0x4   :  { %s121_s1 = smov 128   ;;  %s122_s20 = smov 8  }
   0x6   :  { %47 = vmatpush.bf16.msra.mxu0 %v89_v1 }
   0x9   :  { %87 = vmatmul.msk.bf16.vlgmr.msra.gmra.mxu0 %vm36_vm0, %v88_v2 }
  0x86   :  { %v49_v3 = vpop.f32.mrf.mxu0 }
  0x87   :  { %55 = vst.msk [vmem:[#allocation2] sm:$0xff] %vm54_vm1, %v49_v3 }
  0x8e   :  { %v51_v4 = vpop.f32.mrf.mxu0 }
  0x8f   :  { %56 = vst.msk [vmem:[#allocation2 + $0x8] sm:$0xff] %vm54_vm1, %v51_v4 }
  0x90   :  { %69 = dma.vmem_to_hbm [thread:$0]  %s62_s16, 256, %s64_s19, [#allocation3], %s121_s1, %s121_s1, %s122_s20  }
  0x91   :  { %118 = dma.done.wait [#allocation3], 256  }
  0x92   :  { %119 = vsyncadd [#allocation3], 4294967040 }
  0x93   :  { %74 = vsyncpa [#allocation3], 1 }

// kernel: transformer_forward.8
= control target key start
LH: loop header
LB: loop body
LE: loop exit
PB: predicated region body
PF: predicated region fallthrough
CT: control target
= control target key end

     0   :  { %s5045_s0 = inlined_call_operand.vmem [shape: bf16[2,8,32], index: 0, kind: input, shape index: {}]   ;;  %s5046_s1 = inlined_call_operand.vmem [shape: bf16[2,8,32], index: 1, kind: input, shape index: {}]   ;;  %s5047_s2 = inlined_call_operand.vmem [shape: s32[2,1,8], index: 2, kind: input, shape index: {}]   ;;  %s5048_s3 = inlined_call_operand.vmem [shape: s32[2,1,8], index: 3, kind: input, shape index: {}]   ;;  %s5049_s4 = inlined_call_operand.vmem [shape: bf16[2,32,32], index: 4, kind: input, shape index: {}]   ;;  %s5050_s5 = inlined_call_operand.vmem [shape: bf16[2,32,32], index: 5, kind: input, shape index: {}]   ;;  %s5051_s6 = inlined_call_operand.vmem [shape: bf16[2,32,32], index: 6, kind: input, shape index: {}]   ;;  %s5052_s7 = inlined_call_operand.hbm [shape: bf16[2,32,32], index: 7, kind: input, shape index: {}]   ;;  %s5053_s8 = inlined_call_operand.vmem [shape: f32[2,1,32], index: 8, kind: input, shape index: {}, may-alias: {8,14,20}]   ;;  %s5054_s9 = inlined_call_operand.vmem [shape: f32[2,1,32], index: 9, kind: input, shape index: {}, may-alias: {9,15,19,21}]   ;;  %s5055_s10 = inlined_call_operand.hbm [shape: bf16[2,32,32], index: 10, kind: input, shape index: {}]   ;;  %s5056_s11 = inlined_call_operand.hbm [shape: bf16[2,32,32], index: 11, kind: input, shape index: {}]   ;;  %s5057_s12 = inlined_call_operand.hbm [shape: bf16[2,32,32], index: 12, kind: input, shape index: {}]   ;;  %s5058_s13 = inlined_call_operand.hbm [shape: bf16[2,32,32], index: 13, kind: input, shape index: {}]   ;;  %s5059_s14 = inlined_call_operand.vmem [shape: f32[2,1,32], index: 14, kind: input, shape index: {}, may-alias: {8,14,20}]   ;;  %s5060_s15 = inlined_call_operand.vmem [shape: f32[2,1,32], index: 15, kind: input, shape index: {}, may-alias: {9,15,19,21}]   ;;  %s5061_s16 = inlined_call_operand.hbm [shape: bf16[2,32,64], index: 16, kind: input, shape index: {}]   ;;  %s5062_s17 = inlined_call_operand.vmem [shape: f32[2,1,64], index: 17, kind: input, shape index: {}]   ;;  %s5063_s18 = inlined_call_operand.vmem [shape: bf16[2,64,32], index: 18, kind: input, shape index: {}]   ;;  %s5064_s19 = inlined_call_operand.vmem [shape: f32[2,1,32], index: 19, kind: input, shape index: {}, may-alias: {9,15,19,21}]   ;;  %s5065_s20 = inlined_call_operand.vmem [shape: f32[2,1,32], index: 20, kind: input, shape index: {}, may-alias: {8,14,20}]   ;;  %s5066_s21 = inlined_call_operand.vmem [shape: f32[2,1,32], index: 21, kind: input, shape index: {}, may-alias: {9,15,19,21}]   ;;  %s5067_s22 = inlined_call_operand.vmem [shape: bf16[2,8,32], index: 22, kind: output, shape index: {}]  }
   0x1   :  { %5075 = sst [smem:[#allocation24_spill]] %s5045_s0 }
   0x2   :  { %5076 = sst [smem:[#allocation25_spill]] %s5046_s1 }
   0x3   :  { %5077 = sst [smem:[#allocation26_spill]] %s5047_s2 }
   0x4   :  { %5078 = sst [smem:[#allocation27_spill]] %s5048_s3 }
   0x5   :  { %5079 = sst [smem:[#allocation28_spill]] %s5049_s4 }
   0x6   :  { %5080 = sst [smem:[#allocation29_spill]] %s5050_s5 }
   0x7   :  { %5081 = sst [smem:[#allocation30_spill]] %s5051_s6 }
   0x8   :  { %5082 = sst [smem:[#allocation31_spill]] %s5052_s7 }
   0x9   :  { %5083 = sst [smem:[#allocation32_spill]] %s5053_s8 }
   0xa   :  { %5084 = sst [smem:[#allocation33_spill]] %s5055_s10 }
   0xb   :  { %5085 = sst [smem:[#allocation34_spill]] %s5056_s11 }
   0xc   :  { %5086 = sst [smem:[#allocation35_spill]] %s5057_s12 }
   0xd   :  { %5087 = sst [smem:[#allocation36_spill]] %s5058_s13 }
   0xe   :  { %5088 = sst [smem:[#allocation37_spill]] %s5059_s14 }
   0xf   :  { %5089 = sst [smem:[#allocation38_spill]] %s5060_s15 }
  0x10   :  { %5090 = sst [smem:[#allocation39_spill]] %s5061_s16 }
  0x11   :  { %5091 = sst [smem:[#allocation40_spill]] %s5062_s17 }
  0x12   :  { %5092 = sst [smem:[#allocation41_spill]] %s5063_s18 }
  0x13   :  { %5093 = sst [smem:[#allocation42_spill]] %s5064_s19 }
  0x14   :  { %5094 = sst [smem:[#allocation43_spill]] %s5065_s20 }
  0x15   :  { %5095 = sst [smem:[#allocation44_spill]] %s5066_s21 }
  0x16   :  { %5096 = sst [smem:[#allocation45_spill]] %s5067_s22 }
  0x17   :  { %27 = vsyncpa [#allocation3], 0 }
  0x18   :  { %29 = vsyncpa [#allocation3 + $0x1], 0 }
  0x19   :  { %30 = vsyncpa [#allocation5], 0 }
  0x1a   :  { %32 = vsyncpa [#allocation5 + $0x1], 0 }
  0x1b   :  { %33 = vsyncpa [#allocation8], 0 }
  0x1c   :  { %35 = vsyncpa [#allocation8 + $0x1], 0 }
  0x1d   :  { %36 = vsyncpa [#allocation11], 0 }
  0x1e   :  { %38 = vsyncpa [#allocation11 + $0x1], 0  ;;  %s4197_s3 = smov 0   ;;  %s4199_s28 = smov 0  }
  0x1f   :  { %s4201_s29 = smov 0   ;;  %s4203_s30 = smov 0  }
  0x20   :  { %s4205_s4 = smov 0   ;;  %s4207_s0 = smov 0  }
  0x21   :  { %s4209_s23 = smov 0   ;;  %s4211_s1 = smov 0  }
  0x22 LB: > { %5097 = sst [smem:[#allocation16_spill]] %s4044_s28  ;;  %s5070_s5 = sadd.s32 4294967295, %s4068_s1   ;;  %s4068_s1 = sphi %s4211_s1, %s44_s1   ;;  %s4064_s23 = sphi %s4209_s23, %s5168_s23   ;;  %s4060_s0 = sphi %s4207_s0, %s5167_s0   ;;  %s4056_s4 = sphi %s4205_s4, %s5166_s4   ;;  %s4052_s30 = sphi %s4203_s30, %s5165_s30   ;;  %s4048_s29 = sphi %s4201_s29, %s5164_s29   ;;  %s4044_s28 = sphi %s4199_s28, %s5163_s28   ;;  %s4040_s3 = sphi %s4197_s3, %s5162_s3  }
  0x23   : > { %5098 = sst [smem:[#allocation17_spill]] %s4048_s29  ;;  %s53_s24 = sadd.s32 1, %s4060_s0 }
  0x24   : > { %5099 = sst [smem:[#allocation18_spill]] %s4060_s0  ;;  %p54_p0 = scmp.ge.s32.totalorder %s53_s24, 2 }
  0x25   : > { %5100 = sst [smem:[#allocation19_spill]] %s4064_s23  ;;  %s56_s6 = sadd.s32 1, %s4064_s23 }
  0x26   : > { %5101 = sst [smem:[#allocation20_spill]] %s4068_s1  ;;  %s245_s25 = sadd.s32 1, %s4048_s29 }
  0x27   : > { %p252_p1 = scmp.ne.s32.totalorder %s4048_s29, %s4044_s28  ;;  %s5170_s24 = smov (%p54_p0, %s53_s24), 0 }
  0x28   : > { %5102 = sst [smem:[#allocation21_spill]] %s5170_s24  ;;  %s5172_s6 = smov (!%p54_p0, %s56_s6), %s4064_s23 }
  0x29   : > { %s242_s26 = ssub.s32 %s4060_s0, %s5170_s24  ;;  %p253_p2 = scmp.eq.s32.totalorder %s4068_s1, 0 }
  0x2a   : > { %p58_p3 = scmp.ge.s32.totalorder %s5172_s6, 2  ;;  %p243_p4 = scmp.eq.s32.totalorder %s242_s26, 0 }
  0x2b   : > { %p254_p5 = por %p253_p2, %p252_p1  ;;  %p258_p6 = scmp.ne.s32.totalorder %s4044_s28, %s4040_s3 }
  0x2c   : > { %s5174_s6 = smov (%p58_p3, %s5172_s6), 0  ;;  %p259_p7 = scmp.eq.s32.totalorder %s5070_s5, 0 }
  0x2d   : > { %5103 = sst [smem:[#allocation22_spill]] %s5174_s6  ;;  %p3685_p8 = scmp.lt.s32.totalorder %s4068_s1, 4 }
  0x2e   : > { %s4251_s2 = scalar_select %p243_p4, %s4048_s29, %s245_s25  }
  0x2f   : > { %s4257_s27 = sand.u32 1, %s4048_s29   ;;  %p4259_p9 = por %p259_p7, %p258_p6 }
  0x30   : > { %5104 = sst [smem:[#allocation23_spill]] %s4251_s2  ;;  %s4264_s24 = sshll.u32 %s4257_s27, 4 }
  0x31   : > { %s4267_s3 = sshll.u32 %s4060_s0, 4  ;;  %p4269_p10 = pnand %p3685_p8, %p254_p5 }
  0x32   : > { %s756_s26 = sand.u32 1, %s4068_s1   ;;  %s5107_s10 = sld [smem:[#allocation33_spill]] }
  0x33   : > { %s760_s29 = scalar_lea.vmem [#allocation4], %s4264_s24  ;;  %p3479_p11 = scmp.ge.s32.totalorder %s4068_s1, 1 }
  0x34   : > { %s768_s22 = sshll.u32 %s760_s29, 4  ;;  %s4280_s0 = scalar_lea.sflag [#allocation5], %s756_s26  ;;  %s769_s22 = int_to_ptr.vmem [resolvable:$true] %s768_s22 }
  0x35   : > { %s4070_s20 = smov 64   ;;  %s4071_s18 = smov 4  }
  0x36   : > { %p908_p12 = scmp.lt.s32.totalorder %s4068_s1, 5  ;;  %s5108_s12 = sld [smem:[#allocation35_spill]] }
  0x37   : > { %s804_s19 = scalar_lea.vmem [#allocation7], %s4264_s24  ;;  %s801_s15 = scalar_lea.sflag [#allocation8], %s756_s26 }
  0x38   : > { %s765_s2 = scalar_lea.hbm %s5107_s10, %s4267_s3  ;;  %p4293_p13 = pnand %p3479_p11, %p908_p12 }
  0x39   : > { %s766_s21 = sshll.u32 %s765_s2, 4  ;;  %s812_s17 = sshll.u32 %s804_s19, 4  ;;  %s767_s21 = int_to_ptr.hbm [resolvable:$true] %s766_s21  ;;  %s813_s17 = int_to_ptr.vmem [resolvable:$true] %s812_s17 }
  0x3a   : > { %3672 = dma.hbm_to_vmem [thread:$0]  (!%p4269_p10), %s767_s21, 256, %s769_s22, %s4280_s0, %s4070_s20, %s4070_s20, %s4071_s18  }
  0x3b   : > { %s5110_s7 = sld [smem:[#allocation31_spill]]  ;;  %s723_s19 = scalar_lea.sflag [#allocation3], %s4257_s27 }
  0x3c   : > { %s809_s6 = scalar_lea.hbm %s5108_s12, %s4267_s3  ;;  %s5111_s11 = sld [smem:[#allocation34_spill]] }
  0x3d   : > { %s810_s10 = sshll.u32 %s809_s6, 4  ;;  %s726_s6 = scalar_lea.vmem [#allocation2], %s4264_s24  ;;  %s811_s10 = int_to_ptr.hbm [resolvable:$true] %s810_s10 }
  0x3e   : > { %3678 = dma.hbm_to_vmem [thread:$0]  (!%p4269_p10), %s811_s10, 256, %s813_s17, %s801_s15, %s4070_s20, %s4070_s20, %s4071_s18  }
  0x3f   : > { %s734_s12 = sshll.u32 %s726_s6, 4  ;;  %s782_s22 = scalar_lea.vmem [#allocation6], %s4264_s24  ;;  %s735_s12 = int_to_ptr.vmem [resolvable:$true] %s734_s12 }
  0x40   : > { %s5112_s13 = sld [smem:[#allocation36_spill]] }
  0x41   : > { %s731_s5 = scalar_lea.hbm %s5110_s7, %s4267_s3  ;;  %s5113_s16 = sld [smem:[#allocation39_spill]] }
  0x42   : > { %s732_s29 = sshll.u32 %s731_s5, 4  ;;  %s787_s26 = scalar_lea.hbm %s5111_s11, %s4267_s3  ;;  %s733_s29 = int_to_ptr.hbm [resolvable:$true] %s732_s29 }
  0x43   : > { %3669 = dma.hbm_to_vmem [thread:$0]  (!%p4269_p10), %s733_s29, 256, %s735_s12, %s723_s19, %s4070_s20, %s4070_s20, %s4071_s18  }
  0x44   : > { %s788_s21 = sshll.u32 %s787_s26, 4  ;;  %s790_s5 = sshll.u32 %s782_s22, 4  ;;  %s789_s21 = int_to_ptr.hbm [resolvable:$true] %s788_s21  ;;  %s791_s5 = int_to_ptr.vmem [resolvable:$true] %s790_s5 }
  0x45   : > { %3675 = dma.hbm_to_vmem [thread:$0]  (!%p4269_p10), %s789_s21, 256, %s791_s5, %s4280_s0, %s4070_s20, %s4070_s20, %s4071_s18  }
  0x46   : > { %s831_s12 = scalar_lea.hbm %s5112_s13, %s4267_s3  ;;  %s826_s19 = scalar_lea.vmem [#allocation9], %s4264_s24 }
  0x47   : > { %s832_s29 = sshll.u32 %s831_s12, 4  ;;  %s834_s10 = sshll.u32 %s826_s19, 4  ;;  %s833_s29 = int_to_ptr.hbm [resolvable:$true] %s832_s29  ;;  %s835_s10 = int_to_ptr.vmem [resolvable:$true] %s834_s10 }
  0x48   : > { %3681 = dma.hbm_to_vmem [thread:$0]  (!%p4269_p10), %s833_s29, 256, %s835_s10, %s801_s15, %s4070_s20, %s4070_s20, %s4071_s18  }
  0x49   : > { %s865_s22 = scalar_lea.hbm %s5113_s16, %s4267_s3  ;;  %s860_s11 = scalar_lea.vmem [#allocation10], %s4264_s24 }
  0x4a   : > { %s868_s0 = sshll.u32 %s860_s11, 4  ;;  %s866_s21 = sshll.u32 %s865_s22, 4  ;;  %s869_s0 = int_to_ptr.vmem [resolvable:$true] %s868_s0  ;;  %s867_s21 = int_to_ptr.hbm [resolvable:$true] %s866_s21 }
  0x4b   : > { %s857_s7 = scalar_lea.sflag [#allocation11], %s4257_s27  ;;  %912 = sbr.rel (%p4293_p13) target bundleno = 3348 (0xd14), region = 108 }
  0x4c   : > { %3684 = dma.hbm_to_vmem [thread:$0]  (!%p4269_p10), %s867_s21, 256, %s869_s0, %s857_s7, %s4070_s20, %s4070_s20, %s4071_s18  }
  0x4d   : > { %s914_s15 = sand.u32 (!%p4293_p13), 1, %s4044_s28  }
  0x4e   : > { %s4349_s5 = sshll.u32 (!%p4293_p13), %s914_s15, 4  ;;  %s915_s24 = scalar_lea.sflag (!%p4293_p13), [#allocation3], %s914_s15 }
  0x50   : > { %4023 = dma.done.wait (%p4259_p9), %s915_s24, 256  }
  0x51   : > { %4025 = vsyncadd (%p4259_p9), %s915_s24, 4294967040  ;;  %s5114_s27 = sadd.s32 4294967295, %s4068_s1  }
  0x52   : > { %s924_s18 = sand.u32 1, %s5114_s27  }
  0x53   : > { %s925_s20 = scalar_lea.sflag [#allocation5], %s924_s18 }
  0x54   : > { %4027 = dma.done.wait (%p4259_p9), %s925_s20, 512  }
  0x55   : > { %4029 = vsyncadd (%p4259_p9), %s925_s20, 4294966784  ;;  %s945_s2 = scalar_lea.sflag [#allocation8], %s924_s18 }
  0x56   : > { %4031 = dma.done.wait (%p4259_p9), %s945_s2, 512  }
  0x57   : > { %4033 = vsyncadd (%p4259_p9), %s945_s2, 4294966784  ;;  %s965_s29 = scalar_lea.sflag [#allocation11], %s914_s15 }
  0x58   : > { %4035 = dma.done.wait (%p4259_p9), %s965_s29, 256  }
  0x59   : > { %4037 = vsyncadd (%p4259_p9), %s965_s29, 4294967040  ;;  %p1112_p0 = scmp.lt.s32.totalorder %s4056_s4, 1  ;;  %p1126_p1 = scmp.lt.s32.totalorder %s4052_s30, 1 }
  0x5a   : > { %s5116_s15 = sld [smem:[#allocation24_spill]]  ;;  %p3497_p2 = scmp.ne.s32.totalorder %s4052_s30, 0 }
  0x5b   : > { %s5176_s4 = smov (!%p1112_p0, %s4056_s4), 1  ;;  %s5119_s25 = sld [smem:[#allocation28_spill]] }
  0x5c   : > { %s4381_s10 = scalar_select %p1126_p1, %s4052_s30, 1 }
  0x5d   : > { %s4384_s23 = sshll.u32 %s5176_s4, 2  ;;  %s5120_s21 = sld [smem:[#allocation29_spill]] }
  0x5e   : > { %s3628_s3 = sshll.u32 %s4381_s10, 4  ;;  %s5121_s16 = sld [smem:[#allocation30_spill]] }
  0x5f   : > { %s5126_s20 = sld [smem:[#allocation42_spill]] }
  0x60   : > { %s1115_s24 = scalar_lea.vmem %s5116_s15, %s4384_s23  ;;  %s3631_s15 = sshll.u32 %s4381_s10, 5 }
  0x61   : > { %s1130_s22 = scalar_lea.vmem %s5119_s25, %s3628_s3  ;;  %s5127_s12 = sld [smem:[#allocation41_spill]] }
  0x62   : > { %s5128_s25 = sld [smem:[#allocation43_spill]] }
  0x63   : > { %s1135_s7 = scalar_lea.vmem %s5120_s21, %s3628_s3  ;;  %s5129_s0 = sld [smem:[#allocation44_spill]] }
  0x64   : > { %s4412_s27 = scalar_lea.vmem %s5121_s16, %s3628_s3  ;;  %s5130_s16 = sld [smem:[#allocation45_spill]] }
  0x65   : > { %s1163_s19 = scalar_lea.vmem %s5126_s20, %s4381_s10 }
  0x66   : > { %1178 = sbr.rel (%p3497_p2) target bundleno = 109 (0x6d), region = 136 }
  0x67   : > { %s4442_s6 = scalar_lea.vmem %s5127_s12, %s3631_s15 }
  0x68   : > { %s1166_s14 = scalar_lea.vmem %s5128_s25, %s4381_s10 }
  0x69   : > { %s1169_s21 = scalar_lea.vmem %s5129_s0, %s4381_s10 }
  0x6a   : > { %s4456_s3 = scalar_lea.vmem %s5130_s16, %s4384_s23 }
  0x6b   : > { %v1179_v0 = vld [vmem:[%s1115_s24] sm:$0xf]  ;;  %vm1180_vm0 = vcmask 257024  }
  0x6c   : > { %1181 = vst.msk [vmem:[%s4456_s3] sm:$0xf] %vm1180_vm0, %v1179_v0 }
  0x6d PF: > { %v3633_v1 = vld [vmem:[%s1130_s22 + $0x8] sm:$0xff]  ;;  %v3632_v3 = vld [vmem:[%s1130_s22] sm:$0xff]  ;;  %vm1229_vm1 = vcmask 261120   ;;  %s4072_s8 = smov 112   ;;  %s4073_s30 = smov 104   ;;  %vm1308_vm2 = vcmask 1047556  }
  0x6e   : > { %v3635_v2 = vld [vmem:[%s1135_s7 + $0x8] sm:$0xff]  ;;  %v3634_v4 = vld [vmem:[%s1135_s7] sm:$0xff]  ;;  %1239 = vmatpush.bf16.msra.mxu0 %v3633_v1  ;;  %s4074_s1 = smov 120   ;;  %v4075_v13 = vmov 1983009808   ;;  %vm1658_vm3 = vcmask 64512  }
  0x6f   : > { %1265 = vmatpush.bf16.msra.mxu1 %v3635_v2  ;;  %v1313_v14 = vunpack.c.l.s4 %v4075_v13  ;;  %v4076_v20 = vmov 1934713408   ;;  %s5131_s7 = sld [smem:[#allocation26_spill]]  ;;  %s4078_s25 = smov 16   ;;  %vm2022_vm6 = vcmask 130048   ;;  %vm2024_vm7 = vcmask 195584  }
  0x70   : > { %v1337_v21 = vunpack.c.l.s4 %v4076_v20  ;;  %s4079_s15 = smov 24   ;;  %s4080_s18 = smov 8   ;;  %vm3057_vm0 = vcmask 523264  }
  0x71   : > { %v4473_v17 = vunpack.c.0.s8 %v1313_v14  ;;  %s5133_s20 = scalar_lea.vmem [#allocation2], %s4349_s5  ;;  %s5135_s12 = scalar_lea.vmem [#allocation6], %s4349_s5 }
  0x72   : > { %1240 = vmatpush.bf16.msra.mxu0 %v3632_v3  ;;  %v4479_v29 = vunpack.c.0.s8 %v1337_v21  ;;  %s5134_s29 = smov %s5133_s20  ;;  %s5136_s2 = smov %s5135_s12 }
  0x73   : > { %1266 = vmatpush.bf16.msra.mxu1 %v3634_v4  ;;  %v4461_v5 = vld [vmem:[%s4456_s3] sm:$0xf]  ;;  %s5137_s11 = sld [smem:[#allocation25_spill]] }
  0x74   : > { %s5141_s24 = sld [smem:[#allocation32_spill]] }
  0x75   : > { %3506 = vmatmul.msk.bf16.vlgmr.msra.gmra.mxu0 %vm1229_vm1, %v4461_v5  ;;  %s5152_s26 = sld [smem:[#allocation37_spill]] }
  0x76   : > { %3515 = vmatmul.msk.bf16.vlgmr.msra.gmra.mxu1 %vm1229_vm1, %v4461_v5 }
  0x79   : > { %s5138_s0 = scalar_lea.vmem %s5137_s11, %s4384_s23  ;;  %s5139_s23 = scalar_lea.vmem [#allocation4], %s4349_s5 }
  0x7a   : > { %s5140_s28 = smov %s5139_s23  ;;  %s5142_s22 = scalar_lea.vmem %s5141_s24, %s4381_s10 }
  0x7b   : > { %s5153_s11 = scalar_lea.vmem %s5152_s26, %s4381_s10 }
  0xf2   : > { %v1242_v6 = vpop.f32.mrf.mxu0 }
  0xf3   : > { %v1268_v7 = vpop.f32.mrf.mxu1  ;;  %v1246_v8 = vmul.f32 0.35355338, %v1242_v6 }
  0xf4   : > { %1422 = vrot.lane.b32.xlu0 %v1268_v7, %s4072_s8  ;;  %v1430_v28 = vrot.slane %v1268_v7, 4 }
  0xf5   : > { %1304 = vrot.lane.b32.xlu2 %v1246_v8, %s4073_s30  ;;  %1301 = vrot.lane.b32.xlu1 %v1246_v8, %s4072_s8  ;;  %v1310_v25 = vrot.slane %v1246_v8, 4 }
  0xfa   : > { %v1244_v9 = vpop.f32.mrf.mxu0 }
  0xfb   : > { %v1270_v10 = vpop.f32.mrf.mxu1  ;;  %v3637_v9 = vld [vmem:[%s4412_s27 + $0x8] sm:$0xff] }
  0xfc   : > { %1425 = vrot.lane.b32.xlu0 %v1268_v7, %s4073_s30  ;;  %1290 = vmatpush.bf16.msra.mxu2 %v3637_v9 }
  0xfd   : > { %1298 = vrot.lane.b32.xlu2 %v1246_v8, %s4074_s1  ;;  %1419 = vrot.lane.b32.xlu1 %v1268_v7, %s4074_s1 }
 0x14f   : > { %v1305_v11 = vpop.permute.xlu2 %1304 }
 0x150   : > { %v1320_v16 = vrot.slane %v1305_v11, 4 }
 0x157   : > { %v1299_v12 = vpop.permute.xlu2 %1298 }
 0x158   : > { %v1322_v15 = vrot.slane %v1299_v12, 4  ;;  %v1321_v19 = vsel %vm1308_vm2, %v1320_v16, %v1299_v12 }
 0x159   : > { %v1327_v24 = vperm.slane %v1321_v19, %v4473_v17  ;;  %v3636_v19 = vld [vmem:[%s4412_s27] sm:$0xff]  ;;  %s5132_s27 = scalar_lea.vmem %s5131_s7, %s5176_s4 }
 0x15a   : > { %v1323_v18 = vsel %vm1308_vm2, %v1305_v11, %v1322_v15  ;;  %1291 = vmatpush.bf16.msra.mxu2 %v3636_v19 }
 0x15b   : > { %v1331_v22 = vperm.slane %v1323_v18, %v4473_v17  ;;  %v1332_v34 = vrot.slane %v1327_v24, 4 }
 0x15d   : > { %v1344_v32 = vrot.slane %v1331_v22, 4  ;;  %3524 = vmatmul.msk.bf16.vlgmr.msra.gmra.mxu2 %vm1229_vm1, %v4461_v5 }
 0x166   : > { %v1423_v23 = vpop.permute.xlu0 %1422 }
 0x167   : > { %v1428_v26 = vrot.slane %v1423_v23, 4  ;;  %v1302_v27 = vpop.permute.xlu1 %1301  ;;  %v1431_v35 = vsel %vm1308_vm2, %v1423_v23, %v1430_v28 }
 0x168   : > { %v1307_v30 = vrot.slane %v1302_v27, 4  ;;  %v1311_v31 = vsel %vm1308_vm2, %v1302_v27, %v1310_v25  ;;  %v1439_v42 = vperm.slane %v1431_v35, %v4473_v17 }
 0x169   : > { %v1319_v33 = vperm.slane %v1311_v31, %v4473_v17  ;;  %v1429_v37 = vsel %vm1308_vm2, %v1428_v26, %v1268_v7 }
 0x16a   : > { %v1309_v36 = vsel %vm1308_vm2, %v1307_v30, %v1246_v8  ;;  %v1435_v47 = vperm.slane %v1429_v37, %v4473_v17  ;;  %v1466_v57 = vrot.slane %v1439_v42, 4 }
 0x16b   : > { %v1315_v38 = vperm.slane %v1309_v36, %v4473_v17  ;;  %v1345_v39 = vsel %vm1308_vm2, %v1344_v32, %v1319_v33  ;;  %v1346_v40 = vrot.slane %v1319_v33, 4 }
 0x16c   : > { %v1351_v41 = vperm.slane %v1345_v39, %v4479_v29  ;;  %v1454_v60 = vrot.slane %v1435_v47, 4 }
 0x16d   : > { %v1333_v43 = vsel %vm1308_vm2, %v1332_v34, %v1315_v38  ;;  %v1334_v44 = vrot.slane %v1315_v38, 4  ;;  %v1347_v45 = vsel %vm1308_vm2, %v1331_v22, %v1346_v40 }
 0x16e   : > { %v1426_v46 = vpop.permute.xlu0 %1425  ;;  %v1339_v48 = vperm.slane %v1333_v43, %v4479_v29  ;;  %v1355_v49 = vperm.slane %v1347_v45, %v4479_v29  ;;  %v1360_v52 = vrot.slane %v1351_v41, 4 }
 0x16f   : > { %v1440_v50 = vrot.slane %v1426_v46, 4  ;;  %v1335_v51 = vsel %vm1308_vm2, %v1327_v24, %v1334_v44  ;;  %v1420_v53 = vpop.permute.xlu1 %1419 }
 0x170   : > { %v1343_v54 = vperm.slane %v1335_v51, %v4479_v29  ;;  %v1356_v55 = vrot.slane %v1339_v48, 4  ;;  %v1362_v56 = vrot.slane %v1355_v49, 4  ;;  %v1442_v59 = vrot.slane %v1420_v53, 4 }
 0x171   : > { %v1441_v58 = vsel %vm1308_vm2, %v1440_v50, %v1420_v53  ;;  %v1361_v1 = vsel %vm1308_vm2, 0.0, %v1360_v52 }
 0x172   : > { %v1358_v61 = vrot.slane %v1343_v54, 4  ;;  %v1363_v62 = vsel %vm1308_vm2, 0.0, %v1362_v56  ;;  %v1447_v63 = vperm.slane %v1441_v58, %v4473_v17  ;;  %v1357_v0 = vsel %vm1308_vm2, 0.0, %v1356_v55 }
 0x173   : > { %v1380_v2 = vrot.slane %v1363_v62, 4  ;;  %v1443_v3 = vsel %vm1308_vm2, %v1426_v46, %v1442_v59  ;;  %v1375_v18 = vsel %vm1308_vm2, %v1362_v56, %v1351_v41 }
 0x174   : > { %v1359_v4 = vsel %vm1308_vm2, 0.0, %v1358_v61  ;;  %v1451_v6 = vperm.slane %v1443_v3, %v4473_v17  ;;  %v1452_v7 = vrot.slane %v1447_v63, 4  ;;  %v1455_v8 = vsel %vm1308_vm2, %v1447_v63, %v1454_v60 }
 0x175   : > { %v1369_v10 = vrot.slane %v1359_v4, 4  ;;  %v1381_v11 = vsel %vm1308_vm2, %v1380_v2, %v1361_v1  ;;  %v1463_v12 = vperm.slane %v1455_v8, %v4479_v29  ;;  %v1364_v13 = vsel %vm1308_vm2, %v1358_v61, %v1339_v48 }
 0x176   : > { %v1453_v14 = vsel %vm1308_vm2, %v1452_v7, %v1435_v47  ;;  %v1464_v15 = vrot.slane %v1451_v6, 4  ;;  %v1467_v16 = vsel %vm1308_vm2, %v1451_v6, %v1466_v57  ;;  %v1368_v25 = vperm.slane %v1364_v13, %v4473_v17 }
 0x177   : > { %v1459_v20 = vperm.slane %v1453_v14, %v4479_v29  ;;  %v1475_v21 = vperm.slane %v1467_v16, %v4479_v29  ;;  %v1478_v22 = vrot.slane %v1463_v12, 4  ;;  %v1370_v23 = vsel %vm1308_vm2, %v1369_v10, %v1357_v0 }
 0x178   : > { %v1465_v24 = vsel %vm1308_vm2, %v1464_v15, %v1439_v42  ;;  %v1374_v26 = vperm.slane %v1370_v23, %v4473_v17  ;;  %v1385_v27 = vperm.slane %v1381_v11, %v4473_v17  ;;  %v1379_v50 = vperm.slane %v1375_v18, %v4473_v17 }
 0x179   : > { %v1471_v28 = vperm.slane %v1465_v24, %v4479_v29  ;;  %v1476_v30 = vrot.slane %v1459_v20, 4  ;;  %v1479_v31 = vsel %vm1308_vm2, 0.0, %v1478_v22  ;;  %v1482_v32 = vrot.slane %v1475_v21, 4 }
 0x17a   : > { %v1484_v33 = vsel %vm1308_vm2, %v1478_v22, %v1459_v20  ;;  %v1489_v34 = vrot.slane %v1479_v31, 4  ;;  %v1386_v35 = vrot.slane %v1374_v26, 4  ;;  %v1398_v36 = vrot.slane %v1385_v27, 4 }
 0x17b   : > { %v1477_v37 = vsel %vm1308_vm2, 0.0, %v1476_v30  ;;  %v1480_v38 = vrot.slane %v1471_v28, 4  ;;  %v1483_v39 = vsel %vm1308_vm2, 0.0, %v1482_v32  ;;  %v1488_v40 = vperm.slane %v1484_v33, %v4473_v17 }
 0x17c   : > { %v1500_v41 = vrot.slane %v1483_v39, 4  ;;  %v1490_v42 = vsel %vm1308_vm2, %v1489_v34, %v1477_v37  ;;  %v1495_v43 = vsel %vm1308_vm2, %v1482_v32, %v1471_v28  ;;  %v1387_v44 = vsel %vm1308_vm2, %v1386_v35, %v1368_v25 }
 0x17d   : > { %v1481_v45 = vsel %vm1308_vm2, 0.0, %v1480_v38  ;;  %v1494_v46 = vperm.slane %v1490_v42, %v4473_v17  ;;  %v1499_v47 = vperm.slane %v1495_v43, %v4473_v17  ;;  %v1508_v48 = vrot.slane %v1488_v40, 4 }
 0x17e   : > { %v1501_v49 = vsel %vm1308_vm2, %v1500_v41, %v1481_v45  ;;  %v1393_v55 = vperm.slane %v1387_v44, %v4479_v29  ;;  %v1399_v56 = vsel %vm1308_vm2, %v1398_v36, %v1379_v50  ;;  %v1400_v63 = vrot.slane %v1379_v50, 4 }
 0x17f   : > { %v1505_v51 = vperm.slane %v1501_v49, %v4473_v17  ;;  %v1506_v52 = vrot.slane %v1494_v46, 4  ;;  %v1520_v53 = vrot.slane %v1499_v47, 4  ;;  %v1509_v54 = vsel %vm1308_vm2, %v1494_v46, %v1508_v48 }
 0x180   : > { %v1517_v59 = vperm.slane %v1509_v54, %v4479_v29  ;;  %v1405_v1 = vperm.slane %v1399_v56, %v4479_v29  ;;  %v1388_v6 = vrot.slane %v1368_v25, 4  ;;  %v1412_v8 = vrot.slane %v1393_v55, 4 }
 0x181   : > { %v1507_v57 = vsel %vm1308_vm2, %v1506_v52, %v1488_v40  ;;  %v1518_v58 = vrot.slane %v1505_v51, 4  ;;  %v1521_v60 = vsel %vm1308_vm2, %v1505_v51, %v1520_v53  ;;  %v1401_v12 = vsel %vm1308_vm2, %v1385_v27, %v1400_v63  ;;  %v1191_v27 = vld [vmem:[%s5132_s27] sm:$0x1] }
 0x182   : > { %v1513_v61 = vperm.slane %v1507_v57, %v4479_v29  ;;  %v1529_v62 = vperm.slane %v1521_v60, %v4479_v29  ;;  %v1536_v7 = vrot.slane %v1517_v59, 4  ;;  %v1410_v13 = vrot.slane %v1405_v1, 4 }
 0x183   : > { %v1519_v0 = vsel %vm1308_vm2, %v1518_v58, %v1499_v47  ;;  %v1389_v15 = vsel %vm1308_vm2, %v1374_v26, %v1388_v6  ;;  %v1413_v16 = vsel %vm1308_vm2, %v1405_v1, %v1412_v8  ;;  %v1409_v19 = vperm.slane %v1401_v12, %v4479_v29 }
 0x184   : > { %v1525_v2 = vperm.slane %v1519_v0, %v4479_v29  ;;  %v1532_v3 = vrot.slane %v1513_v61, 4  ;;  %v1534_v4 = vrot.slane %v1529_v62, 4  ;;  %v1537_v18 = vsel %vm1308_vm2, %v1529_v62, %v1536_v7 }
 0x185   : > { %v1411_v20 = vsel %vm1308_vm2, %v1410_v13, %v1393_v55  ;;  %v1397_v21 = vperm.slane %v1389_v15, %v4479_v29  ;;  %v1414_v22 = vrot.slane %v1409_v19, 4  ;;  %v1185_v26 = vlaneseq }
 0x186   : > { %v1533_v9 = vsel %vm1308_vm2, %v1525_v2, %v1532_v3  ;;  %v1535_v10 = vsel %vm1308_vm2, %v1534_v4, %v1517_v59  ;;  %v1530_v11 = vrot.slane %v1525_v2, 4  ;;  %vm1192_vm4 = vcmp.ne.s32.totalorder %v1191_v27, 0 }
 0x187   : > { %3527 = vmatpush.xpose.msk.msra.mxu3 %vm1658_vm3, %v1533_v9  ;;  %v1416_v23 = vrot.slane %v1397_v21, 4  ;;  %v1415_v24 = vsel %vm1308_vm2, %v1414_v22, %v1397_v21  ;;  %v1186_v28 = vshrl.u32 %v1185_v26, 7  ;;  %v1188_v30 = vand.u32 127, %v1185_v26 }
 0x188   : > { %v1531_v14 = vsel %vm1308_vm2, %v1530_v11, %v1513_v61  ;;  %v4077_v31 = vmov -1e+09  }
 0x189   : > { %3525 = vmatpush.xpose.msk.msrb.mxu0 %vm1658_vm3, %v1531_v14  ;;  %v1417_v25 = vsel %vm1308_vm2, %v1409_v19, %v1416_v23  ;;  %v1193_v32 = vsel %vm1192_vm4, 0.0, %v4077_v31  ;;  %vm1189_vm5 = vcmp.ge.s32.totalorder %v1186_v28, %v1188_v30  ;;  %vm3108_vm4 = vcmask 257024  }
 0x18a   : > { %3528 = vmatmul.msk.f32.vlgmr.msra.gmra.mxu3 %vm1658_vm3, %v1413_v16  ;;  %v1195_v34 = vperm.slane %v1193_v32, 0  ;;  %v1190_v35 = vsel %vm1189_vm5, 0.0, %v4077_v31 }
 0x18b   : > { %3529 = vmatpush.xpose.msk.msrb.mxu3 %vm1658_vm3, %v1535_v10 }
 0x18c   : > { %3526 = vmatmul.msk.f32.vlgmr.msrb.gmra.mxu0 %vm1658_vm3, %v1411_v20  ;;  %v1197_v36 = vadd.f32 %v1195_v34, %v1190_v35 }
 0x18d   : > { %3531 = vmatpush.xpose.msk.msra.mxu0 %vm1658_vm3, %v1537_v18 }
 0x192   : > { %3530 = vmatmul.msk.f32.vlgmr.msrb.gmra.mxu3 %vm1658_vm3, %v1415_v24 }
 0x194   : > { %3532 = vmatmul.msk.f32.vlgmr.msra.gmra.mxu0 %vm1658_vm3, %v1417_v25 }
 0x1e0   : > { %v1293_v33 = vpop.f32.mrf.mxu2 }
 0x1e1   : > { %v1550_v6 = vrot.slane %v1293_v33, 4 }
 0x1e8   : > { %v1295_v37 = vpop.f32.mrf.mxu2 }
 0x209   : > { %v1682_v38 = vpop.f32.mrf.mxu0 }
 0x20a   : > { %v1683_v39 = vadd.f32 %v1682_v38, %v1197_v36 }
 0x20c   : > { %v1763_v40 = vsel %vm1658_vm3, %v1683_v39, -inf }
 0x20d   : > { %v1708_v41 = vpop.f32.mrf.mxu3  ;;  %1764 = vmax.xlane.f32.xlu2 %v1763_v40 }
 0x20e   : > { %v1709_v42 = vadd.f32 %v1708_v41, %v1197_v36 }
 0x210   : > { %v1766_v43 = vsel %vm1658_vm3, %v1709_v42, -inf }
 0x211   : > { %1767 = vmax.xlane.f32.xlu1 %v1766_v43  ;;  %v1760_v44 = vpop.f32.mrf.mxu0 }
 0x212   : > { %v1761_v45 = vadd.f32 %v1760_v44, %v1197_v36 }
 0x214   : > { %v1772_v46 = vsel %vm1658_vm3, %v1761_v45, -inf }
 0x215   : > { %v1734_v47 = vpop.f32.mrf.mxu3  ;;  %1773 = vmax.xlane.f32.xlu2 %v1772_v46 }
 0x216   : > { %v1735_v48 = vadd.f32 %v1734_v47, %v1197_v36 }
 0x218   : > { %v1769_v49 = vsel %vm1658_vm3, %v1735_v48, -inf }
 0x219   : > { %1770 = vmax.xlane.f32.xlu0 %v1769_v49 }
 0x22a   : > { %1542 = vrot.lane.b32.xlu1 %v1293_v33, %s4072_s8 }
 0x22d   : > { %1539 = vrot.lane.b32.xlu0 %v1293_v33, %s4074_s1  ;;  %1545 = vrot.lane.b32.xlu2 %v1293_v33, %s4073_s30 }
 0x280   : > { %v1765_v50 = vpop.xlane.xlu2 %1764 }
 0x281   : > { %v1775_v51 = vsub.f32 %v1683_v39, %v1765_v50 }
 0x283   : > { %v1779_v52 = vmul.f32 1.442695, %v1775_v51 }
 0x284   : > { %v1768_v53 = vpop.xlane.xlu1 %1767 }
 0x285   : > { %3770 = vpow2.f32 %v1779_v52  ;;  %v1776_v54 = vsub.f32 %v1709_v42, %v1768_v53 }
 0x287   : > { %v1781_v55 = vmul.f32 1.442695, %v1776_v54 }
 0x288   : > { %v1774_v57 = vpop.xlane.xlu2 %1773 }
 0x289   : > { %3772 = vpow2.f32 %v1781_v55  ;;  %v1778_v62 = vsub.f32 %v1761_v45, %v1774_v57 }
 0x28b   : > { %v4583_v56 = vpop.eup %3770  ;;  %v1785_v1 = vmul.f32 1.442695, %v1778_v62 }
 0x28c   : > { %v1771_v58 = vpop.xlane.xlu0 %1770  ;;  %v1787_v59 = vsel %vm1658_vm3, %v4583_v56, 0.0 }
 0x28d   : > { %v1777_v60 = vsub.f32 %v1735_v48, %v1771_v58  ;;  %1788 = vadd.xlane.f32.xlu2 %v1787_v59 }
 0x28f   : > { %v4587_v61 = vpop.eup %3772  ;;  %v1783_v63 = vmul.f32 1.442695, %v1777_v60 }
 0x290   : > { %v1790_v0 = vsel %vm1658_vm3, %v4587_v61, 0.0  ;;  %v1546_v4 = vpop.permute.xlu2 %1545 }
 0x291   : > { %3774 = vpow2.f32 %v1783_v63  ;;  %1791 = vadd.xlane.f32.xlu1 %v1790_v0  ;;  %v1560_v8 = vrot.slane %v1546_v4, 4 }
 0x292   : > { %3776 = vpow2.f32 %v1785_v1 }
 0x297   : > { %v4591_v2 = vpop.eup %3774 }
 0x298   : > { %v1793_v3 = vsel %vm1658_vm3, %v4591_v2, 0.0  ;;  %v4595_v9 = vpop.eup %3776 }
 0x299   : > { %1794 = vadd.xlane.f32.xlu0 %v1793_v3  ;;  %v1796_v19 = vsel %vm1658_vm3, %v4595_v9, 0.0 }
 0x29c   : > { %v1543_v7 = vpop.permute.xlu1 %1542 }
 0x29d   : > { %v1548_v10 = vrot.slane %v1543_v7, 4  ;;  %v1551_v11 = vsel %vm1308_vm2, %v1543_v7, %v1550_v6 }
 0x29e   : > { %v1559_v13 = vperm.slane %v1551_v11, %v4473_v17 }
 0x29f   : > { %v1549_v12 = vsel %vm1308_vm2, %v1548_v10, %v1293_v33  ;;  %v1540_v14 = vpop.permute.xlu0 %1539 }
 0x2a0   : > { %v1555_v15 = vperm.slane %v1549_v12, %v4473_v17  ;;  %v1561_v16 = vsel %vm1308_vm2, %v1560_v8, %v1540_v14  ;;  %v1562_v18 = vrot.slane %v1540_v14, 4  ;;  %v1586_v23 = vrot.slane %v1559_v13, 4 }
 0x2a1   : > { %v1567_v20 = vperm.slane %v1561_v16, %v4473_v17  ;;  %1797 = vadd.xlane.f32.xlu0 %v1796_v19 }
 0x2a2   : > { %v1574_v21 = vrot.slane %v1555_v15, 4  ;;  %v1563_v22 = vsel %vm1308_vm2, %v1546_v4, %v1562_v18 }
 0x2a3   : > { %v1571_v24 = vperm.slane %v1563_v22, %v4473_v17  ;;  %v1572_v25 = vrot.slane %v1567_v20, 4 }
 0x2a4   : > { %v1575_v26 = vsel %vm1308_vm2, %v1567_v20, %v1574_v21 }
 0x2a5   : > { %v1573_v27 = vsel %vm1308_vm2, %v1572_v25, %v1555_v15  ;;  %v1583_v28 = vperm.slane %v1575_v26, %v4479_v29  ;;  %v1584_v30 = vrot.slane %v1571_v24, 4  ;;  %v1587_v32 = vsel %vm1308_vm2, %v1571_v24, %v1586_v23 }
 0x2a6   : > { %v1579_v33 = vperm.slane %v1573_v27, %v4479_v29  ;;  %v1595_v34 = vperm.slane %v1587_v32, %v4479_v29 }
 0x2a7   : > { %v1585_v35 = vsel %vm1308_vm2, %v1584_v30, %v1559_v13  ;;  %v1598_v36 = vrot.slane %v1583_v28, 4 }
 0x2a8   : > { %v1591_v37 = vperm.slane %v1585_v35, %v4479_v29  ;;  %v1596_v38 = vrot.slane %v1579_v33, 4  ;;  %v1602_v39 = vrot.slane %v1595_v34, 4 }
 0x2a9   : > { %v1599_v40 = vsel %vm1308_vm2, 0.0, %v1598_v36  ;;  %v1604_v41 = vsel %vm1308_vm2, %v1598_v36, %v1579_v33 }
 0x2aa   : > { %v1597_v42 = vsel %vm1308_vm2, 0.0, %v1596_v38  ;;  %v1600_v43 = vrot.slane %v1591_v37, 4  ;;  %v1603_v44 = vsel %vm1308_vm2, 0.0, %v1602_v39  ;;  %v1608_v45 = vperm.slane %v1604_v41, %v4473_v17 }
 0x2ab   : > { %v1609_v46 = vrot.slane %v1599_v40, 4  ;;  %v1620_v47 = vrot.slane %v1603_v44, 4  ;;  %v1615_v48 = vsel %vm1308_vm2, %v1602_v39, %v1591_v37 }
 0x2ac   : > { %v1601_v49 = vsel %vm1308_vm2, 0.0, %v1600_v43  ;;  %v1619_v50 = vperm.slane %v1615_v48, %v4473_v17  ;;  %v1628_v51 = vrot.slane %v1608_v45, 4 }
 0x2ad   : > { %v1610_v52 = vsel %vm1308_vm2, %v1609_v46, %v1597_v42  ;;  %v1621_v53 = vsel %vm1308_vm2, %v1620_v47, %v1601_v49 }
 0x2ae   : > { %v1614_v54 = vperm.slane %v1610_v52, %v4473_v17  ;;  %v1625_v55 = vperm.slane %v1621_v53, %v4473_v17  ;;  %v1640_v57 = vrot.slane %v1619_v50, 4 }
 0x2b0   : > { %v1629_v58 = vsel %vm1308_vm2, %v1614_v54, %v1628_v51  ;;  %v1641_v59 = vsel %vm1308_vm2, %v1625_v55, %v1640_v57  ;;  %v1626_v60 = vrot.slane %v1614_v54, 4  ;;  %v1638_v62 = vrot.slane %v1625_v55, 4 }
 0x2b1   : > { %v1637_v63 = vperm.slane %v1629_v58, %v4479_v29  ;;  %v1649_v0 = vperm.slane %v1641_v59, %v4479_v29 }
 0x2b2   : > { %v1627_v1 = vsel %vm1308_vm2, %v1626_v60, %v1608_v45  ;;  %v1639_v3 = vsel %vm1308_vm2, %v1638_v62, %v1619_v50 }
 0x2b3   : > { %v1656_v4 = vrot.slane %v1637_v63, 4  ;;  %v1654_v6 = vrot.slane %v1649_v0, 4  ;;  %v1633_v7 = vperm.slane %v1627_v1, %v4479_v29  ;;  %v1645_v8 = vperm.slane %v1639_v3, %v4479_v29 }
 0x2b5   : > { %v1657_v10 = vsel %vm1308_vm2, %v1649_v0, %v1656_v4  ;;  %v1655_v11 = vsel %vm1308_vm2, %v1654_v6, %v1637_v63  ;;  %v1652_v12 = vrot.slane %v1633_v7, 4  ;;  %v1650_v13 = vrot.slane %v1645_v8, 4 }
 0x2b6   : > { %1894 = vmatpush.msrb.mxu0 %v1657_v10  ;;  %1871 = vmatpush.msra.mxu3 %v1655_v11 }
 0x2b7   : > { %v1653_v14 = vsel %vm1308_vm2, %v1645_v8, %v1652_v12  ;;  %v1651_v15 = vsel %vm1308_vm2, %v1650_v13, %v1633_v7 }
 0x2b8   : > { %1848 = vmatpush.msrb.mxu2 %v1653_v14  ;;  %1825 = vmatpush.msrb.mxu1 %v1651_v15 }
 0x300   : > { %v1789_v16 = vpop.xlane.xlu2 %1788 }
 0x301   : > { %3778 = vrcp.f32 %v1789_v16 }
 0x304   : > { %v1792_v18 = vpop.xlane.xlu1 %1791 }
 0x305   : > { %3780 = vrcp.f32 %v1792_v18 }
 0x307   : > { %v3779_v19 = vpop.eup %3778 }
 0x308   : > { %v1803_v20 = vmul.f32 %v3779_v19, %v4583_v56 }
 0x30a   : > { %3533 = vmatmul.msk.f32.vlgmr.msrb.gmra.mxu1 %vm1658_vm3, %v1803_v20 }
 0x30b   : > { %v3781_v21 = vpop.eup %3780 }
 0x30c   : > { %v1795_v22 = vpop.xlane.xlu0 %1794  ;;  %v1804_v23 = vmul.f32 %v3781_v21, %v4587_v61 }
 0x30d   : > { %3782 = vrcp.f32 %v1795_v22 }
 0x30e   : > { %3534 = vmatmul.msk.f32.vlgmr.msrb.gmra.mxu2 %vm1658_vm3, %v1804_v23 }
 0x313   : > { %v3783_v24 = vpop.eup %3782 }
 0x314   : > { %v1805_v25 = vmul.f32 %v3783_v24, %v4591_v2  ;;  %v1798_v26 = vpop.xlane.xlu0 %1797 }
 0x315   : > { %3784 = vrcp.f32 %v1798_v26 }
 0x316   : > { %3535 = vmatmul.msk.f32.vlgmr.msra.gmra.mxu3 %vm1658_vm3, %v1805_v25 }
 0x31b   : > { %v3785_v27 = vpop.eup %3784 }
 0x31c   : > { %v1806_v28 = vmul.f32 %v3785_v27, %v4595_v9 }
 0x31e   : > { %3536 = vmatmul.msk.f32.vlgmr.msrb.gmra.mxu0 %vm1658_vm3, %v1806_v28 }
 0x387   : > { %v1827_v56 = vpop.f32.mrf.mxu1 }
 0x388   : > { %v1901_v32 = vrot.slane %v1827_v56, 4 }
 0x391   : > { %v1850_v30 = vpop.f32.mrf.mxu2 }
 0x392   : > { %v1913_v61 = vrot.slane %v1850_v30, 4 }
 0x399   : > { %v1873_v33 = vpop.f32.mrf.mxu3 }
 0x39a   : > { %v1899_v34 = vrot.slane %v1873_v33, 4  ;;  %v1902_v35 = vsel %vm1308_vm2, %v1873_v33, %v1901_v32 }
 0x39b   : > { %v1910_v36 = vperm.slane %v1902_v35, %v4473_v17  ;;  %v1896_v2 = vpop.f32.mrf.mxu0  ;;  %v3639_v35 = vld [vmem:[%s5133_s20 + $0x8] sm:$0xff]  ;;  %s5143_s20 = scalar_lea.vmem %s5054_s9, %s4381_s10 }
 0x39c   : > { %v1900_v37 = vsel %vm1308_vm2, %v1899_v34, %v1827_v56  ;;  %v1911_v38 = vrot.slane %v1896_v2, 4  ;;  %v1914_v39 = vsel %vm1308_vm2, %v1896_v2, %v1913_v61  ;;  %2048 = vmatpush.bf16.msra.mxu1 %v3639_v35 }
 0x39d   : > { %v1906_v9 = vperm.slane %v1900_v37, %v4473_v17  ;;  %v1937_v40 = vrot.slane %v1910_v36, 4  ;;  %v1922_v41 = vperm.slane %v1914_v39, %v4473_v17 }
 0x39e   : > { %v1912_v42 = vsel %vm1308_vm2, %v1911_v38, %v1850_v30 }
 0x39f   : > { %v1925_v43 = vrot.slane %v1906_v9, 4  ;;  %v1918_v44 = vperm.slane %v1912_v42, %v4473_v17  ;;  %v1935_v45 = vrot.slane %v1922_v41, 4  ;;  %v1938_v46 = vsel %vm1308_vm2, %v1922_v41, %v1937_v40 }
 0x3a0   : > { %v1946_v47 = vperm.slane %v1938_v46, %v4479_v29  ;;  %v1183_v42 = vunpack.c.l.bf16 %v4461_v5  ;;  %v4709_v5 = vld [vmem:[%s5138_s0] sm:$0xf] }
 0x3a1   : > { %v1923_v48 = vrot.slane %v1918_v44, 4  ;;  %v1926_v49 = vsel %vm1308_vm2, %v1918_v44, %v1925_v43  ;;  %v1936_v50 = vsel %vm1308_vm2, %v1935_v45, %v1910_v36  ;;  %v3638_v36 = vld [vmem:[%s5134_s29] sm:$0xff]  ;;  %s5144_s29 = scalar_lea.vmem [#allocation7], %s4349_s5 }
 0x3a2   : > { %v1934_v51 = vperm.slane %v1926_v49, %v4479_v29  ;;  %v1942_v52 = vperm.slane %v1936_v50, %v4479_v29  ;;  %v1953_v53 = vrot.slane %v1946_v47, 4  ;;  %2049 = vmatpush.bf16.msra.mxu1 %v3638_v36  ;;  %v4081_v47 = vmov 32.0   ;;  %v3642_v49 = vld [vmem:[%s5136_s2] sm:$0xff]  ;;  %s5146_s2 = sld [smem:[#allocation27_spill]] }
 0x3a3   : > { %v1924_v54 = vsel %vm1308_vm2, %v1923_v48, %v1906_v9  ;;  %3786 = vrcp.f32 %v4081_v47  ;;  %v3643_v48 = vld [vmem:[%s5135_s12 + $0x8] sm:$0xff]  ;;  %s5145_s12 = smov %s5144_s29 }
 0x3a4   : > { %v1930_v55 = vperm.slane %v1924_v54, %v4479_v29  ;;  %v1949_v57 = vrot.slane %v1934_v51, 4  ;;  %v1951_v58 = vrot.slane %v1942_v52, 4  ;;  %v1954_v59 = vsel %vm1308_vm2, 0.0, %v1953_v53  ;;  %2161 = vmatpush.bf16.msrb.mxu3 %v3643_v48 }
 0x3a5   : > { %v1966_v60 = vsel %vm1308_vm2, %v1953_v53, %v1942_v52  ;;  %v1971_v62 = vrot.slane %v1954_v59, 4 }
 0x3a6   : > { %v1947_v63 = vrot.slane %v1930_v55, 4  ;;  %v1950_v0 = vsel %vm1308_vm2, 0.0, %v1949_v57  ;;  %v1952_v1 = vsel %vm1308_vm2, 0.0, %v1951_v58  ;;  %v1970_v3 = vperm.slane %v1966_v60, %v4473_v17 }
 0x3a7   : > { %v1960_v4 = vrot.slane %v1950_v0, 4  ;;  %v1955_v6 = vsel %vm1308_vm2, %v1949_v57, %v1930_v55  ;;  %v1972_v7 = vsel %vm1308_vm2, %v1971_v62, %v1952_v1  ;;  %v3640_v0 = vld [vmem:[%s5140_s28] sm:$0xff]  ;;  %s5154_s28 = sld [smem:[#allocation38_spill]] }
 0x3a8   : > { %v1948_v8 = vsel %vm1308_vm2, 0.0, %v1947_v63  ;;  %v1959_v10 = vperm.slane %v1955_v6, %v4473_v17  ;;  %v1976_v11 = vperm.slane %v1972_v7, %v4473_v17  ;;  %v1991_v12 = vrot.slane %v1970_v3, 4  ;;  %2162 = vmatpush.bf16.msrb.mxu3 %v3642_v49  ;;  %v3641_v63 = vld [vmem:[%s5139_s23 + $0x8] sm:$0xff]  ;;  %s5147_s17 = scalar_lea.vmem %s5146_s2, %s5176_s4  ;;  %s5148_s4 = scalar_lea.vmem [#allocation9], %s4349_s5 }
 0x3a9   : > { %v1961_v13 = vsel %vm1308_vm2, %v1960_v4, %v1948_v8  ;;  %v3787_v50 = vpop.eup %3786  ;;  %2132 = vmatpush.bf16.msra.mxu2 %v3641_v63 }
 0x3aa   : > { %v1965_v14 = vperm.slane %v1961_v13, %v4473_v17  ;;  %v1979_v15 = vrot.slane %v1959_v10, 4  ;;  %v1992_v16 = vsel %vm1308_vm2, %v1976_v11, %v1991_v12  ;;  %v1989_v18 = vrot.slane %v1976_v11, 4 }
 0x3ab   : > { %v2000_v19 = vperm.slane %v1992_v16, %v4479_v29  ;;  %v2061_v51 = vmul.f32 32.0, %v3787_v50  ;;  %3563 = vmatmul.msk.bf16.vlgmr.msrb.gmra.mxu3 %vm1229_vm1, %v4709_v5  ;;  %vm2065_vm8 = vweird.f32 %v3787_v50 }
 0x3ac   : > { %v1980_v20 = vsel %vm1308_vm2, %v1965_v14, %v1979_v15  ;;  %v1977_v21 = vrot.slane %v1965_v14, 4  ;;  %v1990_v22 = vsel %vm1308_vm2, %v1989_v18, %v1970_v3  ;;  %v3762_v15 = vld [vmem:[%s5142_s22] ss:$0 sm:$0xff]  ;;  %s5156_s22 = sld [smem:[#allocation40_spill]] }
 0x3ad   : > { %v1988_v23 = vperm.slane %v1980_v20, %v4479_v29  ;;  %v2005_v24 = vrot.slane %v2000_v19, 4  ;;  %v1996_v25 = vperm.slane %v1990_v22, %v4479_v29  ;;  %v2062_v52 = vsub.f32 1.0, %v2061_v51  ;;  %2133 = vmatpush.bf16.msra.mxu2 %v3640_v0  ;;  %v3763_v18 = vld [vmem:[%s5143_s20] ss:$0 sm:$0xff]  ;;  %s5155_s13 = scalar_lea.vmem %s5154_s28, %s4381_s10 }
 0x3ae   : > { %v1978_v26 = vsel %vm1308_vm2, %v1977_v21, %v1959_v10 }
 0x3af   : > { %v2006_v27 = vsel %vm1308_vm2, %v2005_v24, %v1988_v23  ;;  %v2007_v28 = vrot.slane %v1988_v23, 4  ;;  %v1984_v56 = vperm.slane %v1978_v26, %v4479_v29  ;;  %v2001_v30 = vrot.slane %v1996_v25, 4 }
 0x3b0   : > { %2014 = vrot.lane.b32.xlu0 %v2006_v27, %s4078_s25  ;;  %v2063_v53 = vmul.f32 %v3787_v50, %v2062_v52 }
 0x3b1   : > { %v2008_v32 = vsel %vm1308_vm2, %v2000_v19, %v2007_v28  ;;  %v2003_v33 = vrot.slane %v1984_v56, 4  ;;  %v2002_v61 = vsel %vm1308_vm2, %v2001_v30, %v1984_v56 }
 0x3b2   : > { %2018 = vrot.lane.b32.xlu2 %v2008_v32, %s4079_s15  ;;  %v2064_v54 = vadd.f32 %v3787_v50, %v2063_v53  ;;  %s5157_s7 = scalar_lea.vmem %s5156_s22, %s4381_s10 }
 0x3b3   : > { %v2004_v34 = vsel %vm1308_vm2, %v1996_v25, %v2003_v33 }
 0x3b4   : > { %2010 = vrot.lane.b32.xlu1 %v2004_v34, %s4080_s18  ;;  %v4713_v55 = vsel %vm2065_vm8, %v3787_v50, %v2064_v54 }
 0x40c   : > { %v2019_v39 = vpop.permute.xlu2 %2018 }
 0x422   : > { %v2015_v37 = vpop.permute.xlu0 %2014 }
 0x426   : > { %v2011_v2 = vpop.permute.xlu1 %2010 }
 0x427   : > { %v2021_v38 = vsel %vm1658_vm3, %v2002_v61, %v2011_v2 }
 0x428   : > { %v2023_v9 = vsel %vm2022_vm6, %v2021_v38, %v2015_v37 }
 0x429   : > { %v2025_v40 = vsel %vm2024_vm7, %v2023_v9, %v2019_v39 }
 0x42a   : > { %v2026_v41 = vpack.c.bf16 %v2025_v40, %v2025_v40 }
 0x42c   : > { %3545 = vmatmul.msk.bf16.vlgmr.msra.gmra.mxu1 %vm1229_vm1, %v2026_v41 }
 0x42e   : > { %v2164_v1 = vpop.f32.mrf.mxu3 }
 0x42f   : > { %2314 = vrot.lane.b32.xlu2 %v2164_v1, %s4074_s1  ;;  %v2325_v24 = vrot.slane %v2164_v1, 4 }
 0x436   : > { %v2166_v7 = vpop.f32.mrf.mxu3 }
 0x437   : > { %2317 = vrot.lane.b32.xlu2 %v2164_v1, %s4072_s8 }
 0x43f   : > { %2320 = vrot.lane.b32.xlu2 %v2164_v1, %s4073_s30 }
 0x489   : > { %v2315_v23 = vpop.permute.xlu2 %2314 }
 0x48a   : > { %v2337_v56 = vrot.slane %v2315_v23, 4 }
 0x491   : > { %v2318_v25 = vpop.permute.xlu2 %2317 }
 0x492   : > { %v2326_v26 = vsel %vm1308_vm2, %v2318_v25, %v2325_v24  ;;  %v2323_v27 = vrot.slane %v2318_v25, 4 }
 0x493   : > { %v2334_v28 = vperm.slane %v2326_v26, %v4473_v17 }
 0x494   : > { %v2324_v30 = vsel %vm1308_vm2, %v2323_v27, %v2164_v1  ;;  %v3645_v1 = vld [vmem:[%s5144_s29 + $0x8] sm:$0xff] }
 0x495   : > { %v2361_v32 = vrot.slane %v2334_v28, 4  ;;  %v2330_v61 = vperm.slane %v2324_v30, %v4473_v17  ;;  %2186 = vmatpush.bf16.msra.mxu0 %v3645_v1 }
 0x497   : > { %v2349_v39 = vrot.slane %v2330_v61, 4 }
 0x499   : > { %v2321_v33 = vpop.permute.xlu2 %2320 }
 0x49a   : > { %v2335_v34 = vrot.slane %v2321_v33, 4  ;;  %v2338_v35 = vsel %vm1308_vm2, %v2321_v33, %v2337_v56 }
 0x49b   : > { %v2346_v36 = vperm.slane %v2338_v35, %v4473_v17 }
 0x49c   : > { %v2336_v2 = vsel %vm1308_vm2, %v2335_v34, %v2315_v23 }
 0x49d   : > { %v2359_v37 = vrot.slane %v2346_v36, 4  ;;  %v2362_v38 = vsel %vm1308_vm2, %v2346_v36, %v2361_v32  ;;  %v2342_v9 = vperm.slane %v2336_v2, %v4473_v17 }
 0x49e   : > { %v2370_v40 = vperm.slane %v2362_v38, %v4479_v29 }
 0x49f   : > { %v2360_v41 = vsel %vm1308_vm2, %v2359_v37, %v2334_v28 }
 0x4a9   : > { %v2051_v43 = vpop.f32.mrf.mxu1 }
 0x4aa   : > { %v2052_v44 = vadd.f32 %v2051_v43, %v1183_v42  ;;  %v2347_v42 = vrot.slane %v2342_v9, 4  ;;  %v2350_v43 = vsel %vm1308_vm2, %v2342_v9, %v2349_v39 }
 0x4ac   : > { %v2057_v45 = vsel %vm1229_vm1, %v2052_v44, 0.0  ;;  %v2348_v47 = vsel %vm1308_vm2, %v2347_v42, %v2330_v61 }
 0x4ad   : > { %2058 = vadd.xlane.f32.xlu0 %v2057_v45  ;;  %v2377_v45 = vrot.slane %v2370_v40, 4  ;;  %v2354_v50 = vperm.slane %v2348_v47, %v4479_v29 }
 0x4af   : > { %v2378_v49 = vsel %vm1308_vm2, 0.0, %v2377_v45  ;;  %v2371_v54 = vrot.slane %v2354_v50, 4 }
 0x4b0   : > { %v2395_v52 = vrot.slane %v2378_v49, 4 }
 0x4b1   : > { %v2053_v46 = vpop.f32.mrf.mxu1  ;;  %v2372_v63 = vsel %vm1308_vm2, 0.0, %v2371_v54 }
 0x4b2   : > { %v2358_v46 = vperm.slane %v2350_v43, %v4479_v29 }
 0x4b4   : > { %v2373_v51 = vrot.slane %v2358_v46, 4 }
 0x520   : > { %v2059_v57 = vpop.xlane.xlu0 %2058 }
 0x521   : > { %v2067_v58 = vmul.f32 %v4713_v55, %v2059_v57  ;;  %v2374_v57 = vsel %vm1308_vm2, 0.0, %v2373_v51 }
 0x523   : > { %v2068_v59 = vsub.f32 %v2052_v44, %v2067_v58  ;;  %v2366_v44 = vperm.slane %v2360_v41, %v4479_v29 }
 0x525   : > { %v2069_v60 = vmul.f32 %v2068_v59, %v2068_v59  ;;  %v2375_v48 = vrot.slane %v2366_v44, 4 }
 0x527   : > { %v2070_v62 = vsel %vm1229_vm1, %v2069_v60, 0.0  ;;  %v2376_v53 = vsel %vm1308_vm2, 0.0, %v2375_v48  ;;  %v2384_v60 = vrot.slane %v2374_v57, 4 }
 0x528   : > { %2071 = vadd.xlane.f32.xlu1 %v2070_v62  ;;  %v2396_v58 = vsel %vm1308_vm2, %v2395_v52, %v2376_v53 }
 0x529   : > { %v2400_v62 = vperm.slane %v2396_v58, %v4473_v17 }
 0x59b   : > { %v2072_v3 = vpop.xlane.xlu1 %2071 }
 0x59c   : > { %v2073_v4 = vmul.f32 %v2072_v3, %v4713_v55  ;;  %v2379_v3 = vsel %vm1308_vm2, %v2373_v51, %v2354_v50 }
 0x59e   : > { %v2074_v6 = vadd.f32 1e-06, %v2073_v4  ;;  %v2385_v4 = vsel %vm1308_vm2, %v2384_v60, %v2372_v63 }
 0x5a0   : > { %3788 = vrsqrt.f32 %v2074_v6  ;;  %vm2081_vm10 = vweird.f32 %v2074_v6 }
 0x5a6   : > { %v3789_v8 = vpop.eup %3788 }
 0x5a7   : > { %v2076_v10 = vmul.f32 %v3789_v8, %v2074_v6  ;;  %vm2082_vm9 = vweird.f32 %v3789_v8  ;;  %v2413_v6 = vrot.slane %v2400_v62, 4 }
 0x5a8   : > { %vm2083_vm11 = vmor %vm2081_vm10, %vm2082_vm9 }
 0x5a9   : > { %v2077_v11 = vmul.f32 %v3789_v8, %v2076_v10  ;;  %v2389_v10 = vperm.slane %v2385_v4, %v4473_v17 }
 0x5ab   : > { %v2078_v12 = vmul.f32 0.5, %v2077_v11 }
 0x5ad   : > { %v2079_v13 = vsub.f32 1.5, %v2078_v12  ;;  %v2401_v12 = vrot.slane %v2389_v10, 4 }
 0x5af   : > { %v2080_v14 = vmul.f32 %v3789_v8, %v2079_v13 }
 0x5b1   : > { %v2084_v16 = vsel %vm2083_vm11, %v3789_v8, %v2080_v14  ;;  %v2383_v8 = vperm.slane %v2379_v3, %v4473_v17 }
 0x5b2   : > { %v2085_v19 = vmul.f32 %v2084_v16, %v2068_v59  ;;  %v2390_v59 = vsel %vm1308_vm2, %v2377_v45, %v2366_v44 }
 0x5b3   : > { %v2394_v0 = vperm.slane %v2390_v59, %v4473_v17  ;;  %v2402_v14 = vsel %vm1308_vm2, %v2401_v12, %v2383_v8  ;;  %v2403_v16 = vrot.slane %v2383_v8, 4 }
 0x5b4   : > { %v2089_v20 = vmul.f32 %v3762_v15, %v2085_v19  ;;  %v3644_v19 = vld [vmem:[%s5145_s12] sm:$0xff] }
 0x5b5   : > { %v2415_v7 = vrot.slane %v2394_v0, 4  ;;  %v2414_v11 = vsel %vm1308_vm2, %v2413_v6, %v2394_v0  ;;  %v2404_v23 = vsel %vm1308_vm2, %v2389_v10, %v2403_v16  ;;  %2187 = vmatpush.bf16.msra.mxu0 %v3644_v19 }
 0x5b6   : > { %v4735_v21 = vadd.f32 %v3763_v18, %v2089_v20  ;;  %v2420_v13 = vperm.slane %v2414_v11, %v4479_v29  ;;  %v2408_v20 = vperm.slane %v2402_v14, %v4479_v29  ;;  %v2412_v26 = vperm.slane %v2404_v23, %v4479_v29 }
 0x5b7   : > { %v2416_v18 = vsel %vm1308_vm2, %v2400_v62, %v2415_v7 }
 0x5b8   : > { %v2094_v22 = vpack.c.bf16 %v4735_v21, %v4735_v21  ;;  %v2425_v15 = vrot.slane %v2420_v13, 4  ;;  %v2427_v25 = vrot.slane %v2408_v20, 4  ;;  %v2431_v30 = vrot.slane %v2412_v26, 4  ;;  %3572 = vmatmul.msk.bf16.vlgmr.msra.gmra.mxu0 %vm1229_vm1, %v4709_v5 }
 0x5ba   : > { %3554 = vmatmul.msk.bf16.vlgmr.msra.gmra.mxu2 %vm1229_vm1, %v2094_v22  ;;  %v2424_v22 = vperm.slane %v2416_v18, %v4479_v29  ;;  %v2426_v24 = vsel %vm1308_vm2, %v2425_v15, %v2408_v20  ;;  %v2428_v28 = vsel %vm1308_vm2, %v2420_v13, %v2427_v25 }
 0x5bb   : > { %3573 = vmatpush.xpose.msk.msrb.mxu1 %vm1658_vm3, %v2426_v24  ;;  %3575 = vmatpush.xpose.msk.msrb.mxu2 %vm1658_vm3, %v2428_v28 }
 0x5bc   : > { %v2429_v27 = vrot.slane %v2424_v22, 4  ;;  %v2432_v32 = vsel %vm1308_vm2, %v2424_v22, %v2431_v30 }
 0x5bd   : > { %3579 = vmatpush.xpose.msk.msrb.mxu0 %vm1658_vm3, %v2432_v32 }
 0x5be   : > { %v2430_v56 = vsel %vm1308_vm2, %v2429_v27, %v2412_v26 }
 0x5bf   : > { %3577 = vmatpush.xpose.msk.msra.mxu3 %vm1658_vm3, %v2430_v56 }
 0x635   : > { %v4793_v37 = vpop.f32.mrf.mxu0 }
 0x63d   : > { %v2135_v33 = vpop.f32.mrf.mxu2  ;;  %v2191_v45 = vpop.f32.mrf.mxu0 }
 0x63e   : > { %v2139_v61 = vmul.f32 0.35355338, %v2135_v33 }
 0x640   : > { %2200 = vrot.lane.b32.xlu0 %v2139_v61, %s4073_s30  ;;  %2194 = vrot.lane.b32.xlu2 %v2139_v61, %s4074_s1  ;;  %v2205_v2 = vrot.slane %v2139_v61, 4 }
 0x645   : > { %v2137_v34 = vpop.f32.mrf.mxu2 }
 0x648   : > { %2197 = vrot.lane.b32.xlu2 %v2139_v61, %s4072_s8  ;;  %2434 = vrot.lane.b32.xlu0 %v4793_v37, %s4074_s1 }
 0x650   : > { %2440 = vrot.lane.b32.xlu0 %v4793_v37, %s4073_s30 }
 0x69a   : > { %v2195_v35 = vpop.permute.xlu2 %2194 }
 0x69b   : > { %v2217_v40 = vrot.slane %v2195_v35, 4 }
 0x6a2   : > { %v2198_v36 = vpop.permute.xlu2 %2197 }
 0x6a3   : > { %v2203_v5 = vrot.slane %v2198_v36, 4  ;;  %v2206_v38 = vsel %vm1308_vm2, %v2198_v36, %v2205_v2 }
 0x6a4   : > { %v2214_v9 = vperm.slane %v2206_v38, %v4473_v17 }
 0x6a5   : > { %v2204_v39 = vsel %vm1308_vm2, %v2203_v5, %v2139_v61 }
 0x6a6   : > { %v2210_v41 = vperm.slane %v2204_v39, %v4473_v17  ;;  %v2241_v46 = vrot.slane %v2214_v9, 4 }
 0x6a8   : > { %v2229_v49 = vrot.slane %v2210_v41, 4 }
 0x6b2   : > { %v2201_v42 = vpop.permute.xlu0 %2200 }
 0x6b3   : > { %v2215_v43 = vrot.slane %v2201_v42, 4  ;;  %v2218_v44 = vsel %vm1308_vm2, %v2201_v42, %v2217_v40 }
 0x6b4   : > { %v2226_v47 = vperm.slane %v2218_v44, %v4473_v17 }
 0x6b5   : > { %v2216_v48 = vsel %vm1308_vm2, %v2215_v43, %v2195_v35 }
 0x6b6   : > { %v2222_v50 = vperm.slane %v2216_v48, %v4473_v17  ;;  %v2239_v51 = vrot.slane %v2226_v47, 4  ;;  %v2242_v52 = vsel %vm1308_vm2, %v2226_v47, %v2241_v46 }
 0x6b7   : > { %v2250_v53 = vperm.slane %v2242_v52, %v4479_v29 }
 0x6b8   : > { %v2227_v54 = vrot.slane %v2222_v50, 4  ;;  %v2230_v57 = vsel %vm1308_vm2, %v2222_v50, %v2229_v49  ;;  %v2240_v58 = vsel %vm1308_vm2, %v2239_v51, %v2214_v9 }
 0x6b9   : > { %v2238_v59 = vperm.slane %v2230_v57, %v4479_v29  ;;  %v2246_v60 = vperm.slane %v2240_v58, %v4479_v29  ;;  %v2257_v62 = vrot.slane %v2250_v53, 4 }
 0x6ba   : > { %v2228_v63 = vsel %vm1308_vm2, %v2227_v54, %v2210_v41  ;;  %v1198_v41 = vld [vmem:[%s5147_s17] sm:$0x1] }
 0x6bb   : > { %v2234_v0 = vperm.slane %v2228_v63, %v4479_v29  ;;  %v2253_v1 = vrot.slane %v2238_v59, 4  ;;  %v2255_v3 = vrot.slane %v2246_v60, 4  ;;  %v2258_v4 = vsel %vm1308_vm2, 0.0, %v2257_v62 }
 0x6bc   : > { %v2270_v6 = vsel %vm1308_vm2, %v2257_v62, %v2246_v60  ;;  %v2275_v7 = vrot.slane %v2258_v4, 4  ;;  %vm1199_vm12 = vcmp.ne.s32.totalorder %v1198_v41, 0 }
 0x6bd   : > { %v2251_v8 = vrot.slane %v2234_v0, 4  ;;  %v2254_v10 = vsel %vm1308_vm2, 0.0, %v2253_v1  ;;  %v2256_v11 = vsel %vm1308_vm2, 0.0, %v2255_v3  ;;  %v2259_v12 = vsel %vm1308_vm2, %v2253_v1, %v2234_v0 }
 0x6be   : > { %v2264_v13 = vrot.slane %v2254_v10, 4  ;;  %v2274_v14 = vperm.slane %v2270_v6, %v4473_v17  ;;  %v2276_v15 = vsel %vm1308_vm2, %v2275_v7, %v2256_v11  ;;  %v2263_v16 = vperm.slane %v2259_v12, %v4473_v17 }
 0x6bf   : > { %v2252_v18 = vsel %vm1308_vm2, 0.0, %v2251_v8  ;;  %v2280_v19 = vperm.slane %v2276_v15, %v4473_v17  ;;  %v1200_v42 = vsel %vm1199_vm12, 0.0, %v4077_v31 }
 0x6c0   : > { %v2295_v20 = vrot.slane %v2274_v14, 4  ;;  %v2265_v22 = vsel %vm1308_vm2, %v2264_v13, %v2252_v18  ;;  %v2283_v23 = vrot.slane %v2263_v16, 4  ;;  %v2554_v43 = vperm.slane %v1200_v42, 0 }
 0x6c1   : > { %v2269_v24 = vperm.slane %v2265_v22, %v4473_v17  ;;  %v2293_v25 = vrot.slane %v2280_v19, 4 }
 0x6c2   : > { %v2296_v26 = vsel %vm1308_vm2, %v2280_v19, %v2295_v20 }
 0x6c3   : > { %v2284_v27 = vsel %vm1308_vm2, %v2269_v24, %v2283_v23  ;;  %v2304_v28 = vperm.slane %v2296_v26, %v4479_v29  ;;  %v2281_v56 = vrot.slane %v2269_v24, 4  ;;  %v2294_v30 = vsel %vm1308_vm2, %v2293_v25, %v2274_v14  ;;  %v2435_v14 = vpop.permute.xlu0 %2434 }
 0x6c4   : > { %v2292_v32 = vperm.slane %v2284_v27, %v4479_v29  ;;  %v2300_v33 = vperm.slane %v2294_v30, %v4479_v29  ;;  %v2457_v20 = vrot.slane %v2435_v14, 4  ;;  %v2445_v26 = vrot.slane %v4793_v37, 4 }
 0x6c5   : > { %v2309_v61 = vrot.slane %v2304_v28, 4  ;;  %v2282_v34 = vsel %vm1308_vm2, %v2281_v56, %v2263_v16 }
 0x6c6   : > { %v2288_v35 = vperm.slane %v2282_v34, %v4479_v29  ;;  %v2305_v36 = vrot.slane %v2300_v33, 4  ;;  %v2311_v5 = vrot.slane %v2292_v32, 4 }
 0x6c7   : > { %v2310_v2 = vsel %vm1308_vm2, %v2309_v61, %v2292_v32 }
 0x6c8   : > { %3578 = vmatmul.msk.f32.vlgmr.msra.gmra.mxu3 %vm1658_vm3, %v2310_v2  ;;  %v2306_v38 = vsel %vm1308_vm2, %v2305_v36, %v2288_v35  ;;  %v2312_v39 = vsel %vm1308_vm2, %v2304_v28, %v2311_v5  ;;  %v2307_v9 = vrot.slane %v2288_v35, 4 }
 0x6c9   : > { %3574 = vmatmul.msk.f32.vlgmr.msrb.gmra.mxu1 %vm1658_vm3, %v2306_v38  ;;  %3580 = vmatmul.msk.f32.vlgmr.msrb.gmra.mxu0 %vm1658_vm3, %v2312_v39 }
 0x6ca   : > { %v2308_v40 = vsel %vm1308_vm2, %v2300_v33, %v2307_v9 }
 0x6cb   : > { %3576 = vmatmul.msk.f32.vlgmr.msrb.gmra.mxu2 %vm1658_vm3, %v2308_v40  ;;  %v2441_v19 = vpop.permute.xlu0 %2440 }
 0x6cc   : > { %v2455_v22 = vrot.slane %v2441_v19, 4  ;;  %v2458_v23 = vsel %vm1308_vm2, %v2441_v19, %v2457_v20 }
 0x6cd   : > { %v2466_v25 = vperm.slane %v2458_v23, %v4473_v17 }
 0x6ce   : > { %v2456_v24 = vsel %vm1308_vm2, %v2455_v22, %v2435_v14 }
 0x6cf   : > { %v2462_v27 = vperm.slane %v2456_v24, %v4473_v17  ;;  %v2479_v32 = vrot.slane %v2466_v25, 4 }
 0x6d1   : > { %v2467_v34 = vrot.slane %v2462_v27, 4 }
 0x746   : > { %v2579_v48 = vpop.f32.mrf.mxu1  ;;  %v2657_v53 = vpop.f32.mrf.mxu0 }
 0x747   : > { %v2580_v51 = vadd.f32 %v2579_v48, %v2554_v43  ;;  %v2658_v54 = vadd.f32 %v2657_v53, %v2554_v43 }
 0x749   : > { %v2660_v52 = vsel %vm1658_vm3, %v2580_v51, -inf  ;;  %v2669_v31 = vsel %vm1658_vm3, %v2658_v54, -inf }
 0x74b   : > { %v2631_v44 = vpop.f32.mrf.mxu3 }
 0x74c   : > { %v2632_v45 = vadd.f32 %v2631_v44, %v2554_v43 }
 0x74e   : > { %v2666_v46 = vsel %vm1658_vm3, %v2632_v45, -inf  ;;  %v2605_v47 = vpop.f32.mrf.mxu2 }
 0x74f   : > { %2667 = vmax.xlane.f32.xlu1 %v2666_v46  ;;  %v2606_v49 = vadd.f32 %v2605_v47, %v2554_v43 }
 0x751   : > { %v2663_v50 = vsel %vm1658_vm3, %v2606_v49, -inf }
 0x752   : > { %2664 = vmax.xlane.f32.xlu2 %v2663_v50 }
 0x757   : > { %2661 = vmax.xlane.f32.xlu1 %v2660_v52 }
 0x75f   : > { %2670 = vmax.xlane.f32.xlu1 %v2669_v31 }
 0x778   : > { %2437 = vrot.lane.b32.xlu1 %v4793_v37, %s4072_s8  ;;  %s5149_s8 = smov %s5148_s4 }
 0x7c2   : > { %v2668_v57 = vpop.xlane.xlu1 %2667 }
 0x7c3   : > { %v2674_v58 = vsub.f32 %v2632_v45, %v2668_v57 }
 0x7c5   : > { %v2680_v59 = vmul.f32 1.442695, %v2674_v58  ;;  %v2665_v60 = vpop.xlane.xlu2 %2664 }
 0x7c6   : > { %v2673_v62 = vsub.f32 %v2606_v49, %v2665_v60 }
 0x7c7   : > { %3790 = vpow2.f32 %v2680_v59 }
 0x7c8   : > { %v2678_v63 = vmul.f32 1.442695, %v2673_v62 }
 0x7ca   : > { %3792 = vpow2.f32 %v2678_v63  ;;  %v2662_v0 = vpop.xlane.xlu1 %2661 }
 0x7cb   : > { %v2672_v1 = vsub.f32 %v2580_v51, %v2662_v0 }
 0x7cd   : > { %v4855_v3 = vpop.eup %3790  ;;  %v2676_v4 = vmul.f32 1.442695, %v2672_v1 }
 0x7ce   : > { %v2690_v6 = vsel %vm1658_vm3, %v4855_v3, 0.0 }
 0x7cf   : > { %3794 = vpow2.f32 %v2676_v4  ;;  %2691 = vadd.xlane.f32.xlu0 %v2690_v6 }
 0x7d0   : > { %v4859_v7 = vpop.eup %3792 }
 0x7d1   : > { %v2687_v8 = vsel %vm1658_vm3, %v4859_v7, 0.0 }
 0x7d2   : > { %v2671_v10 = vpop.xlane.xlu1 %2670  ;;  %2688 = vadd.xlane.f32.xlu2 %v2687_v8 }
 0x7d3   : > { %v2675_v11 = vsub.f32 %v2658_v54, %v2671_v10 }
 0x7d5   : > { %v4863_v12 = vpop.eup %3794  ;;  %v2682_v13 = vmul.f32 1.442695, %v2675_v11 }
 0x7d6   : > { %v2684_v15 = vsel %vm1658_vm3, %v4863_v12, 0.0 }
 0x7d7   : > { %3796 = vpow2.f32 %v2682_v13  ;;  %2685 = vadd.xlane.f32.xlu1 %v2684_v15 }
 0x7dd   : > { %v4867_v16 = vpop.eup %3796 }
 0x7de   : > { %v2693_v18 = vsel %vm1658_vm3, %v4867_v16, 0.0 }
 0x7df   : > { %2694 = vadd.xlane.f32.xlu2 %v2693_v18 }
 0x7ea   : > { %v2438_v28 = vpop.permute.xlu1 %2437 }
 0x7eb   : > { %v2443_v56 = vrot.slane %v2438_v28, 4  ;;  %v2446_v30 = vsel %vm1308_vm2, %v2438_v28, %v2445_v26 }
 0x7ec   : > { %v2454_v33 = vperm.slane %v2446_v30, %v4473_v17 }
 0x7ed   : > { %v2444_v61 = vsel %vm1308_vm2, %v2443_v56, %v4793_v37 }
 0x7ee   : > { %v2450_v35 = vperm.slane %v2444_v61, %v4473_v17  ;;  %v2480_v36 = vsel %vm1308_vm2, %v2479_v32, %v2454_v33  ;;  %v2481_v5 = vrot.slane %v2454_v33, 4 }
 0x7ef   : > { %v2486_v2 = vperm.slane %v2480_v36, %v4479_v29 }
 0x7f0   : > { %v2468_v38 = vsel %vm1308_vm2, %v2467_v34, %v2450_v35  ;;  %v2469_v39 = vrot.slane %v2450_v35, 4  ;;  %v2482_v9 = vsel %vm1308_vm2, %v2466_v25, %v2481_v5 }
 0x7f1   : > { %v2474_v40 = vperm.slane %v2468_v38, %v4479_v29  ;;  %v2490_v41 = vperm.slane %v2482_v9, %v4479_v29  ;;  %v2495_v43 = vrot.slane %v2486_v2, 4 }
 0x7f2   : > { %v2470_v42 = vsel %vm1308_vm2, %v2462_v27, %v2469_v39 }
 0x7f3   : > { %v2478_v37 = vperm.slane %v2470_v42, %v4479_v29  ;;  %v2497_v44 = vrot.slane %v2490_v41, 4  ;;  %v2491_v45 = vrot.slane %v2474_v40, 4  ;;  %v2496_v52 = vsel %vm1308_vm2, 0.0, %v2495_v43 }
 0x7f5   : > { %v2493_v46 = vrot.slane %v2478_v37, 4  ;;  %v2498_v47 = vsel %vm1308_vm2, 0.0, %v2497_v44  ;;  %v2510_v48 = vsel %vm1308_vm2, %v2497_v44, %v2486_v2  ;;  %v2492_v59 = vsel %vm1308_vm2, 0.0, %v2491_v45 }
 0x7f6   : > { %v2514_v49 = vperm.slane %v2510_v48, %v4473_v17  ;;  %v2515_v50 = vrot.slane %v2498_v47, 4 }
 0x7f7   : > { %v2494_v51 = vsel %vm1308_vm2, 0.0, %v2493_v46  ;;  %v2499_v53 = vsel %vm1308_vm2, %v2493_v46, %v2474_v40 }
 0x7f8   : > { %v2504_v54 = vrot.slane %v2494_v51, 4  ;;  %v2516_v31 = vsel %vm1308_vm2, %v2515_v50, %v2496_v52  ;;  %v2503_v57 = vperm.slane %v2499_v53, %v4473_v17  ;;  %v2535_v58 = vrot.slane %v2514_v49, 4 }
 0x7f9   : > { %v2520_v60 = vperm.slane %v2516_v31, %v4473_v17 }
 0x7fa   : > { %v2505_v62 = vsel %vm1308_vm2, %v2504_v54, %v2492_v59  ;;  %v2523_v63 = vrot.slane %v2503_v57, 4 }
 0x7fb   : > { %v2509_v0 = vperm.slane %v2505_v62, %v4473_v17  ;;  %v2536_v1 = vsel %vm1308_vm2, %v2520_v60, %v2535_v58  ;;  %v2533_v4 = vrot.slane %v2520_v60, 4 }
 0x7fc   : > { %v2544_v6 = vperm.slane %v2536_v1, %v4479_v29 }
 0x7fd   : > { %v2524_v8 = vsel %vm1308_vm2, %v2509_v0, %v2523_v63  ;;  %v2521_v10 = vrot.slane %v2509_v0, 4  ;;  %v2534_v11 = vsel %vm1308_vm2, %v2533_v4, %v2514_v49 }
 0x7fe   : > { %v2532_v13 = vperm.slane %v2524_v8, %v4479_v29  ;;  %v2549_v14 = vrot.slane %v2544_v6, 4  ;;  %v2540_v15 = vperm.slane %v2534_v11, %v4479_v29 }
 0x7ff   : > { %v2522_v18 = vsel %vm1308_vm2, %v2521_v10, %v2503_v57 }
 0x800   : > { %v2550_v19 = vsel %vm1308_vm2, %v2549_v14, %v2532_v13  ;;  %v2528_v20 = vperm.slane %v2522_v18, %v4479_v29  ;;  %v2545_v22 = vrot.slane %v2540_v15, 4  ;;  %v2551_v23 = vrot.slane %v2532_v13, 4 }
 0x801   : > { %2768 = vmatpush.msrb.mxu3 %v2550_v19 }
 0x802   : > { %v2546_v24 = vsel %vm1308_vm2, %v2545_v22, %v2528_v20  ;;  %v2552_v25 = vsel %vm1308_vm2, %v2544_v6, %v2551_v23  ;;  %v2547_v26 = vrot.slane %v2528_v20, 4 }
 0x803   : > { %2722 = vmatpush.msra.mxu1 %v2546_v24  ;;  %2791 = vmatpush.msra.mxu0 %v2552_v25 }
 0x804   : > { %v2548_v27 = vsel %vm1308_vm2, %v2540_v15, %v2547_v26 }
 0x805   : > { %2745 = vmatpush.msra.mxu2 %v2548_v27 }
 0x842   : > { %v2692_v28 = vpop.xlane.xlu0 %2691 }
 0x843   : > { %3798 = vrcp.f32 %v2692_v28 }
 0x845   : > { %v2689_v56 = vpop.xlane.xlu2 %2688 }
 0x846   : > { %3800 = vrcp.f32 %v2689_v56 }
 0x849   : > { %v3799_v30 = vpop.eup %3798 }
 0x84a   : > { %v2702_v32 = vmul.f32 %v3799_v30, %v4855_v3  ;;  %v2686_v33 = vpop.xlane.xlu1 %2685 }
 0x84b   : > { %3802 = vrcp.f32 %v2686_v33 }
 0x84c   : > { %v3801_v61 = vpop.eup %3800  ;;  %3583 = vmatmul.msk.f32.vlgmr.msrb.gmra.mxu3 %vm1658_vm3, %v2702_v32 }
 0x84d   : > { %v2701_v34 = vmul.f32 %v3801_v61, %v4859_v7 }
 0x84f   : > { %3582 = vmatmul.msk.f32.vlgmr.msra.gmra.mxu2 %vm1658_vm3, %v2701_v34 }
 0x851   : > { %v3803_v35 = vpop.eup %3802 }
 0x852   : > { %v2700_v36 = vmul.f32 %v3803_v35, %v4863_v12  ;;  %v2695_v5 = vpop.xlane.xlu2 %2694 }
 0x853   : > { %3804 = vrcp.f32 %v2695_v5 }
 0x854   : > { %3581 = vmatmul.msk.f32.vlgmr.msra.gmra.mxu1 %vm1658_vm3, %v2700_v36 }
 0x859   : > { %v3805_v2 = vpop.eup %3804 }
 0x85a   : > { %v2703_v38 = vmul.f32 %v3805_v2, %v4867_v16 }
 0x85c   : > { %3584 = vmatmul.msk.f32.vlgmr.msra.gmra.mxu0 %vm1658_vm3, %v2703_v38 }
 0x8cf   : > { %v2770_v3 = vpop.f32.mrf.mxu3 }
 0x8d0   : > { %v2796_v9 = vrot.slane %v2770_v3, 4 }
 0x8d1   : > { %v2724_v39 = vpop.f32.mrf.mxu1 }
 0x8d2   : > { %v2798_v40 = vrot.slane %v2724_v39, 4  ;;  %v2747_v41 = vpop.f32.mrf.mxu2  ;;  %v2797_v42 = vsel %vm1308_vm2, %v2796_v9, %v2724_v39 }
 0x8d3   : > { %v2810_v37 = vrot.slane %v2747_v41, 4  ;;  %v2803_v43 = vperm.slane %v2797_v42, %v4473_v17 }
 0x8d4   : > { %v2799_v7 = vsel %vm1308_vm2, %v2770_v3, %v2798_v40 }
 0x8d5   : > { %v2807_v12 = vperm.slane %v2799_v7, %v4473_v17  ;;  %v2822_v49 = vrot.slane %v2803_v43, 4 }
 0x8d7   : > { %v2834_v46 = vrot.slane %v2807_v12, 4 }
 0x8d9   : > { %v2793_v44 = vpop.f32.mrf.mxu0 }
 0x8da   : > { %v2808_v45 = vrot.slane %v2793_v44, 4  ;;  %v2811_v16 = vsel %vm1308_vm2, %v2793_v44, %v2810_v37 }
 0x8db   : > { %v2819_v47 = vperm.slane %v2811_v16, %v4473_v17 }
 0x8dc   : > { %v2809_v48 = vsel %vm1308_vm2, %v2808_v45, %v2747_v41  ;;  %v3647_v41 = vld [vmem:[%s5148_s4 + $0x8] sm:$0xff] }
 0x8dd   : > { %v2815_v50 = vperm.slane %v2809_v48, %v4473_v17  ;;  %v2832_v51 = vrot.slane %v2819_v47, 4  ;;  %v2835_v52 = vsel %vm1308_vm2, %v2819_v47, %v2834_v46  ;;  %2943 = vmatpush.bf16.msrb.mxu1 %v3647_v41 }
 0x8de   : > { %v2843_v53 = vperm.slane %v2835_v52, %v4479_v29 }
 0x8df   : > { %v2820_v54 = vrot.slane %v2815_v50, 4  ;;  %v2823_v31 = vsel %vm1308_vm2, %v2815_v50, %v2822_v49  ;;  %v2833_v57 = vsel %vm1308_vm2, %v2832_v51, %v2807_v12 }
 0x8e0   : > { %v2831_v58 = vperm.slane %v2823_v31, %v4479_v29  ;;  %v2839_v59 = vperm.slane %v2833_v57, %v4479_v29  ;;  %v2850_v60 = vrot.slane %v2843_v53, 4 }
 0x8e1   : > { %v2821_v62 = vsel %vm1308_vm2, %v2820_v54, %v2803_v43 }
 0x8e2   : > { %v2827_v63 = vperm.slane %v2821_v62, %v4479_v29  ;;  %v2846_v0 = vrot.slane %v2831_v58, 4  ;;  %v2848_v1 = vrot.slane %v2839_v59, 4  ;;  %v2851_v4 = vsel %vm1308_vm2, 0.0, %v2850_v60  ;;  %v3653_v58 = vld [vmem:[%s4442_s6 + $0x18] sm:$0xff] }
 0x8e3   : > { %v2863_v6 = vsel %vm1308_vm2, %v2850_v60, %v2839_v59  ;;  %v2868_v8 = vrot.slane %v2851_v4, 4  ;;  %3065 = vmatpush.bf16.msra.mxu3 %v3653_v58  ;;  %v3652_v60 = vld [vmem:[%s4442_s6 + $0x10] sm:$0xff] }
 0x8e4   : > { %v2844_v10 = vrot.slane %v2827_v63, 4  ;;  %v2847_v11 = vsel %vm1308_vm2, 0.0, %v2846_v0  ;;  %v2849_v13 = vsel %vm1308_vm2, 0.0, %v2848_v1  ;;  %v2867_v14 = vperm.slane %v2863_v6, %v4473_v17 }
 0x8e5   : > { %v2857_v15 = vrot.slane %v2847_v11, 4  ;;  %v2852_v18 = vsel %vm1308_vm2, %v2846_v0, %v2827_v63  ;;  %v2869_v19 = vsel %vm1308_vm2, %v2868_v8, %v2849_v13  ;;  %v3765_v13 = vld [vmem:[%s5155_s13] ss:$0 sm:$0xff] }
 0x8e6   : > { %v2845_v20 = vsel %vm1308_vm2, 0.0, %v2844_v10  ;;  %v2856_v22 = vperm.slane %v2852_v18, %v4473_v17  ;;  %v2873_v23 = vperm.slane %v2869_v19, %v4473_v17  ;;  %v2888_v24 = vrot.slane %v2867_v14, 4  ;;  %v3764_v10 = vld [vmem:[%s5153_s11] ss:$0 sm:$0xff] }
 0x8e7   : > { %v2858_v25 = vsel %vm1308_vm2, %v2857_v15, %v2845_v20  ;;  %3066 = vmatpush.bf16.msra.mxu3 %v3652_v60  ;;  %v3651_v20 = vld [vmem:[%s4442_s6 + $0x8] sm:$0xff] }
 0x8e8   : > { %v2862_v26 = vperm.slane %v2858_v25, %v4473_v17  ;;  %v2876_v27 = vrot.slane %v2856_v22, 4  ;;  %v2889_v28 = vsel %vm1308_vm2, %v2873_v23, %v2888_v24  ;;  %v2886_v56 = vrot.slane %v2873_v23, 4  ;;  %v3766_v23 = vld [vmem:[%s5157_s7] ss:$0 sm:$0xff] }
 0x8e9   : > { %v2897_v30 = vperm.slane %v2889_v28, %v4479_v29 }
 0x8ea   : > { %v2877_v32 = vsel %vm1308_vm2, %v2862_v26, %v2876_v27  ;;  %v2874_v33 = vrot.slane %v2862_v26, 4  ;;  %v2887_v61 = vsel %vm1308_vm2, %v2886_v56, %v2867_v14  ;;  %v3767_v56 = vld [vmem:[%s1163_s19] ss:$0 sm:$0xff] }
 0x8eb   : > { %v2885_v34 = vperm.slane %v2877_v32, %v4479_v29  ;;  %v2902_v35 = vrot.slane %v2897_v30, 4  ;;  %v2893_v36 = vperm.slane %v2887_v61, %v4479_v29  ;;  %3067 = vmatpush.bf16.msra.mxu3 %v3651_v20 }
 0x8ec   : > { %v2875_v17 = vsel %vm1308_vm2, %v2874_v33, %v2856_v22  ;;  %v3650_v22 = vld [vmem:[%s4442_s6] sm:$0xff] }
 0x8ed   : > { %v2903_v5 = vsel %vm1308_vm2, %v2902_v35, %v2885_v34  ;;  %v2881_v2 = vperm.slane %v2875_v17, %v4479_v29  ;;  %v2898_v38 = vrot.slane %v2893_v36, 4  ;;  %v2904_v40 = vrot.slane %v2885_v34, 4  ;;  %v3646_v29 = vld [vmem:[%s5149_s8] sm:$0xff] }
 0x8ee   : > { %2911 = vrot.lane.b32.xlu0 %v2903_v5, %s4078_s25  ;;  %2944 = vmatpush.bf16.msrb.mxu1 %v3646_v29  ;;  %s5150_s25 = scalar_lea.vmem [#allocation10], %s4349_s5 }
 0x8ef   : > { %v2900_v3 = vrot.slane %v2881_v2, 4  ;;  %v2899_v39 = vsel %vm1308_vm2, %v2898_v38, %v2881_v2  ;;  %v2905_v7 = vsel %vm1308_vm2, %v2897_v30, %v2904_v40  ;;  %v3649_v31 = vld [vmem:[%s5150_s25 + $0x8] sm:$0xff]  ;;  %3068 = vmatpush.bf16.msra.mxu3 %v3650_v22 }
 0x8f0   : > { %3021 = vmatpush.bf16.msrb.mxu2 %v3649_v31 }
 0x8f1   : > { %v2901_v9 = vsel %vm1308_vm2, %v2893_v36, %v2900_v3 }
 0x8f2   : > { %2907 = vrot.lane.b32.xlu2 %v2901_v9, %s4080_s18 }
 0x8fa   : > { %2915 = vrot.lane.b32.xlu2 %v2905_v7, %s4079_s15  ;;  %s5151_s15 = smov %s5150_s25 }
 0x8fb   : > { %v3648_v57 = vld [vmem:[%s5151_s15] sm:$0xff] }
 0x8fc   : > { %3022 = vmatpush.bf16.msrb.mxu2 %v3648_v57 }
 0x94c   : > { %v2908_v42 = vpop.permute.xlu2 %2907 }
 0x94d   : > { %v2918_v12 = vsel %vm1658_vm3, %v2899_v39, %v2908_v42 }
 0x954   : > { %v2916_v43 = vpop.permute.xlu2 %2915 }
 0x960   : > { %v2912_v37 = vpop.permute.xlu0 %2911 }
 0x961   : > { %v2919_v44 = vsel %vm2022_vm6, %v2918_v12, %v2912_v37  ;;  %v3768_v12 = vld [vmem:[%s1166_s14] ss:$0 sm:$0xff] }
 0x962   : > { %v2920_v45 = vsel %vm2024_vm7, %v2919_v44, %v2916_v43 }
 0x963   : > { %v2921_v16 = vpack.c.bf16 %v2920_v45, %v2920_v45 }
 0x965   : > { %3593 = vmatmul.msk.bf16.vlgmr.msrb.gmra.mxu1 %vm1229_vm1, %v2921_v16 }
 0x9e2   : > { %v2946_v46 = vpop.f32.mrf.mxu1 }
 0x9e3   : > { %v2947_v47 = vadd.f32 %v2946_v46, %v4735_v21 }
 0x9e5   : > { %v2952_v48 = vsel %vm1229_vm1, %v2947_v47, 0.0 }
 0x9e6   : > { %2953 = vadd.xlane.f32.xlu1 %v2952_v48 }
 0x9ea   : > { %v2948_v49 = vpop.f32.mrf.mxu1 }
 0xa59   : > { %v2954_v50 = vpop.xlane.xlu1 %2953 }
 0xa5a   : > { %v2955_v51 = vmul.f32 %v2954_v50, %v4713_v55 }
 0xa5c   : > { %v2956_v52 = vsub.f32 %v2947_v47, %v2955_v51 }
 0xa5e   : > { %v2957_v53 = vmul.f32 %v2956_v52, %v2956_v52 }
 0xa60   : > { %v2958_v54 = vsel %vm1229_vm1, %v2957_v53, 0.0 }
 0xa61   : > { %2959 = vadd.xlane.f32.xlu2 %v2958_v54 }
 0xad4   : > { %v2960_v21 = vpop.xlane.xlu2 %2959 }
 0xad5   : > { %v2961_v59 = vmul.f32 %v2960_v21, %v4713_v55 }
 0xad7   : > { %v2962_v62 = vadd.f32 1e-06, %v2961_v59 }
 0xad9   : > { %3806 = vrsqrt.f32 %v2962_v62  ;;  %vm2969_vm14 = vweird.f32 %v2962_v62 }
 0xadf   : > { %v3807_v63 = vpop.eup %3806 }
 0xae0   : > { %v2964_v0 = vmul.f32 %v3807_v63, %v2962_v62  ;;  %vm2970_vm13 = vweird.f32 %v3807_v63 }
 0xae1   : > { %vm2971_vm15 = vmor %vm2969_vm14, %vm2970_vm13 }
 0xae2   : > { %v2965_v1 = vmul.f32 %v3807_v63, %v2964_v0 }
 0xae4   : > { %v2966_v4 = vmul.f32 0.5, %v2965_v1 }
 0xae6   : > { %v2967_v6 = vsub.f32 1.5, %v2966_v4 }
 0xae8   : > { %v2968_v8 = vmul.f32 %v3807_v63, %v2967_v6 }
 0xaea   : > { %v2972_v11 = vsel %vm2971_vm15, %v3807_v63, %v2968_v8 }
 0xaeb   : > { %v2973_v14 = vmul.f32 %v2972_v11, %v2956_v52 }
 0xaed   : > { %v2977_v15 = vmul.f32 %v3764_v10, %v2973_v14 }
 0xaef   : > { %v2981_v18 = vadd.f32 %v3765_v13, %v2977_v15 }
 0xaf1   : > { %v2982_v19 = vpack.c.bf16 %v2981_v18, %v2981_v18 }
 0xaf3   : > { %3602 = vmatmul.msk.bf16.vlgmr.msrb.gmra.mxu2 %vm1229_vm1, %v2982_v19 }
 0xb76   : > { %v3024_v24 = vpop.f32.mrf.mxu2 }
 0xb77   : > { %v3025_v25 = vadd.f32 %v3766_v23, %v3024_v24 }
 0xb79   : > { %v3028_v26 = vmax.f32 %v3025_v25, 0.0 }
 0xb7b   : > { %v3029_v27 = vpack.c.bf16 %v3028_v26, %v3028_v26 }
 0xb7d   : > { %3619 = vmatmul.msk.bf16.vlgmr.msra.gmra.mxu3 %vm3057_vm0, %v3029_v27 }
 0xb7e   : > { %v3026_v28 = vpop.f32.mrf.mxu2 }
 0xc00   : > { %v3070_v30 = vpop.f32.mrf.mxu3 }
 0xc01   : > { %v3071_v32 = vadd.f32 %v3767_v56, %v3070_v30 }
 0xc03   : > { %v3074_v33 = vadd.f32 %v3071_v32, %v2981_v18 }
 0xc05   : > { %v3077_v61 = vsel %vm1229_vm1, %v3074_v33, 0.0 }
 0xc06   : > { %3078 = vadd.xlane.f32.xlu0 %v3077_v61 }
 0xc08   : > { %v3072_v34 = vpop.f32.mrf.mxu3 }
 0xc79   : > { %v3079_v35 = vpop.xlane.xlu0 %3078 }
 0xc7a   : > { %v3080_v36 = vmul.f32 %v3079_v35, %v4713_v55 }
 0xc7c   : > { %v3081_v17 = vsub.f32 %v3074_v33, %v3080_v36 }
 0xc7e   : > { %v3082_v5 = vmul.f32 %v3081_v17, %v3081_v17 }
 0xc80   : > { %v3083_v2 = vsel %vm1229_vm1, %v3082_v5, 0.0 }
 0xc81   : > { %3084 = vadd.xlane.f32.xlu1 %v3083_v2 }
 0xcf4   : > { %v3085_v38 = vpop.xlane.xlu1 %3084 }
 0xcf5   : > { %v3086_v3 = vmul.f32 %v3085_v38, %v4713_v55  ;;  %v3769_v55 = vld [vmem:[%s1169_s21] ss:$0 sm:$0xff] }
 0xcf7   : > { %v3087_v39 = vadd.f32 1e-06, %v3086_v3 }
 0xcf9   : > { %3808 = vrsqrt.f32 %v3087_v39  ;;  %vm3094_vm3 = vweird.f32 %v3087_v39 }
 0xcff   : > { %v3809_v9 = vpop.eup %3808 }
 0xd00   : > { %v3089_v40 = vmul.f32 %v3809_v9, %v3087_v39  ;;  %vm3095_vm2 = vweird.f32 %v3809_v9 }
 0xd01   : > { %vm3096_vm1 = vmor %vm3094_vm3, %vm3095_vm2 }
 0xd02   : > { %v3090_v7 = vmul.f32 %v3809_v9, %v3089_v40 }
 0xd04   : > { %v3091_v41 = vmul.f32 0.5, %v3090_v7 }
 0xd06   : > { %v3092_v29 = vsub.f32 1.5, %v3091_v41 }
 0xd08   : > { %v3093_v42 = vmul.f32 %v3809_v9, %v3092_v29 }
 0xd0a   : > { %v3097_v37 = vsel %vm3096_vm1, %v3809_v9, %v3093_v42 }
 0xd0b   : > { %v3098_v43 = vmul.f32 %v3097_v37, %v3081_v17 }
 0xd0d   : > { %v3102_v44 = vmul.f32 %v3768_v12, %v3098_v43 }
 0xd0f   : > { %v3106_v45 = vadd.f32 %v3769_v55, %v3102_v44 }
 0xd11   : > { %v3107_v16 = vpack.c.bf16 %v3106_v45, %v3106_v45 }
 0xd13   : > { %3109 = vst.msk [vmem:[%s4456_s3] sm:$0xf] %vm3108_vm4, %v3107_v16 }
 0xd14 PF: > { %s5161_s17 = sld [smem:[#allocation20_spill]] }
 0xd15   : > { %s5162_s3 = sld [smem:[#allocation16_spill]] }
 0xd16   : > { %s5163_s28 = sld [smem:[#allocation17_spill]] }
 0xd17   : > { %s5164_s29 = sld [smem:[#allocation23_spill]] }
 0xd18   : > { %s5165_s30 = sld [smem:[#allocation18_spill]] }
 0xd19   : > { %s5166_s4 = sld [smem:[#allocation19_spill]] }
 0xd1a   : > { %s44_s1 = sadd.s32 1, %s5161_s17   ;;  %s5167_s0 = sld [smem:[#allocation21_spill]] }
 0xd1b   : > { %p41_p3 = scmp.ge.s32.totalorder %s44_s1, 6   ;;  %s5168_s23 = sld [smem:[#allocation22_spill]] }
 0xd1d   :  { %43 = sbr.rel (!%p41_p3) target bundleno = 34 (0x22), region = 261 }
 0xd22   :  { %3129 = vsyncpa [#allocation3], 1 }
 0xd23   :  { %3131 = vsyncpa [#allocation3 + $0x1], 1 }
 0xd24   :  { %3132 = vsyncpa [#allocation5], 1 }
 0xd25   :  { %3134 = vsyncpa [#allocation5 + $0x1], 1 }
 0xd26   :  { %3135 = vsyncpa [#allocation8], 1 }
 0xd27   :  { %3137 = vsyncpa [#allocation8 + $0x1], 1 }
 0xd28   :  { %3138 = vsyncpa [#allocation11], 1 }
 0xd29   :  { %3140 = vsyncpa [#allocation11 + $0x1], 1 }

</bundles_post_ra>
